<compile_context>
chip_gen: v6e
topology: v6e:2x2x1
jax: 0.10.0
libtpu: 0.0.40
codegen_flags: <defaults>
</compile_context>

<pallas_src>
import functools

import jax
import jax.numpy as jnp
from jax import lax
from jax.experimental import pallas as pl
from jax.experimental.pallas import tpu as pltpu


def _round_up(x, m):
    return (x + m - 1) // m * m


def _default_vmem_limit():
    # <=64 MiB everywhere: plenty for these tiles, and safe on v7x (64 MiB
    # physical VMEM); v5e/v6e (128 MiB) get the full 64 MiB.
    try:
        cap = pltpu.get_tpu_info().vmem_capacity_bytes
        return int(min(64 * 1024 * 1024, max(32 * 1024 * 1024, cap // 2)))
    except Exception:
        return 32 * 1024 * 1024


_VMEM_LIMIT = _default_vmem_limit()


# ----------------------------------------------------------------------------
# Pallas kernel 1: tiled matmul + bias (+ optional ReLU)  -- conv & LSTM x-proj
# ----------------------------------------------------------------------------
def _matmul_bias_kernel(x_ref, w_ref, b_ref, o_ref, acc_ref, *, relu):
    @pl.when(pl.program_id(2) == 0)
    def _():
        acc_ref[...] = jnp.zeros_like(acc_ref)

    acc_ref[...] += jnp.dot(x_ref[...], w_ref[...],
                            preferred_element_type=jnp.float32)

    @pl.when(pl.program_id(2) == pl.num_programs(2) - 1)
    def _():
        y = acc_ref[...] + b_ref[...]
        if relu:
            y = jnp.maximum(y, 0.0)
        o_ref[...] = y.astype(o_ref.dtype)


def matmul_bias(x, w, b, relu=False, out_dtype=jnp.float32,
                tm=512, tn=512, tk=512):
    # x: (M, K), w: (K, N), b: (1, N) f32.  Output (M, N) out_dtype.
    M, K = x.shape
    N = w.shape[1]
    tm = min(tm, _round_up(M, 8))
    tn = min(tn, _round_up(N, 128))
    if K < 128:
        # Full-extent K block: legal (block dim == array dim), avoids padding
        # e.g. K=10 of conv layer 1 up to 128 (12.8x zero DMA / MXU work).
        tk = K
    else:
        tk = min(tk, _round_up(K, 128))
    Mp, Np, Kp = _round_up(M, tm), _round_up(N, tn), _round_up(K, tk)
    if (Mp, Kp) != (M, K):
        x = jnp.pad(x, ((0, Mp - M), (0, Kp - K)))
    if (Kp, Np) != (K, N):
        w = jnp.pad(w, ((0, Kp - K), (0, Np - N)))
    if Np != N:
        b = jnp.pad(b, ((0, 0), (0, Np - N)))

    out = pl.pallas_call(
        functools.partial(_matmul_bias_kernel, relu=relu),
        out_shape=jax.ShapeDtypeStruct((Mp, Np), out_dtype),
        grid_spec=pltpu.PrefetchScalarGridSpec(
            num_scalar_prefetch=0,
            grid=(Mp // tm, Np // tn, Kp // tk),
            in_specs=[
                pl.BlockSpec((tm, tk), lambda i, j, k: (i, k)),
                pl.BlockSpec((tk, tn), lambda i, j, k: (k, j)),
                pl.BlockSpec((1, tn), lambda i, j, k: (0, j)),
            ],
            out_specs=pl.BlockSpec((tm, tn), lambda i, j, k: (i, j)),
            scratch_shapes=[pltpu.VMEM((tm, tn), jnp.float32)],
        ),
        compiler_params=pltpu.CompilerParams(
            dimension_semantics=("parallel", "parallel", "arbitrary"),
            vmem_limit_bytes=_VMEM_LIMIT),
    )(x, w, b)
    return out[:M, :N]


# ----------------------------------------------------------------------------
# Pallas kernel 2: LSTM recurrence (gate order i, f, g, o as torch.nn.LSTM).
# Input projection (x @ W_ih + b_ih + b_hh) is precomputed outside as `gx`.
# Batch-major: gx (B, T, 4H), output (B, T, H).
# ----------------------------------------------------------------------------
def _lstm_kernel(gx_ref, whh_ref, o_ref, h_scr, c_scr, *, hidden, tb):
    @pl.when(pl.program_id(1) == 0)
    def _():
        h_scr[...] = jnp.zeros_like(h_scr)
        c_scr[...] = jnp.zeros_like(c_scr)

    whh = whh_ref[...]                       # bf16 (H, 4H)
    gx = gx_ref[...].astype(jnp.float32)     # (bb, tb, 4H)

    h = h_scr[...]
    c = c_scr[...]
    for t in range(tb):                      # static trip count (tb <= 32)
        gates = gx[:, t, :] + jnp.dot(h.astype(whh.dtype), whh,
                                      preferred_element_type=jnp.float32)
        i = jax.nn.sigmoid(gates[:, 0 * hidden:1 * hidden])
        f = jax.nn.sigmoid(gates[:, 1 * hidden:2 * hidden])
        g = jnp.tanh(gates[:, 2 * hidden:3 * hidden])
        o = jax.nn.sigmoid(gates[:, 3 * hidden:4 * hidden])
        c = f * c + i * g
        h = o * jnp.tanh(c)
        o_ref[:, t, :] = h.astype(o_ref.dtype)
    h_scr[...] = h
    c_scr[...] = c


def lstm_forward(x_btd, w_ih, w_hh, b, out_dtype=jnp.bfloat16):
    # x_btd: (B, T, D) batch-major.  Returns (B, Tp, H) with Tp >= T.
    B, T, D = x_btd.shape
    H = w_hh.shape[0]

    # Hoisted input projection: one big MXU matmul over all timesteps (bf16
    # output halves the HBM writeback and the recurrence's per-step DMA).
    gx = matmul_bias(x_btd.reshape(B * T, D), w_ih, b,
                     relu=False, out_dtype=out_dtype)
    gx = gx.reshape(B, T, 4 * H)

    tb = min(T, 32)                      # timesteps per grid step
    Tp = _round_up(T, tb)
    if Tp != T:
        gx = jnp.pad(gx, ((0, 0), (0, Tp - T), (0, 0)))

    # Leading batch-block axis: on v7x the two TensorCores each take half the
    # batch ("parallel"); single block on small B (and on v5e/v6e it is free).
    nb = 2 if (B % 16 == 0) else 1
    bb = B // nb

    out = pl.pallas_call(
        functools.partial(_lstm_kernel, hidden=H, tb=tb),
        out_shape=jax.ShapeDtypeStruct((B, Tp, H), out_dtype),
        grid_spec=pltpu.PrefetchScalarGridSpec(
            num_scalar_prefetch=0,
            grid=(nb, Tp // tb),
            in_specs=[
                pl.BlockSpec((bb, tb, 4 * H), lambda bI, t: (bI, t, 0)),
                pl.BlockSpec((H, 4 * H), lambda bI, t: (0, 0)),
            ],
            out_specs=pl.BlockSpec((bb, tb, H), lambda bI, t: (bI, t, 0)),
            scratch_shapes=[pltpu.VMEM((bb, H), jnp.float32),
                            pltpu.VMEM((bb, H), jnp.float32)],
        ),
        compiler_params=pltpu.CompilerParams(
            dimension_semantics=("parallel", "arbitrary"),
            vmem_limit_bytes=_VMEM_LIMIT),
    )(gx, w_hh)
    return out


# ----------------------------------------------------------------------------
# Pallas kernel 3: SoftAttention + fused heads, tiled over time with an
# online-softmax accumulator.  score_t = v . tanh(W x_t + b)  (wavencoder
# SoftAttention form), attn = softmax over time, ctx = sum_t attn_t * x_t.
# Heads: [height, age, sigmoid(gender)] from one (H, 3) projection.
# ----------------------------------------------------------------------------
def _attn_heads_kernel(x_ref, wa_t_ref, ba_ref, v_ref, w_heads_ref, b_heads_ref,
                       out_ref, m_scr, den_scr, num_scr, *, seq_len):
    t_idx = pl.program_id(1)
    bb, tt, H = x_ref.shape

    @pl.when(t_idx == 0)
    def _():
        m_scr[...] = jnp.full_like(m_scr, -jnp.inf)
        den_scr[...] = jnp.zeros_like(den_scr)
        num_scr[...] = jnp.zeros_like(num_scr)

    x = x_ref[...]                                           # bf16 (bb, tt, H)
    xf = x.reshape(bb * tt, H)
    h_att = jnp.tanh(
        jnp.dot(xf, wa_t_ref[...], preferred_element_type=jnp.float32)
        + ba_ref[...])                                       # (bb*tt, A) on MXU
    # v-dot as VPU multiply + lane reduce (avoids an N=1 MXU op).
    s = jnp.sum(h_att * v_ref[...], axis=-1, keepdims=True)  # (bb*tt, 1)
    s = s.reshape(bb, tt, 1)

    # mask padded timesteps of the last tile
    t_pos = t_idx * tt + lax.broadcasted_iota(jnp.int32, (1, tt, 1), 1)
    s = jnp.where(t_pos < seq_len, s, -jnp.inf)

    # online softmax over time
    m_prev = m_scr[...]                                      # (bb, 1, 1)
    m_new = jnp.maximum(m_prev, jnp.max(s, axis=1, keepdims=True))
    alpha = jnp.exp(m_prev - m_new)
    p = jnp.exp(s - m_new)                                   # (bb, tt, 1)
    den_scr[...] = alpha * den_scr[...] + jnp.sum(p, axis=1, keepdims=True)
    num_scr[...] = alpha * num_scr[...] + jnp.sum(
        p * x.astype(jnp.float32), axis=1, keepdims=True)
    m_scr[...] = m_new

    @pl.when(t_idx == pl.num_programs(1) - 1)
    def _():
        ctx = (num_scr[...] / den_scr[...]).reshape(bb, H)   # exact division
        heads = (jnp.dot(ctx, w_heads_ref[...],
                         preferred_element_type=jnp.float32)
                 + b_heads_ref[...])                         # (bb, 3)
        lane = lax.broadcasted_iota(jnp.int32, heads.shape, 1)
        out_ref[...] = jnp.where(lane == 2, jax.nn.sigmoid(heads),
                                 heads).astype(out_ref.dtype)


def attention_and_heads(x_bth, seq_len, wa_t, ba, v_row, w_heads, b_heads):
    B, Tcur, H = x_bth.shape
    A = wa_t.shape[1]
    tt = min(128, _round_up(Tcur, 8))    # time tile (VMEM-safe on v7x too)
    Tp = _round_up(Tcur, tt)
    if Tp != Tcur:
        x_bth = jnp.pad(x_bth, ((0, 0), (0, Tp - Tcur), (0, 0)))

    nb = 2 if (B % 16 == 0) else 1
    bb = B // nb

    res = pl.pallas_call(
        functools.partial(_attn_heads_kernel, seq_len=seq_len),
        out_shape=jax.ShapeDtypeStruct((B, 3), jnp.float32),
        grid_spec=pltpu.PrefetchScalarGridSpec(
            num_scalar_prefetch=0,
            grid=(nb, Tp // tt),
            in_specs=[
                pl.BlockSpec((bb, tt, H), lambda bI, t: (bI, t, 0)),
                pl.BlockSpec((H, A), lambda bI, t: (0, 0)),
                pl.BlockSpec((1, A), lambda bI, t: (0, 0)),
                pl.BlockSpec((1, A), lambda bI, t: (0, 0)),
                pl.BlockSpec((H, 3), lambda bI, t: (0, 0)),
                pl.BlockSpec((1, 3), lambda bI, t: (0, 0)),
            ],
            out_specs=pl.BlockSpec((bb, 3), lambda bI, t: (bI, 0)),
            scratch_shapes=[pltpu.VMEM((bb, 1, 1), jnp.float32),
                            pltpu.VMEM((bb, 1, 1), jnp.float32),
                            pltpu.VMEM((bb, 1, H), jnp.float32)],
        ),
        compiler_params=pltpu.CompilerParams(
            dimension_semantics=("parallel", "arbitrary"),
            vmem_limit_bytes=_VMEM_LIMIT),
    )(x_bth, wa_t, ba, v_row, w_heads, b_heads)
    return res[:, 0:1], res[:, 1:2], res[:, 2:3]


# ----------------------------------------------------------------------------
# Glue: im2col for Conv1d in (B, T, C) layout, parameter init/prep, forward
# ----------------------------------------------------------------------------
# wav2vec feature-extractor conv schedule: (kernel, stride) per layer
CONV_CFG = [(10, 5), (8, 4), (4, 2), (4, 2), (4, 2), (1, 1), (1, 1)]


def im2col_1d_btc(x, k, s):
    # x: (B, T, C) -> patches (B, T_out, k*C) via k strided slices (no gather).
    B, T, C = x.shape
    T_out = (T - k) // s + 1
    if k == 1 and s == 1:
        return x
    cols = [lax.slice(x, (0, j, 0), (B, j + (T_out - 1) * s + 1, C), (1, s, 1))
            for j in range(k)]
    return jnp.concatenate(cols, axis=-1)


def _uniform(key, shape, scale):
    return jax.random.uniform(key, shape, jnp.float32, -scale, scale)


def init_params(key, conv_dim, lstm_h):
    keys = jax.random.split(key, 32)
    ki = iter(keys)
    params = {}

    # encoder conv layers (synthetic, deterministic); weight layout (k*C_in, C_out)
    conv = []
    c_in = 1
    for (k, _s) in CONV_CFG:
        scale = 1.0 / (c_in * k) ** 0.5
        w = _uniform(next(ki), (k * c_in, conv_dim), scale)
        b = _uniform(next(ki), (1, conv_dim), scale)
        conv.append((w, b))
        c_in = conv_dim
    params["conv"] = conv

    # LSTM (input = conv_dim, hidden = lstm_h); bias stands for b_ih + b_hh
    s = 1.0 / lstm_h ** 0.5
    params["w_ih"] = _uniform(next(ki), (conv_dim, 4 * lstm_h), s)
    params["w_hh"] = _uniform(next(ki), (lstm_h, 4 * lstm_h), s)
    params["b_lstm"] = _uniform(next(ki), (1, 4 * lstm_h), s)

    # SoftAttention(lstm_h, lstm_h): W torch layout (attn_dim, emb_dim), bias, v
    params["wa"] = _uniform(next(ki), (lstm_h, lstm_h), s)
    params["ba"] = _uniform(next(ki), (1, lstm_h), s)
    params["v"] = _uniform(next(ki), (1, lstm_h), s)

    # heads
    params["wh"] = _uniform(next(ki), (lstm_h, 1), s)
    params["bh"] = _uniform(next(ki), (1, 1), s)
    params["wage"] = _uniform(next(ki), (lstm_h, 1), s)
    params["bage"] = _uniform(next(ki), (1, 1), s)
    params["wg"] = _uniform(next(ki), (lstm_h, 1), s)
    params["bg"] = _uniform(next(ki), (1, 1), s)
    return params


def prepare_params(params, compute_dtype=jnp.bfloat16):
    # One-time weight prep (casts / fusions) OUTSIDE the jitted forward so
    # no per-call HBM pass is spent re-casting weights.
    prep = {
        "conv": [(w.astype(compute_dtype), b) for (w, b) in params["conv"]],
        "w_ih": params["w_ih"].astype(compute_dtype),
        "w_hh": params["w_hh"].astype(compute_dtype),
        "b_lstm": params["b_lstm"],
        "wa_t": params["wa"].T.astype(compute_dtype),         # (H, A)
        "ba": params["ba"],                                    # (1, A) f32
        "v_row": params["v"].reshape(1, -1),                   # (1, A) f32
        "w_heads": jnp.concatenate(
            [params["wh"], params["wage"], params["wg"]], axis=1),   # (H, 3)
        "b_heads": jnp.concatenate(
            [params["bh"], params["bage"], params["bg"]], axis=1),   # (1, 3)
    }
    return prep


def wav2vec_lstm_forward(x, prep, compute_dtype=jnp.bfloat16):
    # x: (B, 1, L) raw waveform.  Conv trunk kept in (B, T, C) layout; the
    # LSTM and attention are batch-major too -> no full-tensor transposes.
    B = x.shape[0]
    feat = jnp.transpose(x, (0, 2, 1)).astype(compute_dtype)         # (B, L, 1)
    for (w, b), (k, s) in zip(prep["conv"], CONV_CFG):
        p3 = im2col_1d_btc(feat, k, s)                               # (B, T_out, k*C)
        T_out, KC = p3.shape[1], p3.shape[2]
        y = matmul_bias(p3.reshape(B * T_out, KC), w, b,
                        relu=True, out_dtype=compute_dtype)          # (B*T_out, C)
        feat = y.reshape(B, T_out, -1)                               # stay (B, T, C)

    # PyTorch: encoder output (B, C, T).transpose(1, 2) -> (B, T, C); already there.
    T = feat.shape[1]
    out_bth = lstm_forward(feat, prep["w_ih"], prep["w_hh"], prep["b_lstm"],
                           out_dtype=compute_dtype)                  # (B, Tp, H)

    height, age, gender = attention_and_heads(
        out_bth, T, prep["wa_t"], prep["ba"], prep["v_row"],
        prep["w_heads"], prep["b_heads"])
    return height, age, gender


if __name__ == "__main__":
    B = 2
    L = 1600            # -> 8 time steps after the wav2vec conv schedule
    CONV_DIM = 16       # stands in for lstm_inp=512 at small scale
    LSTM_H = 32

    key = jax.random.PRNGKey(0)
    k_param, k_x = jax.random.split(key)
    params = init_params(k_param, CONV_DIM, LSTM_H)
    prep = prepare_params(params, jnp.bfloat16)
    x = jax.random.normal(k_x, (B, 1, L), dtype=jnp.float32)

    fwd = jax.jit(functools.partial(wav2vec_lstm_forward,
                                    compute_dtype=jnp.bfloat16))
    height, age, gender = fwd(x, prep)
    jax.block_until_ready((height, age, gender))

    assert height.shape == (B, 1) and age.shape == (B, 1) and gender.shape == (B, 1)
    assert bool(jnp.all(jnp.isfinite(height)))
    assert bool(jnp.all(jnp.isfinite(age)))
    assert bool(jnp.all((gender >= 0.0) & (gender <= 1.0)))
    print("KERNEL_OK")
</pallas_src>

<mosaic_0001>
module attributes {stable_mosaic.version = 11 : i64} {
  func.func @_matmul_bias_kernel(%arg0: i32, %arg1: i32, %arg2: i32, %arg3: memref<512x10xbf16, #tpu.memory_space<vmem>>, %arg4: memref<10x128xbf16, #tpu.memory_space<vmem>>, %arg5: memref<1x128xf32, #tpu.memory_space<vmem>>, %arg6: memref<512x128xbf16, #tpu.memory_space<vmem>>, %arg7: memref<512x128xf32, #tpu.memory_space<vmem>>) attributes {dimension_semantics = [#tpu.dimension_semantics<parallel>, #tpu.dimension_semantics<parallel>, #tpu.dimension_semantics<arbitrary>], iteration_bounds = array<i64: 2, 1, 1>, scalar_prefetch = 0 : i64, scratch_operands = 1 : i64, tpu.core_type = #tpu.core_type<tc>, window_params = [{transform_indices = @transform_0, window_bounds = array<i64: 512, 10>}, {transform_indices = @transform_1, window_bounds = array<i64: 10, 128>}, {transform_indices = @transform_2, window_bounds = array<i64: 1, 128>}, {transform_indices = @transform_3, window_bounds = array<i64: 512, 128>}]} {
    %c0_i32 = arith.constant 0 : i32
    %0 = arith.cmpi eq, %arg2, %c0_i32 : i32
    %1 = arith.extui %0 : i1 to i32
    %c0_i32_0 = arith.constant 0 : i32
    %2 = arith.cmpi ne, %1, %c0_i32_0 : i32
    scf.if %2 {
      %cst_10 = arith.constant 0.000000e+00 : f32
      %12 = vector.broadcast %cst_10 : f32 to vector<512x128xf32>
      %c0_11 = arith.constant 0 : index
      %c0_12 = arith.constant 0 : index
      %13 = vector.load %arg7[%c0_11, %c0_12] : memref<512x128xf32, #tpu.memory_space<vmem>>, vector<512x128xf32>
      tpu.vector_store %arg7[%c0_11, %c0_12], %12 {strides = array<i32>} : memref<512x128xf32, #tpu.memory_space<vmem>>, vector<512x128xf32>,
    } else {
    }
    %c0 = arith.constant 0 : index
    %c0_1 = arith.constant 0 : index
    %3 = vector.load %arg7[%c0, %c0_1] : memref<512x128xf32, #tpu.memory_space<vmem>>, vector<512x128xf32>
    %c0_2 = arith.constant 0 : index
    %c0_3 = arith.constant 0 : index
    %4 = vector.load %arg3[%c0_2, %c0_3] : memref<512x10xbf16, #tpu.memory_space<vmem>>, vector<512x10xbf16>
    %c0_4 = arith.constant 0 : index
    %c0_5 = arith.constant 0 : index
    %5 = vector.load %arg4[%c0_4, %c0_5] : memref<10x128xbf16, #tpu.memory_space<vmem>>, vector<10x128xbf16>
    %cst = arith.constant dense<0.000000e+00> : vector<512x128xf32>
    %6 = tpu.matmul %4, %5, %cst {dimension_numbers = #tpu.dot_dimension_numbers<[1], [0], [0], [1], [0, 0, 1, 1], [], []>} : vector<512x10xbf16>, vector<10x128xbf16>, vector<512x128xf32> -> vector<512x128xf32>
    %7 = arith.addf %3, %6 : vector<512x128xf32>
    %c0_6 = arith.constant 0 : index
    %c0_7 = arith.constant 0 : index
    %8 = vector.load %arg7[%c0_6, %c0_7] : memref<512x128xf32, #tpu.memory_space<vmem>>, vector<512x128xf32>
    tpu.vector_store %arg7[%c0_6, %c0_7], %7 {strides = array<i32>} : memref<512x128xf32, #tpu.memory_space<vmem>>, vector<512x128xf32>,
    %c0_i32_8 = arith.constant 0 : i32
    %9 = arith.cmpi eq, %arg2, %c0_i32_8 : i32
    %10 = arith.extui %9 : i1 to i32
    %c0_i32_9 = arith.constant 0 : i32
    %11 = arith.cmpi ne, %10, %c0_i32_9 : i32
    scf.if %11 {
      %c0_10 = arith.constant 0 : index
      %c0_11 = arith.constant 0 : index
      %12 = vector.load %arg7[%c0_10, %c0_11] : memref<512x128xf32, #tpu.memory_space<vmem>>, vector<512x128xf32>
      %c0_12 = arith.constant 0 : index
      %c0_13 = arith.constant 0 : index
      %13 = vector.load %arg5[%c0_12, %c0_13] : memref<1x128xf32, #tpu.memory_space<vmem>>, vector<1x128xf32>
      %14 = vector.broadcast %13 : vector<1x128xf32> to vector<512x128xf32>
      %15 = arith.addf %12, %14 : vector<512x128xf32>
      %cst_14 = arith.constant 0.000000e+00 : f32
      %16 = vector.broadcast %cst_14 : f32 to vector<512x128xf32>
      %17 = arith.maximumf %15, %16 : vector<512x128xf32>
      %18 = arith.truncf %17 : vector<512x128xf32> to vector<512x128xbf16>
      %c0_15 = arith.constant 0 : index
      %c0_16 = arith.constant 0 : index
      %19 = vector.load %arg6[%c0_15, %c0_16] : memref<512x128xbf16, #tpu.memory_space<vmem>>, vector<512x128xbf16>
      tpu.vector_store %arg6[%c0_15, %c0_16], %18 {strides = array<i32>} : memref<512x128xbf16, #tpu.memory_space<vmem>>, vector<512x128xbf16>,
    } else {
    }
    return
  }
  func.func @transform_0(%arg0: i32, %arg1: i32, %arg2: i32) -> (i32, i32) {
    %c0_i32 = arith.constant 0 : i32
    return %arg0, %arg2 : i32, i32
  }
  func.func @transform_1(%arg0: i32, %arg1: i32, %arg2: i32) -> (i32, i32) {
    %c0_i32 = arith.constant 0 : i32
    return %arg2, %arg1 : i32, i32
  }
  func.func @transform_2(%arg0: i32, %arg1: i32, %arg2: i32) -> (i32, i32) {
    %c0_i32 = arith.constant 0 : i32
    %c0_i32_0 = arith.constant 0 : i32
    return %c0_i32, %arg1 : i32, i32
  }
  func.func @transform_3(%arg0: i32, %arg1: i32, %arg2: i32) -> (i32, i32) {
    %c0_i32 = arith.constant 0 : i32
    return %arg0, %arg1 : i32, i32
  }
}

module attributes {stable_mosaic.version = 11 : i64} {
  func.func @_matmul_bias_kernel(%arg0: i32, %arg1: i32, %arg2: i32, %arg3: memref<160x128xbf16, #tpu.memory_space<vmem>>, %arg4: memref<128x128xbf16, #tpu.memory_space<vmem>>, %arg5: memref<1x128xf32, #tpu.memory_space<vmem>>, %arg6: memref<160x128xbf16, #tpu.memory_space<vmem>>, %arg7: memref<160x128xf32, #tpu.memory_space<vmem>>) attributes {dimension_semantics = [#tpu.dimension_semantics<parallel>, #tpu.dimension_semantics<parallel>, #tpu.dimension_semantics<arbitrary>], iteration_bounds = array<i64: 1, 1, 1>, scalar_prefetch = 0 : i64, scratch_operands = 1 : i64, tpu.core_type = #tpu.core_type<tc>, window_params = [{transform_indices = @transform_0, window_bounds = array<i64: 160, 128>}, {transform_indices = @transform_1, window_bounds = array<i64: 128, 128>}, {transform_indices = @transform_2, window_bounds = array<i64: 1, 128>}, {transform_indices = @transform_3, window_bounds = array<i64: 160, 128>}]} {
    %c0_i32 = arith.constant 0 : i32
    %0 = arith.cmpi eq, %arg2, %c0_i32 : i32
    %1 = arith.extui %0 : i1 to i32
    %c0_i32_0 = arith.constant 0 : i32
    %2 = arith.cmpi ne, %1, %c0_i32_0 : i32
    scf.if %2 {
      %cst_10 = arith.constant 0.000000e+00 : f32
      %12 = vector.broadcast %cst_10 : f32 to vector<160x128xf32>
      %c0_11 = arith.constant 0 : index
      %c0_12 = arith.constant 0 : index
      %13 = vector.load %arg7[%c0_11, %c0_12] : memref<160x128xf32, #tpu.memory_space<vmem>>, vector<160x128xf32>
      tpu.vector_store %arg7[%c0_11, %c0_12], %12 {strides = array<i32>} : memref<160x128xf32, #tpu.memory_space<vmem>>, vector<160x128xf32>,
    } else {
    }
    %c0 = arith.constant 0 : index
    %c0_1 = arith.constant 0 : index
    %3 = vector.load %arg7[%c0, %c0_1] : memref<160x128xf32, #tpu.memory_space<vmem>>, vector<160x128xf32>
    %c0_2 = arith.constant 0 : index
    %c0_3 = arith.constant 0 : index
    %4 = vector.load %arg3[%c0_2, %c0_3] : memref<160x128xbf16, #tpu.memory_space<vmem>>, vector<160x128xbf16>
    %c0_4 = arith.constant 0 : index
    %c0_5 = arith.constant 0 : index
    %5 = vector.load %arg4[%c0_4, %c0_5] : memref<128x128xbf16, #tpu.memory_space<vmem>>, vector<128x128xbf16>
    %cst = arith.constant dense<0.000000e+00> : vector<160x128xf32>
    %6 = tpu.matmul %4, %5, %cst {dimension_numbers = #tpu.dot_dimension_numbers<[1], [0], [0], [1], [0, 0, 1, 1], [], []>} : vector<160x128xbf16>, vector<128x128xbf16>, vector<160x128xf32> -> vector<160x128xf32>
    %7 = arith.addf %3, %6 : vector<160x128xf32>
    %c0_6 = arith.constant 0 : index
    %c0_7 = arith.constant 0 : index
    %8 = vector.load %arg7[%c0_6, %c0_7] : memref<160x128xf32, #tpu.memory_space<vmem>>, vector<160x128xf32>
    tpu.vector_store %arg7[%c0_6, %c0_7], %7 {strides = array<i32>} : memref<160x128xf32, #tpu.memory_space<vmem>>, vector<160x128xf32>,
    %c0_i32_8 = arith.constant 0 : i32
    %9 = arith.cmpi eq, %arg2, %c0_i32_8 : i32
    %10 = arith.extui %9 : i1 to i32
    %c0_i32_9 = arith.constant 0 : i32
    %11 = arith.cmpi ne, %10, %c0_i32_9 : i32
    scf.if %11 {
      %c0_10 = arith.constant 0 : index
      %c0_11 = arith.constant 0 : index
      %12 = vector.load %arg7[%c0_10, %c0_11] : memref<160x128xf32, #tpu.memory_space<vmem>>, vector<160x128xf32>
      %c0_12 = arith.constant 0 : index
      %c0_13 = arith.constant 0 : index
      %13 = vector.load %arg5[%c0_12, %c0_13] : memref<1x128xf32, #tpu.memory_space<vmem>>, vector<1x128xf32>
      %14 = vector.broadcast %13 : vector<1x128xf32> to vector<160x128xf32>
      %15 = arith.addf %12, %14 : vector<160x128xf32>
      %cst_14 = arith.constant 0.000000e+00 : f32
      %16 = vector.broadcast %cst_14 : f32 to vector<160x128xf32>
      %17 = arith.maximumf %15, %16 : vector<160x128xf32>
      %18 = arith.truncf %17 : vector<160x128xf32> to vector<160x128xbf16>
      %c0_15 = arith.constant 0 : index
      %c0_16 = arith.constant 0 : index
      %19 = vector.load %arg6[%c0_15, %c0_16] : memref<160x128xbf16, #tpu.memory_space<vmem>>, vector<160x128xbf16>
      tpu.vector_store %arg6[%c0_15, %c0_16], %18 {strides = array<i32>} : memref<160x128xbf16, #tpu.memory_space<vmem>>, vector<160x128xbf16>,
    } else {
    }
    return
  }
  func.func @transform_0(%arg0: i32, %arg1: i32, %arg2: i32) -> (i32, i32) {
    %c0_i32 = arith.constant 0 : i32
    return %arg0, %arg2 : i32, i32
  }
  func.func @transform_1(%arg0: i32, %arg1: i32, %arg2: i32) -> (i32, i32) {
    %c0_i32 = arith.constant 0 : i32
    return %arg2, %arg1 : i32, i32
  }
  func.func @transform_2(%arg0: i32, %arg1: i32, %arg2: i32) -> (i32, i32) {
    %c0_i32 = arith.constant 0 : i32
    %c0_i32_0 = arith.constant 0 : i32
    return %c0_i32, %arg1 : i32, i32
  }
  func.func @transform_3(%arg0: i32, %arg1: i32, %arg2: i32) -> (i32, i32) {
    %c0_i32 = arith.constant 0 : i32
    return %arg0, %arg1 : i32, i32
  }
}

module attributes {stable_mosaic.version = 11 : i64} {
  func.func @_matmul_bias_kernel(%arg0: i32, %arg1: i32, %arg2: i32, %arg3: memref<80x64xbf16, #tpu.memory_space<vmem>>, %arg4: memref<64x128xbf16, #tpu.memory_space<vmem>>, %arg5: memref<1x128xf32, #tpu.memory_space<vmem>>, %arg6: memref<80x128xbf16, #tpu.memory_space<vmem>>, %arg7: memref<80x128xf32, #tpu.memory_space<vmem>>) attributes {dimension_semantics = [#tpu.dimension_semantics<parallel>, #tpu.dimension_semantics<parallel>, #tpu.dimension_semantics<arbitrary>], iteration_bounds = array<i64: 1, 1, 1>, scalar_prefetch = 0 : i64, scratch_operands = 1 : i64, tpu.core_type = #tpu.core_type<tc>, window_params = [{transform_indices = @transform_0, window_bounds = array<i64: 80, 64>}, {transform_indices = @transform_1, window_bounds = array<i64: 64, 128>}, {transform_indices = @transform_2, window_bounds = array<i64: 1, 128>}, {transform_indices = @transform_3, window_bounds = array<i64: 80, 128>}]} {
    %c0_i32 = arith.constant 0 : i32
    %0 = arith.cmpi eq, %arg2, %c0_i32 : i32
    %1 = arith.extui %0 : i1 to i32
    %c0_i32_0 = arith.constant 0 : i32
    %2 = arith.cmpi ne, %1, %c0_i32_0 : i32
    scf.if %2 {
      %cst_10 = arith.constant 0.000000e+00 : f32
      %12 = vector.broadcast %cst_10 : f32 to vector<80x128xf32>
      %c0_11 = arith.constant 0 : index
      %c0_12 = arith.constant 0 : index
      %13 = vector.load %arg7[%c0_11, %c0_12] : memref<80x128xf32, #tpu.memory_space<vmem>>, vector<80x128xf32>
      tpu.vector_store %arg7[%c0_11, %c0_12], %12 {strides = array<i32>} : memref<80x128xf32, #tpu.memory_space<vmem>>, vector<80x128xf32>,
    } else {
    }
    %c0 = arith.constant 0 : index
    %c0_1 = arith.constant 0 : index
    %3 = vector.load %arg7[%c0, %c0_1] : memref<80x128xf32, #tpu.memory_space<vmem>>, vector<80x128xf32>
    %c0_2 = arith.constant 0 : index
    %c0_3 = arith.constant 0 : index
    %4 = vector.load %arg3[%c0_2, %c0_3] : memref<80x64xbf16, #tpu.memory_space<vmem>>, vector<80x64xbf16>
    %c0_4 = arith.constant 0 : index
    %c0_5 = arith.constant 0 : index
    %5 = vector.load %arg4[%c0_4, %c0_5] : memref<64x128xbf16, #tpu.memory_space<vmem>>, vector<64x128xbf16>
    %cst = arith.constant dense<0.000000e+00> : vector<80x128xf32>
    %6 = tpu.matmul %4, %5, %cst {dimension_numbers = #tpu.dot_dimension_numbers<[1], [0], [0], [1], [0, 0, 1, 1], [], []>} : vector<80x64xbf16>, vector<64x128xbf16>, vector<80x128xf32> -> vector<80x128xf32>
    %7 = arith.addf %3, %6 : vector<80x128xf32>
    %c0_6 = arith.constant 0 : index
    %c0_7 = arith.constant 0 : index
    %8 = vector.load %arg7[%c0_6, %c0_7] : memref<80x128xf32, #tpu.memory_space<vmem>>, vector<80x128xf32>
    tpu.vector_store %arg7[%c0_6, %c0_7], %7 {strides = array<i32>} : memref<80x128xf32, #tpu.memory_space<vmem>>, vector<80x128xf32>,
    %c0_i32_8 = arith.constant 0 : i32
    %9 = arith.cmpi eq, %arg2, %c0_i32_8 : i32
    %10 = arith.extui %9 : i1 to i32
    %c0_i32_9 = arith.constant 0 : i32
    %11 = arith.cmpi ne, %10, %c0_i32_9 : i32
    scf.if %11 {
      %c0_10 = arith.constant 0 : index
      %c0_11 = arith.constant 0 : index
      %12 = vector.load %arg7[%c0_10, %c0_11] : memref<80x128xf32, #tpu.memory_space<vmem>>, vector<80x128xf32>
      %c0_12 = arith.constant 0 : index
      %c0_13 = arith.constant 0 : index
      %13 = vector.load %arg5[%c0_12, %c0_13] : memref<1x128xf32, #tpu.memory_space<vmem>>, vector<1x128xf32>
      %14 = vector.broadcast %13 : vector<1x128xf32> to vector<80x128xf32>
      %15 = arith.addf %12, %14 : vector<80x128xf32>
      %cst_14 = arith.constant 0.000000e+00 : f32
      %16 = vector.broadcast %cst_14 : f32 to vector<80x128xf32>
      %17 = arith.maximumf %15, %16 : vector<80x128xf32>
      %18 = arith.truncf %17 : vector<80x128xf32> to vector<80x128xbf16>
      %c0_15 = arith.constant 0 : index
      %c0_16 = arith.constant 0 : index
      %19 = vector.load %arg6[%c0_15, %c0_16] : memref<80x128xbf16, #tpu.memory_space<vmem>>, vector<80x128xbf16>
      tpu.vector_store %arg6[%c0_15, %c0_16], %18 {strides = array<i32>} : memref<80x128xbf16, #tpu.memory_space<vmem>>, vector<80x128xbf16>,
    } else {
    }
    return
  }
  func.func @transform_0(%arg0: i32, %arg1: i32, %arg2: i32) -> (i32, i32) {
    %c0_i32 = arith.constant 0 : i32
    return %arg0, %arg2 : i32, i32
  }
  func.func @transform_1(%arg0: i32, %arg1: i32, %arg2: i32) -> (i32, i32) {
    %c0_i32 = arith.constant 0 : i32
    return %arg2, %arg1 : i32, i32
  }
  func.func @transform_2(%arg0: i32, %arg1: i32, %arg2: i32) -> (i32, i32) {
    %c0_i32 = arith.constant 0 : i32
    %c0_i32_0 = arith.constant 0 : i32
    return %c0_i32, %arg1 : i32, i32
  }
  func.func @transform_3(%arg0: i32, %arg1: i32, %arg2: i32) -> (i32, i32) {
    %c0_i32 = arith.constant 0 : i32
    return %arg0, %arg1 : i32, i32
  }
}

module attributes {stable_mosaic.version = 11 : i64} {
  func.func @_matmul_bias_kernel(%arg0: i32, %arg1: i32, %arg2: i32, %arg3: memref<40x64xbf16, #tpu.memory_space<vmem>>, %arg4: memref<64x128xbf16, #tpu.memory_space<vmem>>, %arg5: memref<1x128xf32, #tpu.memory_space<vmem>>, %arg6: memref<40x128xbf16, #tpu.memory_space<vmem>>, %arg7: memref<40x128xf32, #tpu.memory_space<vmem>>) attributes {dimension_semantics = [#tpu.dimension_semantics<parallel>, #tpu.dimension_semantics<parallel>, #tpu.dimension_semantics<arbitrary>], iteration_bounds = array<i64: 1, 1, 1>, scalar_prefetch = 0 : i64, scratch_operands = 1 : i64, tpu.core_type = #tpu.core_type<tc>, window_params = [{transform_indices = @transform_0, window_bounds = array<i64: 40, 64>}, {transform_indices = @transform_1, window_bounds = array<i64: 64, 128>}, {transform_indices = @transform_2, window_bounds = array<i64: 1, 128>}, {transform_indices = @transform_3, window_bounds = array<i64: 40, 128>}]} {
    %c0_i32 = arith.constant 0 : i32
    %0 = arith.cmpi eq, %arg2, %c0_i32 : i32
    %1 = arith.extui %0 : i1 to i32
    %c0_i32_0 = arith.constant 0 : i32
    %2 = arith.cmpi ne, %1, %c0_i32_0 : i32
    scf.if %2 {
      %cst_10 = arith.constant 0.000000e+00 : f32
      %12 = vector.broadcast %cst_10 : f32 to vector<40x128xf32>
      %c0_11 = arith.constant 0 : index
      %c0_12 = arith.constant 0 : index
      %13 = vector.load %arg7[%c0_11, %c0_12] : memref<40x128xf32, #tpu.memory_space<vmem>>, vector<40x128xf32>
      tpu.vector_store %arg7[%c0_11, %c0_12], %12 {strides = array<i32>} : memref<40x128xf32, #tpu.memory_space<vmem>>, vector<40x128xf32>,
    } else {
    }
    %c0 = arith.constant 0 : index
    %c0_1 = arith.constant 0 : index
    %3 = vector.load %arg7[%c0, %c0_1] : memref<40x128xf32, #tpu.memory_space<vmem>>, vector<40x128xf32>
    %c0_2 = arith.constant 0 : index
    %c0_3 = arith.constant 0 : index
    %4 = vector.load %arg3[%c0_2, %c0_3] : memref<40x64xbf16, #tpu.memory_space<vmem>>, vector<40x64xbf16>
    %c0_4 = arith.constant 0 : index
    %c0_5 = arith.constant 0 : index
    %5 = vector.load %arg4[%c0_4, %c0_5] : memref<64x128xbf16, #tpu.memory_space<vmem>>, vector<64x128xbf16>
    %cst = arith.constant dense<0.000000e+00> : vector<40x128xf32>
    %6 = tpu.matmul %4, %5, %cst {dimension_numbers = #tpu.dot_dimension_numbers<[1], [0], [0], [1], [0, 0, 1, 1], [], []>} : vector<40x64xbf16>, vector<64x128xbf16>, vector<40x128xf32> -> vector<40x128xf32>
    %7 = arith.addf %3, %6 : vector<40x128xf32>
    %c0_6 = arith.constant 0 : index
    %c0_7 = arith.constant 0 : index
    %8 = vector.load %arg7[%c0_6, %c0_7] : memref<40x128xf32, #tpu.memory_space<vmem>>, vector<40x128xf32>
    tpu.vector_store %arg7[%c0_6, %c0_7], %7 {strides = array<i32>} : memref<40x128xf32, #tpu.memory_space<vmem>>, vector<40x128xf32>,
    %c0_i32_8 = arith.constant 0 : i32
    %9 = arith.cmpi eq, %arg2, %c0_i32_8 : i32
    %10 = arith.extui %9 : i1 to i32
    %c0_i32_9 = arith.constant 0 : i32
    %11 = arith.cmpi ne, %10, %c0_i32_9 : i32
    scf.if %11 {
      %c0_10 = arith.constant 0 : index
      %c0_11 = arith.constant 0 : index
      %12 = vector.load %arg7[%c0_10, %c0_11] : memref<40x128xf32, #tpu.memory_space<vmem>>, vector<40x128xf32>
      %c0_12 = arith.constant 0 : index
      %c0_13 = arith.constant 0 : index
      %13 = vector.load %arg5[%c0_12, %c0_13] : memref<1x128xf32, #tpu.memory_space<vmem>>, vector<1x128xf32>
      %14 = vector.broadcast %13 : vector<1x128xf32> to vector<40x128xf32>
      %15 = arith.addf %12, %14 : vector<40x128xf32>
      %cst_14 = arith.constant 0.000000e+00 : f32
      %16 = vector.broadcast %cst_14 : f32 to vector<40x128xf32>
      %17 = arith.maximumf %15, %16 : vector<40x128xf32>
      %18 = arith.truncf %17 : vector<40x128xf32> to vector<40x128xbf16>
      %c0_15 = arith.constant 0 : index
      %c0_16 = arith.constant 0 : index
      %19 = vector.load %arg6[%c0_15, %c0_16] : memref<40x128xbf16, #tpu.memory_space<vmem>>, vector<40x128xbf16>
      tpu.vector_store %arg6[%c0_15, %c0_16], %18 {strides = array<i32>} : memref<40x128xbf16, #tpu.memory_space<vmem>>, vector<40x128xbf16>,
    } else {
    }
    return
  }
  func.func @transform_0(%arg0: i32, %arg1: i32, %arg2: i32) -> (i32, i32) {
    %c0_i32 = arith.constant 0 : i32
    return %arg0, %arg2 : i32, i32
  }
  func.func @transform_1(%arg0: i32, %arg1: i32, %arg2: i32) -> (i32, i32) {
    %c0_i32 = arith.constant 0 : i32
    return %arg2, %arg1 : i32, i32
  }
  func.func @transform_2(%arg0: i32, %arg1: i32, %arg2: i32) -> (i32, i32) {
    %c0_i32 = arith.constant 0 : i32
    %c0_i32_0 = arith.constant 0 : i32
    return %c0_i32, %arg1 : i32, i32
  }
  func.func @transform_3(%arg0: i32, %arg1: i32, %arg2: i32) -> (i32, i32) {
    %c0_i32 = arith.constant 0 : i32
    return %arg0, %arg1 : i32, i32
  }
}

module attributes {stable_mosaic.version = 11 : i64} {
  func.func @_matmul_bias_kernel(%arg0: i32, %arg1: i32, %arg2: i32, %arg3: memref<16x16xbf16, #tpu.memory_space<vmem>>, %arg4: memref<16x128xbf16, #tpu.memory_space<vmem>>, %arg5: memref<1x128xf32, #tpu.memory_space<vmem>>, %arg6: memref<16x128xbf16, #tpu.memory_space<vmem>>, %arg7: memref<16x128xf32, #tpu.memory_space<vmem>>) attributes {dimension_semantics = [#tpu.dimension_semantics<parallel>, #tpu.dimension_semantics<parallel>, #tpu.dimension_semantics<arbitrary>], iteration_bounds = array<i64: 1, 1, 1>, scalar_prefetch = 0 : i64, scratch_operands = 1 : i64, tpu.core_type = #tpu.core_type<tc>, window_params = [{transform_indices = @transform_0, window_bounds = array<i64: 16, 16>}, {transform_indices = @transform_1, window_bounds = array<i64: 16, 128>}, {transform_indices = @transform_2, window_bounds = array<i64: 1, 128>}, {transform_indices = @transform_3, window_bounds = array<i64: 16, 128>}]} {
    %c0_i32 = arith.constant 0 : i32
    %0 = arith.cmpi eq, %arg2, %c0_i32 : i32
    %1 = arith.extui %0 : i1 to i32
    %c0_i32_0 = arith.constant 0 : i32
    %2 = arith.cmpi ne, %1, %c0_i32_0 : i32
    scf.if %2 {
      %cst_10 = arith.constant 0.000000e+00 : f32
      %12 = vector.broadcast %cst_10 : f32 to vector<16x128xf32>
      %c0_11 = arith.constant 0 : index
      %c0_12 = arith.constant 0 : index
      %13 = vector.load %arg7[%c0_11, %c0_12] : memref<16x128xf32, #tpu.memory_space<vmem>>, vector<16x128xf32>
      tpu.vector_store %arg7[%c0_11, %c0_12], %12 {strides = array<i32>} : memref<16x128xf32, #tpu.memory_space<vmem>>, vector<16x128xf32>,
    } else {
    }
    %c0 = arith.constant 0 : index
    %c0_1 = arith.constant 0 : index
    %3 = vector.load %arg7[%c0, %c0_1] : memref<16x128xf32, #tpu.memory_space<vmem>>, vector<16x128xf32>
    %c0_2 = arith.constant 0 : index
    %c0_3 = arith.constant 0 : index
    %4 = vector.load %arg3[%c0_2, %c0_3] : memref<16x16xbf16, #tpu.memory_space<vmem>>, vector<16x16xbf16>
    %c0_4 = arith.constant 0 : index
    %c0_5 = arith.constant 0 : index
    %5 = vector.load %arg4[%c0_4, %c0_5] : memref<16x128xbf16, #tpu.memory_space<vmem>>, vector<16x128xbf16>
    %cst = arith.constant dense<0.000000e+00> : vector<16x128xf32>
    %6 = tpu.matmul %4, %5, %cst {dimension_numbers = #tpu.dot_dimension_numbers<[1], [0], [0], [1], [0, 0, 1, 1], [], []>} : vector<16x16xbf16>, vector<16x128xbf16>, vector<16x128xf32> -> vector<16x128xf32>
    %7 = arith.addf %3, %6 : vector<16x128xf32>
    %c0_6 = arith.constant 0 : index
    %c0_7 = arith.constant 0 : index
    %8 = vector.load %arg7[%c0_6, %c0_7] : memref<16x128xf32, #tpu.memory_space<vmem>>, vector<16x128xf32>
    tpu.vector_store %arg7[%c0_6, %c0_7], %7 {strides = array<i32>} : memref<16x128xf32, #tpu.memory_space<vmem>>, vector<16x128xf32>,
    %c0_i32_8 = arith.constant 0 : i32
    %9 = arith.cmpi eq, %arg2, %c0_i32_8 : i32
    %10 = arith.extui %9 : i1 to i32
    %c0_i32_9 = arith.constant 0 : i32
    %11 = arith.cmpi ne, %10, %c0_i32_9 : i32
    scf.if %11 {
      %c0_10 = arith.constant 0 : index
      %c0_11 = arith.constant 0 : index
      %12 = vector.load %arg7[%c0_10, %c0_11] : memref<16x128xf32, #tpu.memory_space<vmem>>, vector<16x128xf32>
      %c0_12 = arith.constant 0 : index
      %c0_13 = arith.constant 0 : index
      %13 = vector.load %arg5[%c0_12, %c0_13] : memref<1x128xf32, #tpu.memory_space<vmem>>, vector<1x128xf32>
      %14 = vector.broadcast %13 : vector<1x128xf32> to vector<16x128xf32>
      %15 = arith.addf %12, %14 : vector<16x128xf32>
      %cst_14 = arith.constant 0.000000e+00 : f32
      %16 = vector.broadcast %cst_14 : f32 to vector<16x128xf32>
      %17 = arith.maximumf %15, %16 : vector<16x128xf32>
      %18 = arith.truncf %17 : vector<16x128xf32> to vector<16x128xbf16>
      %c0_15 = arith.constant 0 : index
      %c0_16 = arith.constant 0 : index
      %19 = vector.load %arg6[%c0_15, %c0_16] : memref<16x128xbf16, #tpu.memory_space<vmem>>, vector<16x128xbf16>
      tpu.vector_store %arg6[%c0_15, %c0_16], %18 {strides = array<i32>} : memref<16x128xbf16, #tpu.memory_space<vmem>>, vector<16x128xbf16>,
    } else {
    }
    return
  }
  func.func @transform_0(%arg0: i32, %arg1: i32, %arg2: i32) -> (i32, i32) {
    %c0_i32 = arith.constant 0 : i32
    return %arg0, %arg2 : i32, i32
  }
  func.func @transform_1(%arg0: i32, %arg1: i32, %arg2: i32) -> (i32, i32) {
    %c0_i32 = arith.constant 0 : i32
    return %arg2, %arg1 : i32, i32
  }
  func.func @transform_2(%arg0: i32, %arg1: i32, %arg2: i32) -> (i32, i32) {
    %c0_i32 = arith.constant 0 : i32
    %c0_i32_0 = arith.constant 0 : i32
    return %c0_i32, %arg1 : i32, i32
  }
  func.func @transform_3(%arg0: i32, %arg1: i32, %arg2: i32) -> (i32, i32) {
    %c0_i32 = arith.constant 0 : i32
    return %arg0, %arg1 : i32, i32
  }
}

module attributes {stable_mosaic.version = 11 : i64} {
  func.func @_matmul_bias_kernel(%arg0: i32, %arg1: i32, %arg2: i32, %arg3: memref<16x64xbf16, #tpu.memory_space<vmem>>, %arg4: memref<64x128xbf16, #tpu.memory_space<vmem>>, %arg5: memref<1x128xf32, #tpu.memory_space<vmem>>, %arg6: memref<16x128xbf16, #tpu.memory_space<vmem>>, %arg7: memref<16x128xf32, #tpu.memory_space<vmem>>) attributes {dimension_semantics = [#tpu.dimension_semantics<parallel>, #tpu.dimension_semantics<parallel>, #tpu.dimension_semantics<arbitrary>], iteration_bounds = array<i64: 1, 1, 1>, scalar_prefetch = 0 : i64, scratch_operands = 1 : i64, tpu.core_type = #tpu.core_type<tc>, window_params = [{transform_indices = @transform_0, window_bounds = array<i64: 16, 64>}, {transform_indices = @transform_1, window_bounds = array<i64: 64, 128>}, {transform_indices = @transform_2, window_bounds = array<i64: 1, 128>}, {transform_indices = @transform_3, window_bounds = array<i64: 16, 128>}]} {
    %c0_i32 = arith.constant 0 : i32
    %0 = arith.cmpi eq, %arg2, %c0_i32 : i32
    %1 = arith.extui %0 : i1 to i32
    %c0_i32_0 = arith.constant 0 : i32
    %2 = arith.cmpi ne, %1, %c0_i32_0 : i32
    scf.if %2 {
      %cst_10 = arith.constant 0.000000e+00 : f32
      %12 = vector.broadcast %cst_10 : f32 to vector<16x128xf32>
      %c0_11 = arith.constant 0 : index
      %c0_12 = arith.constant 0 : index
      %13 = vector.load %arg7[%c0_11, %c0_12] : memref<16x128xf32, #tpu.memory_space<vmem>>, vector<16x128xf32>
      tpu.vector_store %arg7[%c0_11, %c0_12], %12 {strides = array<i32>} : memref<16x128xf32, #tpu.memory_space<vmem>>, vector<16x128xf32>,
    } else {
    }
    %c0 = arith.constant 0 : index
    %c0_1 = arith.constant 0 : index
    %3 = vector.load %arg7[%c0, %c0_1] : memref<16x128xf32, #tpu.memory_space<vmem>>, vector<16x128xf32>
    %c0_2 = arith.constant 0 : index
    %c0_3 = arith.constant 0 : index
    %4 = vector.load %arg3[%c0_2, %c0_3] : memref<16x64xbf16, #tpu.memory_space<vmem>>, vector<16x64xbf16>
    %c0_4 = arith.constant 0 : index
    %c0_5 = arith.constant 0 : index
    %5 = vector.load %arg4[%c0_4, %c0_5] : memref<64x128xbf16, #tpu.memory_space<vmem>>, vector<64x128xbf16>
    %cst = arith.constant dense<0.000000e+00> : vector<16x128xf32>
    %6 = tpu.matmul %4, %5, %cst {dimension_numbers = #tpu.dot_dimension_numbers<[1], [0], [0], [1], [0, 0, 1, 1], [], []>} : vector<16x64xbf16>, vector<64x128xbf16>, vector<16x128xf32> -> vector<16x128xf32>
    %7 = arith.addf %3, %6 : vector<16x128xf32>
    %c0_6 = arith.constant 0 : index
    %c0_7 = arith.constant 0 : index
    %8 = vector.load %arg7[%c0_6, %c0_7] : memref<16x128xf32, #tpu.memory_space<vmem>>, vector<16x128xf32>
    tpu.vector_store %arg7[%c0_6, %c0_7], %7 {strides = array<i32>} : memref<16x128xf32, #tpu.memory_space<vmem>>, vector<16x128xf32>,
    %c0_i32_8 = arith.constant 0 : i32
    %9 = arith.cmpi eq, %arg2, %c0_i32_8 : i32
    %10 = arith.extui %9 : i1 to i32
    %c0_i32_9 = arith.constant 0 : i32
    %11 = arith.cmpi ne, %10, %c0_i32_9 : i32
    scf.if %11 {
      %c0_10 = arith.constant 0 : index
      %c0_11 = arith.constant 0 : index
      %12 = vector.load %arg7[%c0_10, %c0_11] : memref<16x128xf32, #tpu.memory_space<vmem>>, vector<16x128xf32>
      %c0_12 = arith.constant 0 : index
      %c0_13 = arith.constant 0 : index
      %13 = vector.load %arg5[%c0_12, %c0_13] : memref<1x128xf32, #tpu.memory_space<vmem>>, vector<1x128xf32>
      %14 = vector.broadcast %13 : vector<1x128xf32> to vector<16x128xf32>
      %15 = arith.addf %12, %14 : vector<16x128xf32>
      %cst_14 = arith.constant 0.000000e+00 : f32
      %16 = vector.broadcast %cst_14 : f32 to vector<16x128xf32>
      %17 = arith.maximumf %15, %16 : vector<16x128xf32>
      %18 = arith.truncf %17 : vector<16x128xf32> to vector<16x128xbf16>
      %c0_15 = arith.constant 0 : index
      %c0_16 = arith.constant 0 : index
      %19 = vector.load %arg6[%c0_15, %c0_16] : memref<16x128xbf16, #tpu.memory_space<vmem>>, vector<16x128xbf16>
      tpu.vector_store %arg6[%c0_15, %c0_16], %18 {strides = array<i32>} : memref<16x128xbf16, #tpu.memory_space<vmem>>, vector<16x128xbf16>,
    } else {
    }
    return
  }
  func.func @transform_0(%arg0: i32, %arg1: i32, %arg2: i32) -> (i32, i32) {
    %c0_i32 = arith.constant 0 : i32
    return %arg0, %arg2 : i32, i32
  }
  func.func @transform_1(%arg0: i32, %arg1: i32, %arg2: i32) -> (i32, i32) {
    %c0_i32 = arith.constant 0 : i32
    return %arg2, %arg1 : i32, i32
  }
  func.func @transform_2(%arg0: i32, %arg1: i32, %arg2: i32) -> (i32, i32) {
    %c0_i32 = arith.constant 0 : i32
    %c0_i32_0 = arith.constant 0 : i32
    return %c0_i32, %arg1 : i32, i32
  }
  func.func @transform_3(%arg0: i32, %arg1: i32, %arg2: i32) -> (i32, i32) {
    %c0_i32 = arith.constant 0 : i32
    return %arg0, %arg1 : i32, i32
  }
}

module attributes {stable_mosaic.version = 11 : i64} {
  func.func @_matmul_bias_kernel(%arg0: i32, %arg1: i32, %arg2: i32, %arg3: memref<16x16xbf16, #tpu.memory_space<vmem>>, %arg4: memref<16x128xbf16, #tpu.memory_space<vmem>>, %arg5: memref<1x128xf32, #tpu.memory_space<vmem>>, %arg6: memref<16x128xbf16, #tpu.memory_space<vmem>>, %arg7: memref<16x128xf32, #tpu.memory_space<vmem>>) attributes {dimension_semantics = [#tpu.dimension_semantics<parallel>, #tpu.dimension_semantics<parallel>, #tpu.dimension_semantics<arbitrary>], iteration_bounds = array<i64: 1, 1, 1>, scalar_prefetch = 0 : i64, scratch_operands = 1 : i64, tpu.core_type = #tpu.core_type<tc>, window_params = [{transform_indices = @transform_0, window_bounds = array<i64: 16, 16>}, {transform_indices = @transform_1, window_bounds = array<i64: 16, 128>}, {transform_indices = @transform_2, window_bounds = array<i64: 1, 128>}, {transform_indices = @transform_3, window_bounds = array<i64: 16, 128>}]} {
    %c0_i32 = arith.constant 0 : i32
    %0 = arith.cmpi eq, %arg2, %c0_i32 : i32
    %1 = arith.extui %0 : i1 to i32
    %c0_i32_0 = arith.constant 0 : i32
    %2 = arith.cmpi ne, %1, %c0_i32_0 : i32
    scf.if %2 {
      %cst_10 = arith.constant 0.000000e+00 : f32
      %12 = vector.broadcast %cst_10 : f32 to vector<16x128xf32>
      %c0_11 = arith.constant 0 : index
      %c0_12 = arith.constant 0 : index
      %13 = vector.load %arg7[%c0_11, %c0_12] : memref<16x128xf32, #tpu.memory_space<vmem>>, vector<16x128xf32>
      tpu.vector_store %arg7[%c0_11, %c0_12], %12 {strides = array<i32>} : memref<16x128xf32, #tpu.memory_space<vmem>>, vector<16x128xf32>,
    } else {
    }
    %c0 = arith.constant 0 : index
    %c0_1 = arith.constant 0 : index
    %3 = vector.load %arg7[%c0, %c0_1] : memref<16x128xf32, #tpu.memory_space<vmem>>, vector<16x128xf32>
    %c0_2 = arith.constant 0 : index
    %c0_3 = arith.constant 0 : index
    %4 = vector.load %arg3[%c0_2, %c0_3] : memref<16x16xbf16, #tpu.memory_space<vmem>>, vector<16x16xbf16>
    %c0_4 = arith.constant 0 : index
    %c0_5 = arith.constant 0 : index
    %5 = vector.load %arg4[%c0_4, %c0_5] : memref<16x128xbf16, #tpu.memory_space<vmem>>, vector<16x128xbf16>
    %cst = arith.constant dense<0.000000e+00> : vector<16x128xf32>
    %6 = tpu.matmul %4, %5, %cst {dimension_numbers = #tpu.dot_dimension_numbers<[1], [0], [0], [1], [0, 0, 1, 1], [], []>} : vector<16x16xbf16>, vector<16x128xbf16>, vector<16x128xf32> -> vector<16x128xf32>
    %7 = arith.addf %3, %6 : vector<16x128xf32>
    %c0_6 = arith.constant 0 : index
    %c0_7 = arith.constant 0 : index
    %8 = vector.load %arg7[%c0_6, %c0_7] : memref<16x128xf32, #tpu.memory_space<vmem>>, vector<16x128xf32>
    tpu.vector_store %arg7[%c0_6, %c0_7], %7 {strides = array<i32>} : memref<16x128xf32, #tpu.memory_space<vmem>>, vector<16x128xf32>,
    %c0_i32_8 = arith.constant 0 : i32
    %9 = arith.cmpi eq, %arg2, %c0_i32_8 : i32
    %10 = arith.extui %9 : i1 to i32
    %c0_i32_9 = arith.constant 0 : i32
    %11 = arith.cmpi ne, %10, %c0_i32_9 : i32
    scf.if %11 {
      %c0_10 = arith.constant 0 : index
      %c0_11 = arith.constant 0 : index
      %12 = vector.load %arg7[%c0_10, %c0_11] : memref<16x128xf32, #tpu.memory_space<vmem>>, vector<16x128xf32>
      %c0_12 = arith.constant 0 : index
      %c0_13 = arith.constant 0 : index
      %13 = vector.load %arg5[%c0_12, %c0_13] : memref<1x128xf32, #tpu.memory_space<vmem>>, vector<1x128xf32>
      %14 = vector.broadcast %13 : vector<1x128xf32> to vector<16x128xf32>
      %15 = arith.addf %12, %14 : vector<16x128xf32>
      %16 = arith.truncf %15 : vector<16x128xf32> to vector<16x128xbf16>
      %c0_14 = arith.constant 0 : index
      %c0_15 = arith.constant 0 : index
      %17 = vector.load %arg6[%c0_14, %c0_15] : memref<16x128xbf16, #tpu.memory_space<vmem>>, vector<16x128xbf16>
      tpu.vector_store %arg6[%c0_14, %c0_15], %16 {strides = array<i32>} : memref<16x128xbf16, #tpu.memory_space<vmem>>, vector<16x128xbf16>,
    } else {
    }
    return
  }
  func.func @transform_0(%arg0: i32, %arg1: i32, %arg2: i32) -> (i32, i32) {
    %c0_i32 = arith.constant 0 : i32
    return %arg0, %arg2 : i32, i32
  }
  func.func @transform_1(%arg0: i32, %arg1: i32, %arg2: i32) -> (i32, i32) {
    %c0_i32 = arith.constant 0 : i32
    return %arg2, %arg1 : i32, i32
  }
  func.func @transform_2(%arg0: i32, %arg1: i32, %arg2: i32) -> (i32, i32) {
    %c0_i32 = arith.constant 0 : i32
    %c0_i32_0 = arith.constant 0 : i32
    return %c0_i32, %arg1 : i32, i32
  }
  func.func @transform_3(%arg0: i32, %arg1: i32, %arg2: i32) -> (i32, i32) {
    %c0_i32 = arith.constant 0 : i32
    return %arg0, %arg1 : i32, i32
  }
}

module attributes {stable_mosaic.version = 11 : i64} {
  func.func @_lstm_kernel(%arg0: i32, %arg1: i32, %arg2: memref<2x8x128xbf16, #tpu.memory_space<vmem>>, %arg3: memref<32x128xbf16, #tpu.memory_space<vmem>>, %arg4: memref<2x8x32xbf16, #tpu.memory_space<vmem>>, %arg5: memref<2x32xf32, #tpu.memory_space<vmem>>, %arg6: memref<2x32xf32, #tpu.memory_space<vmem>>) attributes {dimension_semantics = [#tpu.dimension_semantics<parallel>, #tpu.dimension_semantics<arbitrary>], iteration_bounds = array<i64: 1, 1>, scalar_prefetch = 0 : i64, scratch_operands = 2 : i64, tpu.core_type = #tpu.core_type<tc>, window_params = [{transform_indices = @transform_0, window_bounds = array<i64: 2, 8, 128>}, {pipeline_mode = #tpu.pipeline_mode<synchronous>, transform_indices = @transform_1, window_bounds = array<i64: 32, 128>}, {transform_indices = @transform_2, window_bounds = array<i64: 2, 8, 32>}]} {
    %c0_i32 = arith.constant 0 : i32
    %0 = arith.cmpi eq, %arg1, %c0_i32 : i32
    %1 = arith.extui %0 : i1 to i32
    %c0_i32_0 = arith.constant 0 : i32
    %2 = arith.cmpi ne, %1, %c0_i32_0 : i32
    scf.if %2 {
      %cst_61 = arith.constant 0.000000e+00 : f32
      %282 = vector.broadcast %cst_61 : f32 to vector<2x32xf32>
      %c0_62 = arith.constant 0 : index
      %c0_63 = arith.constant 0 : index
      %283 = vector.load %arg5[%c0_62, %c0_63] : memref<2x32xf32, #tpu.memory_space<vmem>>, vector<2x32xf32>
      tpu.vector_store %arg5[%c0_62, %c0_63], %282 {strides = array<i32>} : memref<2x32xf32, #tpu.memory_space<vmem>>, vector<2x32xf32>,
      %cst_64 = arith.constant 0.000000e+00 : f32
      %284 = vector.broadcast %cst_64 : f32 to vector<2x32xf32>
      %c0_65 = arith.constant 0 : index
      %c0_66 = arith.constant 0 : index
      %285 = vector.load %arg6[%c0_65, %c0_66] : memref<2x32xf32, #tpu.memory_space<vmem>>, vector<2x32xf32>
      tpu.vector_store %arg6[%c0_65, %c0_66], %284 {strides = array<i32>} : memref<2x32xf32, #tpu.memory_space<vmem>>, vector<2x32xf32>,
    } else {
    }
    %c0 = arith.constant 0 : index
    %c0_1 = arith.constant 0 : index
    %3 = vector.load %arg3[%c0, %c0_1] : memref<32x128xbf16, #tpu.memory_space<vmem>>, vector<32x128xbf16>
    %c0_2 = arith.constant 0 : index
    %c0_3 = arith.constant 0 : index
    %c0_4 = arith.constant 0 : index
    %4 = vector.load %arg2[%c0_2, %c0_3, %c0_4] : memref<2x8x128xbf16, #tpu.memory_space<vmem>>, vector<2x8x128xbf16>
    %5 = arith.extf %4 : vector<2x8x128xbf16> to vector<2x8x128xf32>
    %c0_5 = arith.constant 0 : index
    %c0_6 = arith.constant 0 : index
    %6 = vector.load %arg5[%c0_5, %c0_6] : memref<2x32xf32, #tpu.memory_space<vmem>>, vector<2x32xf32>
    %c0_7 = arith.constant 0 : index
    %c0_8 = arith.constant 0 : index
    %7 = vector.load %arg6[%c0_7, %c0_8] : memref<2x32xf32, #tpu.memory_space<vmem>>, vector<2x32xf32>
    %8 = vector.extract_strided_slice %5 {offsets = [0, 0, 0], sizes = [2, 1, 128], strides = [1, 1, 1]} : vector<2x8x128xf32> to vector<2x1x128xf32>
    %9 = vector.shape_cast %8 : vector<2x1x128xf32> to vector<2x128xf32>
    %10 = arith.truncf %6 : vector<2x32xf32> to vector<2x32xbf16>
    %cst = arith.constant dense<0.000000e+00> : vector<2x128xf32>
    %11 = tpu.matmul %10, %3, %cst {dimension_numbers = #tpu.dot_dimension_numbers<[1], [0], [0], [1], [0, 0, 1, 1], [], []>} : vector<2x32xbf16>, vector<32x128xbf16>, vector<2x128xf32> -> vector<2x128xf32>
    %12 = arith.addf %9, %11 : vector<2x128xf32>
    %13 = vector.extract_strided_slice %12 {offsets = [0, 0], sizes = [2, 32], strides = [1, 1]} : vector<2x128xf32> to vector<2x32xf32>
    %14 = arith.negf %13 : vector<2x32xf32>
    %15 = math.exp %14 : vector<2x32xf32>
    %cst_9 = arith.constant 1.000000e+00 : f32
    %16 = vector.broadcast %cst_9 : f32 to vector<2x32xf32>
    %17 = arith.addf %16, %15 : vector<2x32xf32>
    %18 = arith.divf %16, %17 : vector<2x32xf32>
    %19 = vector.extract_strided_slice %12 {offsets = [0, 32], sizes = [2, 32], strides = [1, 1]} : vector<2x128xf32> to vector<2x32xf32>
    %20 = arith.negf %19 : vector<2x32xf32>
    %21 = math.exp %20 : vector<2x32xf32>
    %cst_10 = arith.constant 1.000000e+00 : f32
    %22 = vector.broadcast %cst_10 : f32 to vector<2x32xf32>
    %23 = arith.addf %22, %21 : vector<2x32xf32>
    %24 = arith.divf %22, %23 : vector<2x32xf32>
    %25 = vector.extract_strided_slice %12 {offsets = [0, 64], sizes = [2, 32], strides = [1, 1]} : vector<2x128xf32> to vector<2x32xf32>
    %26 = math.tanh %25 : vector<2x32xf32>
    %27 = vector.extract_strided_slice %12 {offsets = [0, 96], sizes = [2, 32], strides = [1, 1]} : vector<2x128xf32> to vector<2x32xf32>
    %28 = arith.negf %27 : vector<2x32xf32>
    %29 = math.exp %28 : vector<2x32xf32>
    %cst_11 = arith.constant 1.000000e+00 : f32
    %30 = vector.broadcast %cst_11 : f32 to vector<2x32xf32>
    %31 = arith.addf %30, %29 : vector<2x32xf32>
    %32 = arith.divf %30, %31 : vector<2x32xf32>
    %33 = arith.mulf %24, %7 : vector<2x32xf32>
    %34 = arith.mulf %18, %26 : vector<2x32xf32>
    %35 = arith.addf %33, %34 : vector<2x32xf32>
    %36 = math.tanh %35 : vector<2x32xf32>
    %37 = arith.mulf %32, %36 : vector<2x32xf32>
    %38 = arith.truncf %37 : vector<2x32xf32> to vector<2x32xbf16>
    %c0_12 = arith.constant 0 : index
    %c0_13 = arith.constant 0 : index
    %c0_14 = arith.constant 0 : index
    %39 = vector.load %arg4[%c0_12, %c0_13, %c0_14] : memref<2x8x32xbf16, #tpu.memory_space<vmem>>, vector<2x1x32xbf16>
    %40 = vector.shape_cast %39 : vector<2x1x32xbf16> to vector<2x32xbf16>
    %41 = vector.shape_cast %38 : vector<2x32xbf16> to vector<2x1x32xbf16>
    tpu.vector_store %arg4[%c0_12, %c0_13, %c0_14], %41 {strides = array<i32>} : memref<2x8x32xbf16, #tpu.memory_space<vmem>>, vector<2x1x32xbf16>,
    %42 = vector.extract_strided_slice %5 {offsets = [0, 1, 0], sizes = [2, 1, 128], strides = [1, 1, 1]} : vector<2x8x128xf32> to vector<2x1x128xf32>
    %43 = vector.shape_cast %42 : vector<2x1x128xf32> to vector<2x128xf32>
    %44 = arith.truncf %37 : vector<2x32xf32> to vector<2x32xbf16>
    %cst_15 = arith.constant dense<0.000000e+00> : vector<2x128xf32>
    %45 = tpu.matmul %44, %3, %cst_15 {dimension_numbers = #tpu.dot_dimension_numbers<[1], [0], [0], [1], [0, 0, 1, 1], [], []>} : vector<2x32xbf16>, vector<32x128xbf16>, vector<2x128xf32> -> vector<2x128xf32>
    %46 = arith.addf %43, %45 : vector<2x128xf32>
    %47 = vector.extract_strided_slice %46 {offsets = [0, 0], sizes = [2, 32], strides = [1, 1]} : vector<2x128xf32> to vector<2x32xf32>
    %48 = arith.negf %47 : vector<2x32xf32>
    %49 = math.exp %48 : vector<2x32xf32>
    %cst_16 = arith.constant 1.000000e+00 : f32
    %50 = vector.broadcast %cst_16 : f32 to vector<2x32xf32>
    %51 = arith.addf %50, %49 : vector<2x32xf32>
    %52 = arith.divf %50, %51 : vector<2x32xf32>
    %53 = vector.extract_strided_slice %46 {offsets = [0, 32], sizes = [2, 32], strides = [1, 1]} : vector<2x128xf32> to vector<2x32xf32>
    %54 = arith.negf %53 : vector<2x32xf32>
    %55 = math.exp %54 : vector<2x32xf32>
    %cst_17 = arith.constant 1.000000e+00 : f32
    %56 = vector.broadcast %cst_17 : f32 to vector<2x32xf32>
    %57 = arith.addf %56, %55 : vector<2x32xf32>
    %58 = arith.divf %56, %57 : vector<2x32xf32>
    %59 = vector.extract_strided_slice %46 {offsets = [0, 64], sizes = [2, 32], strides = [1, 1]} : vector<2x128xf32> to vector<2x32xf32>
    %60 = math.tanh %59 : vector<2x32xf32>
    %61 = vector.extract_strided_slice %46 {offsets = [0, 96], sizes = [2, 32], strides = [1, 1]} : vector<2x128xf32> to vector<2x32xf32>
    %62 = arith.negf %61 : vector<2x32xf32>
    %63 = math.exp %62 : vector<2x32xf32>
    %cst_18 = arith.constant 1.000000e+00 : f32
    %64 = vector.broadcast %cst_18 : f32 to vector<2x32xf32>
    %65 = arith.addf %64, %63 : vector<2x32xf32>
    %66 = arith.divf %64, %65 : vector<2x32xf32>
    %67 = arith.mulf %58, %35 : vector<2x32xf32>
    %68 = arith.mulf %52, %60 : vector<2x32xf32>
    %69 = arith.addf %67, %68 : vector<2x32xf32>
    %70 = math.tanh %69 : vector<2x32xf32>
    %71 = arith.mulf %66, %70 : vector<2x32xf32>
    %72 = arith.truncf %71 : vector<2x32xf32> to vector<2x32xbf16>
    %c0_19 = arith.constant 0 : index
    %c1 = arith.constant 1 : index
    %c0_20 = arith.constant 0 : index
    %73 = vector.load %arg4[%c0_19, %c1, %c0_20] : memref<2x8x32xbf16, #tpu.memory_space<vmem>>, vector<2x1x32xbf16>
    %74 = vector.shape_cast %73 : vector<2x1x32xbf16> to vector<2x32xbf16>
    %75 = vector.shape_cast %72 : vector<2x32xbf16> to vector<2x1x32xbf16>
    tpu.vector_store %arg4[%c0_19, %c1, %c0_20], %75 {strides = array<i32>} : memref<2x8x32xbf16, #tpu.memory_space<vmem>>, vector<2x1x32xbf16>,
    %76 = vector.extract_strided_slice %5 {offsets = [0, 2, 0], sizes = [2, 1, 128], strides = [1, 1, 1]} : vector<2x8x128xf32> to vector<2x1x128xf32>
    %77 = vector.shape_cast %76 : vector<2x1x128xf32> to vector<2x128xf32>
    %78 = arith.truncf %71 : vector<2x32xf32> to vector<2x32xbf16>
    %cst_21 = arith.constant dense<0.000000e+00> : vector<2x128xf32>
    %79 = tpu.matmul %78, %3, %cst_21 {dimension_numbers = #tpu.dot_dimension_numbers<[1], [0], [0], [1], [0, 0, 1, 1], [], []>} : vector<2x32xbf16>, vector<32x128xbf16>, vector<2x128xf32> -> vector<2x128xf32>
    %80 = arith.addf %77, %79 : vector<2x128xf32>
    %81 = vector.extract_strided_slice %80 {offsets = [0, 0], sizes = [2, 32], strides = [1, 1]} : vector<2x128xf32> to vector<2x32xf32>
    %82 = arith.negf %81 : vector<2x32xf32>
    %83 = math.exp %82 : vector<2x32xf32>
    %cst_22 = arith.constant 1.000000e+00 : f32
    %84 = vector.broadcast %cst_22 : f32 to vector<2x32xf32>
    %85 = arith.addf %84, %83 : vector<2x32xf32>
    %86 = arith.divf %84, %85 : vector<2x32xf32>
    %87 = vector.extract_strided_slice %80 {offsets = [0, 32], sizes = [2, 32], strides = [1, 1]} : vector<2x128xf32> to vector<2x32xf32>
    %88 = arith.negf %87 : vector<2x32xf32>
    %89 = math.exp %88 : vector<2x32xf32>
    %cst_23 = arith.constant 1.000000e+00 : f32
    %90 = vector.broadcast %cst_23 : f32 to vector<2x32xf32>
    %91 = arith.addf %90, %89 : vector<2x32xf32>
    %92 = arith.divf %90, %91 : vector<2x32xf32>
    %93 = vector.extract_strided_slice %80 {offsets = [0, 64], sizes = [2, 32], strides = [1, 1]} : vector<2x128xf32> to vector<2x32xf32>
    %94 = math.tanh %93 : vector<2x32xf32>
    %95 = vector.extract_strided_slice %80 {offsets = [0, 96], sizes = [2, 32], strides = [1, 1]} : vector<2x128xf32> to vector<2x32xf32>
    %96 = arith.negf %95 : vector<2x32xf32>
    %97 = math.exp %96 : vector<2x32xf32>
    %cst_24 = arith.constant 1.000000e+00 : f32
    %98 = vector.broadcast %cst_24 : f32 to vector<2x32xf32>
    %99 = arith.addf %98, %97 : vector<2x32xf32>
    %100 = arith.divf %98, %99 : vector<2x32xf32>
    %101 = arith.mulf %92, %69 : vector<2x32xf32>
    %102 = arith.mulf %86, %94 : vector<2x32xf32>
    %103 = arith.addf %101, %102 : vector<2x32xf32>
    %104 = math.tanh %103 : vector<2x32xf32>
    %105 = arith.mulf %100, %104 : vector<2x32xf32>
    %106 = arith.truncf %105 : vector<2x32xf32> to vector<2x32xbf16>
    %c0_25 = arith.constant 0 : index
    %c2 = arith.constant 2 : index
    %c0_26 = arith.constant 0 : index
    %107 = vector.load %arg4[%c0_25, %c2, %c0_26] : memref<2x8x32xbf16, #tpu.memory_space<vmem>>, vector<2x1x32xbf16>
    %108 = vector.shape_cast %107 : vector<2x1x32xbf16> to vector<2x32xbf16>
    %109 = vector.shape_cast %106 : vector<2x32xbf16> to vector<2x1x32xbf16>
    tpu.vector_store %arg4[%c0_25, %c2, %c0_26], %109 {strides = array<i32>} : memref<2x8x32xbf16, #tpu.memory_space<vmem>>, vector<2x1x32xbf16>,
    %110 = vector.extract_strided_slice %5 {offsets = [0, 3, 0], sizes = [2, 1, 128], strides = [1, 1, 1]} : vector<2x8x128xf32> to vector<2x1x128xf32>
    %111 = vector.shape_cast %110 : vector<2x1x128xf32> to vector<2x128xf32>
    %112 = arith.truncf %105 : vector<2x32xf32> to vector<2x32xbf16>
    %cst_27 = arith.constant dense<0.000000e+00> : vector<2x128xf32>
    %113 = tpu.matmul %112, %3, %cst_27 {dimension_numbers = #tpu.dot_dimension_numbers<[1], [0], [0], [1], [0, 0, 1, 1], [], []>} : vector<2x32xbf16>, vector<32x128xbf16>, vector<2x128xf32> -> vector<2x128xf32>
    %114 = arith.addf %111, %113 : vector<2x128xf32>
    %115 = vector.extract_strided_slice %114 {offsets = [0, 0], sizes = [2, 32], strides = [1, 1]} : vector<2x128xf32> to vector<2x32xf32>
    %116 = arith.negf %115 : vector<2x32xf32>
    %117 = math.exp %116 : vector<2x32xf32>
    %cst_28 = arith.constant 1.000000e+00 : f32
    %118 = vector.broadcast %cst_28 : f32 to vector<2x32xf32>
    %119 = arith.addf %118, %117 : vector<2x32xf32>
    %120 = arith.divf %118, %119 : vector<2x32xf32>
    %121 = vector.extract_strided_slice %114 {offsets = [0, 32], sizes = [2, 32], strides = [1, 1]} : vector<2x128xf32> to vector<2x32xf32>
    %122 = arith.negf %121 : vector<2x32xf32>
    %123 = math.exp %122 : vector<2x32xf32>
    %cst_29 = arith.constant 1.000000e+00 : f32
    %124 = vector.broadcast %cst_29 : f32 to vector<2x32xf32>
    %125 = arith.addf %124, %123 : vector<2x32xf32>
    %126 = arith.divf %124, %125 : vector<2x32xf32>
    %127 = vector.extract_strided_slice %114 {offsets = [0, 64], sizes = [2, 32], strides = [1, 1]} : vector<2x128xf32> to vector<2x32xf32>
    %128 = math.tanh %127 : vector<2x32xf32>
    %129 = vector.extract_strided_slice %114 {offsets = [0, 96], sizes = [2, 32], strides = [1, 1]} : vector<2x128xf32> to vector<2x32xf32>
    %130 = arith.negf %129 : vector<2x32xf32>
    %131 = math.exp %130 : vector<2x32xf32>
    %cst_30 = arith.constant 1.000000e+00 : f32
    %132 = vector.broadcast %cst_30 : f32 to vector<2x32xf32>
    %133 = arith.addf %132, %131 : vector<2x32xf32>
    %134 = arith.divf %132, %133 : vector<2x32xf32>
    %135 = arith.mulf %126, %103 : vector<2x32xf32>
    %136 = arith.mulf %120, %128 : vector<2x32xf32>
    %137 = arith.addf %135, %136 : vector<2x32xf32>
    %138 = math.tanh %137 : vector<2x32xf32>
    %139 = arith.mulf %134, %138 : vector<2x32xf32>
    %140 = arith.truncf %139 : vector<2x32xf32> to vector<2x32xbf16>
    %c0_31 = arith.constant 0 : index
    %c3 = arith.constant 3 : index
    %c0_32 = arith.constant 0 : index
    %141 = vector.load %arg4[%c0_31, %c3, %c0_32] : memref<2x8x32xbf16, #tpu.memory_space<vmem>>, vector<2x1x32xbf16>
    %142 = vector.shape_cast %141 : vector<2x1x32xbf16> to vector<2x32xbf16>
    %143 = vector.shape_cast %140 : vector<2x32xbf16> to vector<2x1x32xbf16>
    tpu.vector_store %arg4[%c0_31, %c3, %c0_32], %143 {strides = array<i32>} : memref<2x8x32xbf16, #tpu.memory_space<vmem>>, vector<2x1x32xbf16>,
    %144 = vector.extract_strided_slice %5 {offsets = [0, 4, 0], sizes = [2, 1, 128], strides = [1, 1, 1]} : vector<2x8x128xf32> to vector<2x1x128xf32>
    %145 = vector.shape_cast %144 : vector<2x1x128xf32> to vector<2x128xf32>
    %146 = arith.truncf %139 : vector<2x32xf32> to vector<2x32xbf16>
    %cst_33 = arith.constant dense<0.000000e+00> : vector<2x128xf32>
    %147 = tpu.matmul %146, %3, %cst_33 {dimension_numbers = #tpu.dot_dimension_numbers<[1], [0], [0], [1], [0, 0, 1, 1], [], []>} : vector<2x32xbf16>, vector<32x128xbf16>, vector<2x128xf32> -> vector<2x128xf32>
    %148 = arith.addf %145, %147 : vector<2x128xf32>
    %149 = vector.extract_strided_slice %148 {offsets = [0, 0], sizes = [2, 32], strides = [1, 1]} : vector<2x128xf32> to vector<2x32xf32>
    %150 = arith.negf %149 : vector<2x32xf32>
    %151 = math.exp %150 : vector<2x32xf32>
    %cst_34 = arith.constant 1.000000e+00 : f32
    %152 = vector.broadcast %cst_34 : f32 to vector<2x32xf32>
    %153 = arith.addf %152, %151 : vector<2x32xf32>
    %154 = arith.divf %152, %153 : vector<2x32xf32>
    %155 = vector.extract_strided_slice %148 {offsets = [0, 32], sizes = [2, 32], strides = [1, 1]} : vector<2x128xf32> to vector<2x32xf32>
    %156 = arith.negf %155 : vector<2x32xf32>
    %157 = math.exp %156 : vector<2x32xf32>
    %cst_35 = arith.constant 1.000000e+00 : f32
    %158 = vector.broadcast %cst_35 : f32 to vector<2x32xf32>
    %159 = arith.addf %158, %157 : vector<2x32xf32>
    %160 = arith.divf %158, %159 : vector<2x32xf32>
    %161 = vector.extract_strided_slice %148 {offsets = [0, 64], sizes = [2, 32], strides = [1, 1]} : vector<2x128xf32> to vector<2x32xf32>
    %162 = math.tanh %161 : vector<2x32xf32>
    %163 = vector.extract_strided_slice %148 {offsets = [0, 96], sizes = [2, 32], strides = [1, 1]} : vector<2x128xf32> to vector<2x32xf32>
    %164 = arith.negf %163 : vector<2x32xf32>
    %165 = math.exp %164 : vector<2x32xf32>
    %cst_36 = arith.constant 1.000000e+00 : f32
    %166 = vector.broadcast %cst_36 : f32 to vector<2x32xf32>
    %167 = arith.addf %166, %165 : vector<2x32xf32>
    %168 = arith.divf %166, %167 : vector<2x32xf32>
    %169 = arith.mulf %160, %137 : vector<2x32xf32>
    %170 = arith.mulf %154, %162 : vector<2x32xf32>
    %171 = arith.addf %169, %170 : vector<2x32xf32>
    %172 = math.tanh %171 : vector<2x32xf32>
    %173 = arith.mulf %168, %172 : vector<2x32xf32>
    %174 = arith.truncf %173 : vector<2x32xf32> to vector<2x32xbf16>
    %c0_37 = arith.constant 0 : index
    %c4 = arith.constant 4 : index
    %c0_38 = arith.constant 0 : index
    %175 = vector.load %arg4[%c0_37, %c4, %c0_38] : memref<2x8x32xbf16, #tpu.memory_space<vmem>>, vector<2x1x32xbf16>
    %176 = vector.shape_cast %175 : vector<2x1x32xbf16> to vector<2x32xbf16>
    %177 = vector.shape_cast %174 : vector<2x32xbf16> to vector<2x1x32xbf16>
    tpu.vector_store %arg4[%c0_37, %c4, %c0_38], %177 {strides = array<i32>} : memref<2x8x32xbf16, #tpu.memory_space<vmem>>, vector<2x1x32xbf16>,
    %178 = vector.extract_strided_slice %5 {offsets = [0, 5, 0], sizes = [2, 1, 128], strides = [1, 1, 1]} : vector<2x8x128xf32> to vector<2x1x128xf32>
    %179 = vector.shape_cast %178 : vector<2x1x128xf32> to vector<2x128xf32>
    %180 = arith.truncf %173 : vector<2x32xf32> to vector<2x32xbf16>
    %cst_39 = arith.constant dense<0.000000e+00> : vector<2x128xf32>
    %181 = tpu.matmul %180, %3, %cst_39 {dimension_numbers = #tpu.dot_dimension_numbers<[1], [0], [0], [1], [0, 0, 1, 1], [], []>} : vector<2x32xbf16>, vector<32x128xbf16>, vector<2x128xf32> -> vector<2x128xf32>
    %182 = arith.addf %179, %181 : vector<2x128xf32>
    %183 = vector.extract_strided_slice %182 {offsets = [0, 0], sizes = [2, 32], strides = [1, 1]} : vector<2x128xf32> to vector<2x32xf32>
    %184 = arith.negf %183 : vector<2x32xf32>
    %185 = math.exp %184 : vector<2x32xf32>
    %cst_40 = arith.constant 1.000000e+00 : f32
    %186 = vector.broadcast %cst_40 : f32 to vector<2x32xf32>
    %187 = arith.addf %186, %185 : vector<2x32xf32>
    %188 = arith.divf %186, %187 : vector<2x32xf32>
    %189 = vector.extract_strided_slice %182 {offsets = [0, 32], sizes = [2, 32], strides = [1, 1]} : vector<2x128xf32> to vector<2x32xf32>
    %190 = arith.negf %189 : vector<2x32xf32>
    %191 = math.exp %190 : vector<2x32xf32>
    %cst_41 = arith.constant 1.000000e+00 : f32
    %192 = vector.broadcast %cst_41 : f32 to vector<2x32xf32>
    %193 = arith.addf %192, %191 : vector<2x32xf32>
    %194 = arith.divf %192, %193 : vector<2x32xf32>
    %195 = vector.extract_strided_slice %182 {offsets = [0, 64], sizes = [2, 32], strides = [1, 1]} : vector<2x128xf32> to vector<2x32xf32>
    %196 = math.tanh %195 : vector<2x32xf32>
    %197 = vector.extract_strided_slice %182 {offsets = [0, 96], sizes = [2, 32], strides = [1, 1]} : vector<2x128xf32> to vector<2x32xf32>
    %198 = arith.negf %197 : vector<2x32xf32>
    %199 = math.exp %198 : vector<2x32xf32>
    %cst_42 = arith.constant 1.000000e+00 : f32
    %200 = vector.broadcast %cst_42 : f32 to vector<2x32xf32>
    %201 = arith.addf %200, %199 : vector<2x32xf32>
    %202 = arith.divf %200, %201 : vector<2x32xf32>
    %203 = arith.mulf %194, %171 : vector<2x32xf32>
    %204 = arith.mulf %188, %196 : vector<2x32xf32>
    %205 = arith.addf %203, %204 : vector<2x32xf32>
    %206 = math.tanh %205 : vector<2x32xf32>
    %207 = arith.mulf %202, %206 : vector<2x32xf32>
    %208 = arith.truncf %207 : vector<2x32xf32> to vector<2x32xbf16>
    %c0_43 = arith.constant 0 : index
    %c5 = arith.constant 5 : index
    %c0_44 = arith.constant 0 : index
    %209 = vector.load %arg4[%c0_43, %c5, %c0_44] : memref<2x8x32xbf16, #tpu.memory_space<vmem>>, vector<2x1x32xbf16>
    %210 = vector.shape_cast %209 : vector<2x1x32xbf16> to vector<2x32xbf16>
    %211 = vector.shape_cast %208 : vector<2x32xbf16> to vector<2x1x32xbf16>
    tpu.vector_store %arg4[%c0_43, %c5, %c0_44], %211 {strides = array<i32>} : memref<2x8x32xbf16, #tpu.memory_space<vmem>>, vector<2x1x32xbf16>,
    %212 = vector.extract_strided_slice %5 {offsets = [0, 6, 0], sizes = [2, 1, 128], strides = [1, 1, 1]} : vector<2x8x128xf32> to vector<2x1x128xf32>
    %213 = vector.shape_cast %212 : vector<2x1x128xf32> to vector<2x128xf32>
    %214 = arith.truncf %207 : vector<2x32xf32> to vector<2x32xbf16>
    %cst_45 = arith.constant dense<0.000000e+00> : vector<2x128xf32>
    %215 = tpu.matmul %214, %3, %cst_45 {dimension_numbers = #tpu.dot_dimension_numbers<[1], [0], [0], [1], [0, 0, 1, 1], [], []>} : vector<2x32xbf16>, vector<32x128xbf16>, vector<2x128xf32> -> vector<2x128xf32>
    %216 = arith.addf %213, %215 : vector<2x128xf32>
    %217 = vector.extract_strided_slice %216 {offsets = [0, 0], sizes = [2, 32], strides = [1, 1]} : vector<2x128xf32> to vector<2x32xf32>
    %218 = arith.negf %217 : vector<2x32xf32>
    %219 = math.exp %218 : vector<2x32xf32>
    %cst_46 = arith.constant 1.000000e+00 : f32
    %220 = vector.broadcast %cst_46 : f32 to vector<2x32xf32>
    %221 = arith.addf %220, %219 : vector<2x32xf32>
    %222 = arith.divf %220, %221 : vector<2x32xf32>
    %223 = vector.extract_strided_slice %216 {offsets = [0, 32], sizes = [2, 32], strides = [1, 1]} : vector<2x128xf32> to vector<2x32xf32>
    %224 = arith.negf %223 : vector<2x32xf32>
    %225 = math.exp %224 : vector<2x32xf32>
    %cst_47 = arith.constant 1.000000e+00 : f32
    %226 = vector.broadcast %cst_47 : f32 to vector<2x32xf32>
    %227 = arith.addf %226, %225 : vector<2x32xf32>
    %228 = arith.divf %226, %227 : vector<2x32xf32>
    %229 = vector.extract_strided_slice %216 {offsets = [0, 64], sizes = [2, 32], strides = [1, 1]} : vector<2x128xf32> to vector<2x32xf32>
    %230 = math.tanh %229 : vector<2x32xf32>
    %231 = vector.extract_strided_slice %216 {offsets = [0, 96], sizes = [2, 32], strides = [1, 1]} : vector<2x128xf32> to vector<2x32xf32>
    %232 = arith.negf %231 : vector<2x32xf32>
    %233 = math.exp %232 : vector<2x32xf32>
    %cst_48 = arith.constant 1.000000e+00 : f32
    %234 = vector.broadcast %cst_48 : f32 to vector<2x32xf32>
    %235 = arith.addf %234, %233 : vector<2x32xf32>
    %236 = arith.divf %234, %235 : vector<2x32xf32>
    %237 = arith.mulf %228, %205 : vector<2x32xf32>
    %238 = arith.mulf %222, %230 : vector<2x32xf32>
    %239 = arith.addf %237, %238 : vector<2x32xf32>
    %240 = math.tanh %239 : vector<2x32xf32>
    %241 = arith.mulf %236, %240 : vector<2x32xf32>
    %242 = arith.truncf %241 : vector<2x32xf32> to vector<2x32xbf16>
    %c0_49 = arith.constant 0 : index
    %c6 = arith.constant 6 : index
    %c0_50 = arith.constant 0 : index
    %243 = vector.load %arg4[%c0_49, %c6, %c0_50] : memref<2x8x32xbf16, #tpu.memory_space<vmem>>, vector<2x1x32xbf16>
    %244 = vector.shape_cast %243 : vector<2x1x32xbf16> to vector<2x32xbf16>
    %245 = vector.shape_cast %242 : vector<2x32xbf16> to vector<2x1x32xbf16>
    tpu.vector_store %arg4[%c0_49, %c6, %c0_50], %245 {strides = array<i32>} : memref<2x8x32xbf16, #tpu.memory_space<vmem>>, vector<2x1x32xbf16>,
    %246 = vector.extract_strided_slice %5 {offsets = [0, 7, 0], sizes = [2, 1, 128], strides = [1, 1, 1]} : vector<2x8x128xf32> to vector<2x1x128xf32>
    %247 = vector.shape_cast %246 : vector<2x1x128xf32> to vector<2x128xf32>
    %248 = arith.truncf %241 : vector<2x32xf32> to vector<2x32xbf16>
    %cst_51 = arith.constant dense<0.000000e+00> : vector<2x128xf32>
    %249 = tpu.matmul %248, %3, %cst_51 {dimension_numbers = #tpu.dot_dimension_numbers<[1], [0], [0], [1], [0, 0, 1, 1], [], []>} : vector<2x32xbf16>, vector<32x128xbf16>, vector<2x128xf32> -> vector<2x128xf32>
    %250 = arith.addf %247, %249 : vector<2x128xf32>
    %251 = vector.extract_strided_slice %250 {offsets = [0, 0], sizes = [2, 32], strides = [1, 1]} : vector<2x128xf32> to vector<2x32xf32>
    %252 = arith.negf %251 : vector<2x32xf32>
    %253 = math.exp %252 : vector<2x32xf32>
    %cst_52 = arith.constant 1.000000e+00 : f32
    %254 = vector.broadcast %cst_52 : f32 to vector<2x32xf32>
    %255 = arith.addf %254, %253 : vector<2x32xf32>
    %256 = arith.divf %254, %255 : vector<2x32xf32>
    %257 = vector.extract_strided_slice %250 {offsets = [0, 32], sizes = [2, 32], strides = [1, 1]} : vector<2x128xf32> to vector<2x32xf32>
    %258 = arith.negf %257 : vector<2x32xf32>
    %259 = math.exp %258 : vector<2x32xf32>
    %cst_53 = arith.constant 1.000000e+00 : f32
    %260 = vector.broadcast %cst_53 : f32 to vector<2x32xf32>
    %261 = arith.addf %260, %259 : vector<2x32xf32>
    %262 = arith.divf %260, %261 : vector<2x32xf32>
    %263 = vector.extract_strided_slice %250 {offsets = [0, 64], sizes = [2, 32], strides = [1, 1]} : vector<2x128xf32> to vector<2x32xf32>
    %264 = math.tanh %263 : vector<2x32xf32>
    %265 = vector.extract_strided_slice %250 {offsets = [0, 96], sizes = [2, 32], strides = [1, 1]} : vector<2x128xf32> to vector<2x32xf32>
    %266 = arith.negf %265 : vector<2x32xf32>
    %267 = math.exp %266 : vector<2x32xf32>
    %cst_54 = arith.constant 1.000000e+00 : f32
    %268 = vector.broadcast %cst_54 : f32 to vector<2x32xf32>
    %269 = arith.addf %268, %267 : vector<2x32xf32>
    %270 = arith.divf %268, %269 : vector<2x32xf32>
    %271 = arith.mulf %262, %239 : vector<2x32xf32>
    %272 = arith.mulf %256, %264 : vector<2x32xf32>
    %273 = arith.addf %271, %272 : vector<2x32xf32>
    %274 = math.tanh %273 : vector<2x32xf32>
    %275 = arith.mulf %270, %274 : vector<2x32xf32>
    %276 = arith.truncf %275 : vector<2x32xf32> to vector<2x32xbf16>
    %c0_55 = arith.constant 0 : index
    %c7 = arith.constant 7 : index
    %c0_56 = arith.constant 0 : index
    %277 = vector.load %arg4[%c0_55, %c7, %c0_56] : memref<2x8x32xbf16, #tpu.memory_space<vmem>>, vector<2x1x32xbf16>
    %278 = vector.shape_cast %277 : vector<2x1x32xbf16> to vector<2x32xbf16>
    %279 = vector.shape_cast %276 : vector<2x32xbf16> to vector<2x1x32xbf16>
    tpu.vector_store %arg4[%c0_55, %c7, %c0_56], %279 {strides = array<i32>} : memref<2x8x32xbf16, #tpu.memory_space<vmem>>, vector<2x1x32xbf16>,
    %c0_57 = arith.constant 0 : index
    %c0_58 = arith.constant 0 : index
    %280 = vector.load %arg5[%c0_57, %c0_58] : memref<2x32xf32, #tpu.memory_space<vmem>>, vector<2x32xf32>
    tpu.vector_store %arg5[%c0_57, %c0_58], %275 {strides = array<i32>} : memref<2x32xf32, #tpu.memory_space<vmem>>, vector<2x32xf32>,
    %c0_59 = arith.constant 0 : index
    %c0_60 = arith.constant 0 : index
    %281 = vector.load %arg6[%c0_59, %c0_60] : memref<2x32xf32, #tpu.memory_space<vmem>>, vector<2x32xf32>
    tpu.vector_store %arg6[%c0_59, %c0_60], %273 {strides = array<i32>} : memref<2x32xf32, #tpu.memory_space<vmem>>, vector<2x32xf32>,
    return
  }
  func.func @transform_0(%arg0: i32, %arg1: i32) -> (i32, i32, i32) {
    %c0_i32 = arith.constant 0 : i32
    %c0_i32_0 = arith.constant 0 : i32
    return %arg0, %arg1, %c0_i32 : i32, i32, i32
  }
  func.func @transform_1(%arg0: i32, %arg1: i32) -> (i32, i32) {
    %c0_i32 = arith.constant 0 : i32
    %c0_i32_0 = arith.constant 0 : i32
    %c0_i32_1 = arith.constant 0 : i32
    return %c0_i32, %c0_i32_0 : i32, i32
  }
  func.func @transform_2(%arg0: i32, %arg1: i32) -> (i32, i32, i32) {
    %c0_i32 = arith.constant 0 : i32
    %c0_i32_0 = arith.constant 0 : i32
    return %arg0, %arg1, %c0_i32 : i32, i32, i32
  }
}

module attributes {stable_mosaic.version = 11 : i64} {
  func.func @_attn_heads_kernel(%arg0: i32, %arg1: i32, %arg2: memref<2x8x32xbf16, #tpu.memory_space<vmem>>, %arg3: memref<32x32xbf16, #tpu.memory_space<vmem>>, %arg4: memref<1x32xf32, #tpu.memory_space<vmem>>, %arg5: memref<1x32xf32, #tpu.memory_space<vmem>>, %arg6: memref<32x3xf32, #tpu.memory_space<vmem>>, %arg7: memref<1x3xf32, #tpu.memory_space<vmem>>, %arg8: memref<2x3xf32, #tpu.memory_space<vmem>>, %arg9: memref<2x1x1xf32, #tpu.memory_space<vmem>>, %arg10: memref<2x1x1xf32, #tpu.memory_space<vmem>>, %arg11: memref<2x1x32xf32, #tpu.memory_space<vmem>>) attributes {dimension_semantics = [#tpu.dimension_semantics<parallel>, #tpu.dimension_semantics<arbitrary>], iteration_bounds = array<i64: 1, 1>, scalar_prefetch = 0 : i64, scratch_operands = 3 : i64, tpu.core_type = #tpu.core_type<tc>, window_params = [{transform_indices = @transform_0, window_bounds = array<i64: 2, 8, 32>}, {pipeline_mode = #tpu.pipeline_mode<synchronous>, transform_indices = @transform_1, window_bounds = array<i64: 32, 32>}, {pipeline_mode = #tpu.pipeline_mode<synchronous>, transform_indices = @transform_2, window_bounds = array<i64: 1, 32>}, {pipeline_mode = #tpu.pipeline_mode<synchronous>, transform_indices = @transform_3, window_bounds = array<i64: 1, 32>}, {pipeline_mode = #tpu.pipeline_mode<synchronous>, transform_indices = @transform_4, window_bounds = array<i64: 32, 3>}, {pipeline_mode = #tpu.pipeline_mode<synchronous>, transform_indices = @transform_5, window_bounds = array<i64: 1, 3>}, {transform_indices = @transform_6, window_bounds = array<i64: 2, 3>}]} {
    %c0_i32 = arith.constant 0 : i32
    %0 = arith.cmpi eq, %arg1, %c0_i32 : i32
    %1 = arith.extui %0 : i1 to i32
    %c0_i32_0 = arith.constant 0 : i32
    %2 = arith.cmpi ne, %1, %c0_i32_0 : i32
    scf.if %2 {
      %cst_35 = arith.constant 0xFF800000 : f32
      %56 = vector.broadcast %cst_35 : f32 to vector<2x1x1xf32>
      %c0_36 = arith.constant 0 : index
      %c0_37 = arith.constant 0 : index
      %c0_38 = arith.constant 0 : index
      %57 = vector.load %arg9[%c0_36, %c0_37, %c0_38] : memref<2x1x1xf32, #tpu.memory_space<vmem>>, vector<2x1x1xf32>
      tpu.vector_store %arg9[%c0_36, %c0_37, %c0_38], %56 {strides = array<i32>} : memref<2x1x1xf32, #tpu.memory_space<vmem>>, vector<2x1x1xf32>,
      %cst_39 = arith.constant 0.000000e+00 : f32
      %58 = vector.broadcast %cst_39 : f32 to vector<2x1x1xf32>
      %c0_40 = arith.constant 0 : index
      %c0_41 = arith.constant 0 : index
      %c0_42 = arith.constant 0 : index
      %59 = vector.load %arg10[%c0_40, %c0_41, %c0_42] : memref<2x1x1xf32, #tpu.memory_space<vmem>>, vector<2x1x1xf32>
      tpu.vector_store %arg10[%c0_40, %c0_41, %c0_42], %58 {strides = array<i32>} : memref<2x1x1xf32, #tpu.memory_space<vmem>>, vector<2x1x1xf32>,
      %cst_43 = arith.constant 0.000000e+00 : f32
      %60 = vector.broadcast %cst_43 : f32 to vector<2x1x32xf32>
      %c0_44 = arith.constant 0 : index
      %c0_45 = arith.constant 0 : index
      %c0_46 = arith.constant 0 : index
      %61 = vector.load %arg11[%c0_44, %c0_45, %c0_46] : memref<2x1x32xf32, #tpu.memory_space<vmem>>, vector<2x1x32xf32>
      tpu.vector_store %arg11[%c0_44, %c0_45, %c0_46], %60 {strides = array<i32>} : memref<2x1x32xf32, #tpu.memory_space<vmem>>, vector<2x1x32xf32>,
    } else {
    }
    %c0 = arith.constant 0 : index
    %c0_1 = arith.constant 0 : index
    %c0_2 = arith.constant 0 : index
    %3 = vector.load %arg2[%c0, %c0_1, %c0_2] : memref<2x8x32xbf16, #tpu.memory_space<vmem>>, vector<2x8x32xbf16>
    %4 = vector.shape_cast %3 : vector<2x8x32xbf16> to vector<16x32xbf16>
    %c0_3 = arith.constant 0 : index
    %c0_4 = arith.constant 0 : index
    %5 = vector.load %arg3[%c0_3, %c0_4] : memref<32x32xbf16, #tpu.memory_space<vmem>>, vector<32x32xbf16>
    %cst = arith.constant dense<0.000000e+00> : vector<16x32xf32>
    %6 = tpu.matmul %4, %5, %cst {dimension_numbers = #tpu.dot_dimension_numbers<[1], [0], [0], [1], [0, 0, 1, 1], [], []>} : vector<16x32xbf16>, vector<32x32xbf16>, vector<16x32xf32> -> vector<16x32xf32>
    %c0_5 = arith.constant 0 : index
    %c0_6 = arith.constant 0 : index
    %7 = vector.load %arg4[%c0_5, %c0_6] : memref<1x32xf32, #tpu.memory_space<vmem>>, vector<1x32xf32>
    %8 = vector.broadcast %7 : vector<1x32xf32> to vector<16x32xf32>
    %9 = arith.addf %6, %8 : vector<16x32xf32>
    %10 = math.tanh %9 : vector<16x32xf32>
    %c0_7 = arith.constant 0 : index
    %c0_8 = arith.constant 0 : index
    %11 = vector.load %arg5[%c0_7, %c0_8] : memref<1x32xf32, #tpu.memory_space<vmem>>, vector<1x32xf32>
    %12 = vector.broadcast %11 : vector<1x32xf32> to vector<16x32xf32>
    %13 = arith.mulf %10, %12 : vector<16x32xf32>
    %cst_9 = arith.constant dense<0.000000e+00> : vector<16xf32>
    %14 = vector.multi_reduction <add>, %13, %cst_9 [1] : vector<16x32xf32> to vector<16xf32>
    %15 = vector.shape_cast %14 : vector<16xf32> to vector<16x1xf32>
    %16 = vector.shape_cast %15 : vector<16x1xf32> to vector<2x8x1xf32>
    %c8_i32 = arith.constant 8 : i32
    %17 = arith.muli %arg1, %c8_i32 : i32
    %18 = tpu.iota {dimensions = array<i32: 1>} : vector<1x8x1xi32>
    %19 = vector.broadcast %17 : i32 to vector<1x8x1xi32>
    %20 = arith.addi %19, %18 : vector<1x8x1xi32>
    %c8_i32_10 = arith.constant 8 : i32
    %21 = vector.broadcast %c8_i32_10 : i32 to vector<1x8x1xi32>
    %22 = arith.cmpi slt, %20, %21 : vector<1x8x1xi32>
    %cst_11 = arith.constant 0xFF800000 : f32
    %23 = vector.shape_cast %22 : vector<1x8x1xi1> to vector<1x8x1xi1>
    %24 = vector.broadcast %23 : vector<1x8x1xi1> to vector<2x8x1xi1>
    %25 = vector.broadcast %cst_11 : f32 to vector<2x8x1xf32>
    %26 = arith.select %24, %16, %25 : vector<2x8x1xi1>, vector<2x8x1xf32>
    %c0_12 = arith.constant 0 : index
    %c0_13 = arith.constant 0 : index
    %c0_14 = arith.constant 0 : index
    %27 = vector.load %arg9[%c0_12, %c0_13, %c0_14] : memref<2x1x1xf32, #tpu.memory_space<vmem>>, vector<2x1x1xf32>
    %cst_15 = arith.constant dense<0xFF800000> : vector<2x1xf32>
    %28 = vector.multi_reduction <maximumf>, %26, %cst_15 [1] : vector<2x8x1xf32> to vector<2x1xf32>
    %29 = vector.shape_cast %28 : vector<2x1xf32> to vector<2x1x1xf32>
    %30 = arith.maximumf %27, %29 : vector<2x1x1xf32>
    %31 = arith.subf %27, %30 : vector<2x1x1xf32>
    %32 = math.exp %31 : vector<2x1x1xf32>
    %33 = vector.broadcast %30 : vector<2x1x1xf32> to vector<2x8x1xf32>
    %34 = arith.subf %26, %33 : vector<2x8x1xf32>
    %35 = math.exp %34 : vector<2x8x1xf32>
    %c0_16 = arith.constant 0 : index
    %c0_17 = arith.constant 0 : index
    %c0_18 = arith.constant 0 : index
    %36 = vector.load %arg10[%c0_16, %c0_17, %c0_18] : memref<2x1x1xf32, #tpu.memory_space<vmem>>, vector<2x1x1xf32>
    %37 = arith.mulf %32, %36 : vector<2x1x1xf32>
    %cst_19 = arith.constant dense<0.000000e+00> : vector<2x1xf32>
    %38 = vector.multi_reduction <add>, %35, %cst_19 [1] : vector<2x8x1xf32> to vector<2x1xf32>
    %39 = vector.shape_cast %38 : vector<2x1xf32> to vector<2x1x1xf32>
    %40 = arith.addf %37, %39 : vector<2x1x1xf32>
    %c0_20 = arith.constant 0 : index
    %c0_21 = arith.constant 0 : index
    %c0_22 = arith.constant 0 : index
    %41 = vector.load %arg10[%c0_20, %c0_21, %c0_22] : memref<2x1x1xf32, #tpu.memory_space<vmem>>, vector<2x1x1xf32>
    tpu.vector_store %arg10[%c0_20, %c0_21, %c0_22], %40 {strides = array<i32>} : memref<2x1x1xf32, #tpu.memory_space<vmem>>, vector<2x1x1xf32>,
    %c0_23 = arith.constant 0 : index
    %c0_24 = arith.constant 0 : index
    %c0_25 = arith.constant 0 : index
    %42 = vector.load %arg11[%c0_23, %c0_24, %c0_25] : memref<2x1x32xf32, #tpu.memory_space<vmem>>, vector<2x1x32xf32>
    %43 = vector.broadcast %32 : vector<2x1x1xf32> to vector<2x1x32xf32>
    %44 = arith.mulf %43, %42 : vector<2x1x32xf32>
    %45 = arith.extf %3 : vector<2x8x32xbf16> to vector<2x8x32xf32>
    %46 = vector.broadcast %35 : vector<2x8x1xf32> to vector<2x8x32xf32>
    %47 = arith.mulf %46, %45 : vector<2x8x32xf32>
    %cst_26 = arith.constant dense<0.000000e+00> : vector<2x32xf32>
    %48 = vector.multi_reduction <add>, %47, %cst_26 [1] : vector<2x8x32xf32> to vector<2x32xf32>
    %49 = vector.shape_cast %48 : vector<2x32xf32> to vector<2x1x32xf32>
    %50 = arith.addf %44, %49 : vector<2x1x32xf32>
    %c0_27 = arith.constant 0 : index
    %c0_28 = arith.constant 0 : index
    %c0_29 = arith.constant 0 : index
    %51 = vector.load %arg11[%c0_27, %c0_28, %c0_29] : memref<2x1x32xf32, #tpu.memory_space<vmem>>, vector<2x1x32xf32>
    tpu.vector_store %arg11[%c0_27, %c0_28, %c0_29], %50 {strides = array<i32>} : memref<2x1x32xf32, #tpu.memory_space<vmem>>, vector<2x1x32xf32>,
    %c0_30 = arith.constant 0 : index
    %c0_31 = arith.constant 0 : index
    %c0_32 = arith.constant 0 : index
    %52 = vector.load %arg9[%c0_30, %c0_31, %c0_32] : memref<2x1x1xf32, #tpu.memory_space<vmem>>, vector<2x1x1xf32>
    tpu.vector_store %arg9[%c0_30, %c0_31, %c0_32], %30 {strides = array<i32>} : memref<2x1x1xf32, #tpu.memory_space<vmem>>, vector<2x1x1xf32>,
    %c0_i32_33 = arith.constant 0 : i32
    %53 = arith.cmpi eq, %arg1, %c0_i32_33 : i32
    %54 = arith.extui %53 : i1 to i32
    %c0_i32_34 = arith.constant 0 : i32
    %55 = arith.cmpi ne, %54, %c0_i32_34 : i32
    scf.if %55 {
      %c0_35 = arith.constant 0 : index
      %c0_36 = arith.constant 0 : index
      %c0_37 = arith.constant 0 : index
      %56 = vector.load %arg11[%c0_35, %c0_36, %c0_37] : memref<2x1x32xf32, #tpu.memory_space<vmem>>, vector<2x1x32xf32>
      %c0_38 = arith.constant 0 : index
      %c0_39 = arith.constant 0 : index
      %c0_40 = arith.constant 0 : index
      %57 = vector.load %arg10[%c0_38, %c0_39, %c0_40] : memref<2x1x1xf32, #tpu.memory_space<vmem>>, vector<2x1x1xf32>
      %58 = vector.broadcast %57 : vector<2x1x1xf32> to vector<2x1x32xf32>
      %59 = arith.divf %56, %58 : vector<2x1x32xf32>
      %60 = vector.shape_cast %59 : vector<2x1x32xf32> to vector<2x32xf32>
      %c0_41 = arith.constant 0 : index
      %c0_42 = arith.constant 0 : index
      %61 = vector.load %arg6[%c0_41, %c0_42] : memref<32x3xf32, #tpu.memory_space<vmem>>, vector<32x3xf32>
      %cst_43 = arith.constant dense<0.000000e+00> : vector<2x3xf32>
      %62 = tpu.matmul %60, %61, %cst_43 {dimension_numbers = #tpu.dot_dimension_numbers<[1], [0], [0], [1], [0, 0, 1, 1], [], []>} : vector<2x32xf32>, vector<32x3xf32>, vector<2x3xf32> -> vector<2x3xf32>
      %c0_44 = arith.constant 0 : index
      %c0_45 = arith.constant 0 : index
      %63 = vector.load %arg7[%c0_44, %c0_45] : memref<1x3xf32, #tpu.memory_space<vmem>>, vector<1x3xf32>
      %64 = vector.broadcast %63 : vector<1x3xf32> to vector<2x3xf32>
      %65 = arith.addf %62, %64 : vector<2x3xf32>
      %66 = tpu.iota {dimensions = array<i32: 1>} : vector<2x3xi32>
      %c2_i32 = arith.constant 2 : i32
      %67 = vector.broadcast %c2_i32 : i32 to vector<2x3xi32>
      %68 = arith.cmpi eq, %66, %67 : vector<2x3xi32>
      %69 = arith.negf %65 : vector<2x3xf32>
      %70 = math.exp %69 : vector<2x3xf32>
      %cst_46 = arith.constant 1.000000e+00 : f32
      %71 = vector.broadcast %cst_46 : f32 to vector<2x3xf32>
      %72 = arith.addf %71, %70 : vector<2x3xf32>
      %73 = arith.divf %71, %72 : vector<2x3xf32>
      %74 = arith.select %68, %73, %65 : vector<2x3xi1>, vector<2x3xf32>
      %c0_47 = arith.constant 0 : index
      %c0_48 = arith.constant 0 : index
      %75 = vector.load %arg8[%c0_47, %c0_48] : memref<2x3xf32, #tpu.memory_space<vmem>>, vector<2x3xf32>
      tpu.vector_store %arg8[%c0_47, %c0_48], %74 {strides = array<i32>} : memref<2x3xf32, #tpu.memory_space<vmem>>, vector<2x3xf32>,
    } else {
    }
    return
  }
  func.func @transform_0(%arg0: i32, %arg1: i32) -> (i32, i32, i32) {
    %c0_i32 = arith.constant 0 : i32
    %c0_i32_0 = arith.constant 0 : i32
    return %arg0, %arg1, %c0_i32 : i32, i32, i32
  }
  func.func @transform_1(%arg0: i32, %arg1: i32) -> (i32, i32) {
    %c0_i32 = arith.constant 0 : i32
    %c0_i32_0 = arith.constant 0 : i32
    %c0_i32_1 = arith.constant 0 : i32
    return %c0_i32, %c0_i32_0 : i32, i32
  }
  func.func @transform_2(%arg0: i32, %arg1: i32) -> (i32, i32) {
    %c0_i32 = arith.constant 0 : i32
    %c0_i32_0 = arith.constant 0 : i32
    %c0_i32_1 = arith.constant 0 : i32
    return %c0_i32, %c0_i32_0 : i32, i32
  }
  func.func @transform_3(%arg0: i32, %arg1: i32) -> (i32, i32) {
    %c0_i32 = arith.constant 0 : i32
    %c0_i32_0 = arith.constant 0 : i32
    %c0_i32_1 = arith.constant 0 : i32
    return %c0_i32, %c0_i32_0 : i32, i32
  }
  func.func @transform_4(%arg0: i32, %arg1: i32) -> (i32, i32) {
    %c0_i32 = arith.constant 0 : i32
    %c0_i32_0 = arith.constant 0 : i32
    %c0_i32_1 = arith.constant 0 : i32
    return %c0_i32, %c0_i32_0 : i32, i32
  }
  func.func @transform_5(%arg0: i32, %arg1: i32) -> (i32, i32) {
    %c0_i32 = arith.constant 0 : i32
    %c0_i32_0 = arith.constant 0 : i32
    %c0_i32_1 = arith.constant 0 : i32
    return %c0_i32, %c0_i32_0 : i32, i32
  }
  func.func @transform_6(%arg0: i32, %arg1: i32) -> (i32, i32) {
    %c0_i32 = arith.constant 0 : i32
    %c0_i32_0 = arith.constant 0 : i32
    return %arg0, %c0_i32 : i32, i32
  }
}

</mosaic_0001>

<bundles_post_ra>
// kernel: wav2vec_lstm_forward.10
= control target key start
LH: loop header
LB: loop body
LE: loop exit
PB: predicated region body
PF: predicated region fallthrough
CT: control target
= control target key end

     0   :  { %s2376_s12 = smov 0   ;;  %s2378_s13 = smov 0   ;;  %s2588_s0 = inlined_call_operand.vmem [shape: bf16[1024,10], index: 0, kind: input, shape index: {}]   ;;  %s2589_s1 = inlined_call_operand.vmem [shape: bf16[10,128], index: 1, kind: input, shape index: {}]   ;;  %s2590_s2 = inlined_call_operand.vmem [shape: f32[1,128], index: 2, kind: input, shape index: {}]   ;;  %s2591_s3 = inlined_call_operand.vmem [shape: bf16[1024,128], index: 3, kind: output, shape index: {}]  }
   0x1   :  { %s2380_s14 = smov 0  }
   0x2 LB: > { %s32_s15 = sadd.s32 1, %s2350_s13  ;;  %p1780_p0 = scmp.ge.s32.totalorder %s2354_s14, 1  ;;  %s2354_s14 = sphi %s2380_s14, %s13_s14   ;;  %s2350_s13 = sphi %s2378_s13, %s2593_s13   ;;  %s2346_s12 = sphi %s2376_s12, %s2592_s12  }
   0x3   : > { %p34_p1 = scmp.ge.s32.totalorder %s32_s15, 2  ;;  %p188_p2 = scmp.lt.s32.totalorder %s2354_s14, 3 }
   0x5   : > { %s2595_s15 = smov (%p34_p1, %s32_s15), 0  ;;  %p189_p3 = pnand %p1780_p0, %p188_p2 }
   0x6   : > { %s1781_s18 = sshll.u32 (!%p189_p3), %s2346_s12, 6 }
   0x7   : > { %192 = sbr.rel (%p189_p3) target bundleno = 280 (0x118), region = 32  ;;  %p230_p4 = scmp.lt.s32.totalorder (!%p189_p3), %s1781_s18, 127 }
   0xc   : > { %v2299_v0 = vld [vmem:[%s2589_s1] sm:$0x1f]   ;;  %vm720_vm0 = vcmask 1044480   ;;  %s2597_s18 = smov (!%p230_p4, %s1781_s18), 127  ;;  %vm623_vm1 = vcmask 80896  }
   0xd   : > { %2273 = vmatprep.subr.msk.bf16.mxu0 %vm720_vm0, %v2299_v0  ;;  %2274 = vmatprep.subr.msk.bf16.mxu1 %vm720_vm0, %v2299_v0  ;;  %v722_v1 = vsel %vm720_vm0, %v2299_v0, 0  ;;  %s1782_s19 = sshll.u32 %s2597_s18, 2  ;;  %v2474_v35 = vld [vmem:[%s2590_s2] ss:$0 sm:$0xff] }
   0xe   : > { %2206 = vmatpush3.bf16.msra.mxu0 %v722_v1  ;;  %2272 = vmatpush3.bf16.msra.mxu1 %v722_v1  ;;  %s2405_s22 = scalar_lea.vmem %s2588_s0, %s1782_s19  ;;  %s2488_s27 = scalar_lea.vmem %s2591_s3, %s1782_s19 }
   0xf   : > { %v2300_v2 = vld [vmem:[%s2405_s22] sm:$0xff]   ;;  %v2302_v4 = vld [vmem:[%s2405_s22 + $0x8] sm:$0xff]   ;;  %v2304_v6 = vld [vmem:[%s2405_s22 + $0x10] sm:$0xff]  }
  0x10   : > { %v2301_v3 = vld [vmem:[%s2405_s22 + $0x80] sm:$0xff]   ;;  %2207 = vmatprep.mubr.msk.bf16.mxu0 %vm623_vm1, %v2300_v2  ;;  %v2303_v5 = vld [vmem:[%s2405_s22 + $0x88] sm:$0xff]   ;;  %v2305_v7 = vld [vmem:[%s2405_s22 + $0x90] sm:$0xff]  }
  0x11   : > { %2239 = vmatprep.mubr.msk.bf16.mxu1 %vm623_vm1, %v2301_v3  ;;  %2208 = vmatmul.mubr.msk.bf16.vlgmr.msra.gmra.mxu0 %vm623_vm1, %v2302_v4  ;;  %v2306_v8 = vld [vmem:[%s2405_s22 + $0x18] sm:$0xff]   ;;  %v2308_v10 = vld [vmem:[%s2405_s22 + $0x20] sm:$0xff]   ;;  %v2310_v12 = vld [vmem:[%s2405_s22 + $0x28] sm:$0xff]  }
  0x12   : > { %2240 = vmatmul.mubr.msk.bf16.vlgmr.msra.gmra.mxu1 %vm623_vm1, %v2303_v5  ;;  %2211 = vmatprep.mubr.msk.bf16.mxu0 %vm623_vm1, %v2304_v6  ;;  %v2307_v9 = vld [vmem:[%s2405_s22 + $0x98] sm:$0xff]   ;;  %v2309_v11 = vld [vmem:[%s2405_s22 + $0xa0] sm:$0xff]   ;;  %v2311_v13 = vld [vmem:[%s2405_s22 + $0xa8] sm:$0xff]  }
  0x13   : > { %2243 = vmatprep.mubr.msk.bf16.mxu1 %vm623_vm1, %v2305_v7  ;;  %v2312_v14 = vld [vmem:[%s2405_s22 + $0x30] sm:$0xff]   ;;  %v2314_v16 = vld [vmem:[%s2405_s22 + $0x38] sm:$0xff]   ;;  %v2316_v18 = vld [vmem:[%s2405_s22 + $0x40] sm:$0xff]  }
  0x14   : > { %v2313_v15 = vld [vmem:[%s2405_s22 + $0xb0] sm:$0xff]   ;;  %v2315_v17 = vld [vmem:[%s2405_s22 + $0xb8] sm:$0xff]   ;;  %v2317_v19 = vld [vmem:[%s2405_s22 + $0xc0] sm:$0xff]  }
  0x15   : > { %v2318_v20 = vld [vmem:[%s2405_s22 + $0x48] sm:$0xff]   ;;  %v2320_v22 = vld [vmem:[%s2405_s22 + $0x50] sm:$0xff]   ;;  %v2322_v24 = vld [vmem:[%s2405_s22 + $0x58] sm:$0xff]  }
  0x16   : > { %v2319_v21 = vld [vmem:[%s2405_s22 + $0xc8] sm:$0xff]   ;;  %v2321_v23 = vld [vmem:[%s2405_s22 + $0xd0] sm:$0xff]   ;;  %v2323_v25 = vld [vmem:[%s2405_s22 + $0xd8] sm:$0xff]  }
  0x17   : > { %v2324_v26 = vld [vmem:[%s2405_s22 + $0x60] sm:$0xff]   ;;  %v2326_v28 = vld [vmem:[%s2405_s22 + $0x68] sm:$0xff]   ;;  %v2328_v30 = vld [vmem:[%s2405_s22 + $0x70] sm:$0xff]  }
  0x18   : > { %v2325_v27 = vld [vmem:[%s2405_s22 + $0xe0] sm:$0xff]   ;;  %v2327_v29 = vld [vmem:[%s2405_s22 + $0xe8] sm:$0xff]   ;;  %v2329_v31 = vld [vmem:[%s2405_s22 + $0xf0] sm:$0xff]  }
  0x19   : > { %2212 = vmatmul.mubr.msk.bf16.gmra.mxu0 %vm623_vm1, %v2306_v8  ;;  %v2330_v32 = vld [vmem:[%s2405_s22 + $0x78] sm:$0xff]  }
  0x1a   : > { %2244 = vmatmul.mubr.msk.bf16.gmra.mxu1 %vm623_vm1, %v2307_v9  ;;  %2215 = vmatprep.mubr.msk.bf16.mxu0 %vm623_vm1, %v2308_v10  ;;  %v2331_v33 = vld [vmem:[%s2405_s22 + $0xf8] sm:$0xff]  }
  0x1b   : > { %2247 = vmatprep.mubr.msk.bf16.mxu1 %vm623_vm1, %v2309_v11 }
  0x21   : > { %2216 = vmatmul.mubr.msk.bf16.gmra.mxu0 %vm623_vm1, %v2310_v12 }
  0x22   : > { %2248 = vmatmul.mubr.msk.bf16.gmra.mxu1 %vm623_vm1, %v2311_v13  ;;  %2219 = vmatprep.mubr.msk.bf16.mxu0 %vm623_vm1, %v2312_v14 }
  0x23   : > { %2251 = vmatprep.mubr.msk.bf16.mxu1 %vm623_vm1, %v2313_v15 }
  0x29   : > { %2220 = vmatmul.mubr.msk.bf16.gmra.mxu0 %vm623_vm1, %v2314_v16 }
  0x2a   : > { %2252 = vmatmul.mubr.msk.bf16.gmra.mxu1 %vm623_vm1, %v2315_v17  ;;  %2223 = vmatprep.mubr.msk.bf16.mxu0 %vm623_vm1, %v2316_v18 }
  0x2b   : > { %2255 = vmatprep.mubr.msk.bf16.mxu1 %vm623_vm1, %v2317_v19 }
  0x31   : > { %2224 = vmatmul.mubr.msk.bf16.gmra.mxu0 %vm623_vm1, %v2318_v20 }
  0x32   : > { %2256 = vmatmul.mubr.msk.bf16.gmra.mxu1 %vm623_vm1, %v2319_v21  ;;  %2227 = vmatprep.mubr.msk.bf16.mxu0 %vm623_vm1, %v2320_v22 }
  0x33   : > { %2259 = vmatprep.mubr.msk.bf16.mxu1 %vm623_vm1, %v2321_v23 }
  0x39   : > { %2228 = vmatmul.mubr.msk.bf16.gmra.mxu0 %vm623_vm1, %v2322_v24 }
  0x3a   : > { %2260 = vmatmul.mubr.msk.bf16.gmra.mxu1 %vm623_vm1, %v2323_v25  ;;  %2231 = vmatprep.mubr.msk.bf16.mxu0 %vm623_vm1, %v2324_v26 }
  0x3b   : > { %2263 = vmatprep.mubr.msk.bf16.mxu1 %vm623_vm1, %v2325_v27 }
  0x41   : > { %2232 = vmatmul.mubr.msk.bf16.gmra.mxu0 %vm623_vm1, %v2326_v28 }
  0x42   : > { %2264 = vmatmul.mubr.msk.bf16.gmra.mxu1 %vm623_vm1, %v2327_v29  ;;  %2235 = vmatprep.mubr.msk.bf16.mxu0 %vm623_vm1, %v2328_v30 }
  0x43   : > { %2267 = vmatprep.mubr.msk.bf16.mxu1 %vm623_vm1, %v2329_v31 }
  0x49   : > { %2236 = vmatmul.mubr.msk.bf16.gmra.mxu0 %vm623_vm1, %v2330_v32 }
  0x4a   : > { %2268 = vmatmul.mubr.msk.bf16.gmra.mxu1 %vm623_vm1, %v2331_v33 }
  0xd1   : > { %v2209_v34 = vpop.f32.mrf.mxu0 }
  0xd2   : > { %v2241_v36 = vpop.f32.mrf.mxu1  ;;  %v1217_v38 = vadd.f32 %v2209_v34, %v2474_v35 }
  0xd3   : > { %v758_v37 = vpop.f32.mrf.mxu0  ;;  %v1249_v40 = vadd.f32 %v2241_v36, %v2474_v35 }
  0xd4   : > { %v886_v39 = vpop.f32.mrf.mxu1  ;;  %v1215_v42 = vadd.f32 %v2474_v35, %v758_v37  ;;  %v1281_v48 = vmax.f32 %v1217_v38, 0.0 }
  0xd5   : > { %v2210_v41 = vpop.f32.mrf.mxu0  ;;  %v1247_v45 = vadd.f32 %v2474_v35, %v886_v39  ;;  %v1313_v52 = vmax.f32 %v1249_v40, 0.0 }
  0xd6   : > { %v1218_v43 = vadd.f32 %v2210_v41, %v2474_v35  ;;  %v2242_v44 = vpop.f32.mrf.mxu1  ;;  %v1279_v56 = vmax.f32 %v1215_v42, 0.0 }
  0xd7   : > { %v1250_v46 = vadd.f32 %v2242_v44, %v2474_v35  ;;  %v761_v47 = vpop.f32.mrf.mxu0  ;;  %v1311_v60 = vmax.f32 %v1247_v45, 0.0 }
  0xd8   : > { %v1282_v49 = vmax.f32 %v1218_v43, 0.0  ;;  %v1216_v50 = vadd.f32 %v2474_v35, %v761_v47  ;;  %v889_v51 = vpop.f32.mrf.mxu1 }
  0xd9   : > { %v1314_v53 = vmax.f32 %v1250_v46, 0.0  ;;  %v1248_v54 = vadd.f32 %v2474_v35, %v889_v51  ;;  %v2213_v55 = vpop.f32.mrf.mxu0 }
  0xda   : > { %v1989_v57 = vpack.c.bf16 %v1282_v49, %v1281_v48  ;;  %v1280_v58 = vmax.f32 %v1216_v50, 0.0  ;;  %v2245_v59 = vpop.f32.mrf.mxu1  ;;  %v1221_v1 = vadd.f32 %v2213_v55, %v2474_v35 }
  0xdb   : > { %v2069_v61 = vpack.c.bf16 %v1314_v53, %v1313_v52  ;;  %v1312_v62 = vmax.f32 %v1248_v54, 0.0  ;;  %v774_v63 = vpop.f32.mrf.mxu0  ;;  %v1253_v4 = vadd.f32 %v2245_v59, %v2474_v35 }
  0xdc   : > { %2141 = vst [vmem:[%s2488_s27 + $0x8] sm:$0xff] %v1989_v57   ;;  %v1984_v0 = vpack.c.bf16 %v1280_v58, %v1279_v56  ;;  %v902_v2 = vpop.f32.mrf.mxu1  ;;  %v1219_v6 = vadd.f32 %v2474_v35, %v774_v63  ;;  %v1285_v12 = vmax.f32 %v1221_v1, 0.0 }
  0xdd   : > { %2157 = vst [vmem:[%s2488_s27 + $0x88] sm:$0xff] %v2069_v61   ;;  %v2064_v3 = vpack.c.bf16 %v1312_v62, %v1311_v60  ;;  %v2214_v5 = vpop.f32.mrf.mxu0  ;;  %v1251_v9 = vadd.f32 %v2474_v35, %v902_v2  ;;  %v1317_v16 = vmax.f32 %v1253_v4, 0.0 }
  0xde   : > { %1985 = vst [vmem:[%s2488_s27] sm:$0xff] %v1984_v0   ;;  %v1222_v7 = vadd.f32 %v2214_v5, %v2474_v35  ;;  %v2246_v8 = vpop.f32.mrf.mxu1  ;;  %v1283_v20 = vmax.f32 %v1219_v6, 0.0 }
  0xdf   : > { %2156 = vst [vmem:[%s2488_s27 + $0x80] sm:$0xff] %v2064_v3   ;;  %v1254_v10 = vadd.f32 %v2246_v8, %v2474_v35  ;;  %v777_v11 = vpop.f32.mrf.mxu0  ;;  %v1315_v24 = vmax.f32 %v1251_v9, 0.0 }
  0xe0   : > { %v1286_v13 = vmax.f32 %v1222_v7, 0.0  ;;  %v1220_v14 = vadd.f32 %v2474_v35, %v777_v11  ;;  %v905_v15 = vpop.f32.mrf.mxu1 }
  0xe1   : > { %v1318_v17 = vmax.f32 %v1254_v10, 0.0  ;;  %v1252_v18 = vadd.f32 %v2474_v35, %v905_v15  ;;  %v2217_v19 = vpop.f32.mrf.mxu0 }
  0xe2   : > { %v1999_v21 = vpack.c.bf16 %v1286_v13, %v1285_v12  ;;  %v1284_v22 = vmax.f32 %v1220_v14, 0.0  ;;  %v2249_v23 = vpop.f32.mrf.mxu1  ;;  %v1225_v29 = vadd.f32 %v2217_v19, %v2474_v35 }
  0xe3   : > { %v2079_v25 = vpack.c.bf16 %v1318_v17, %v1317_v16  ;;  %v1316_v26 = vmax.f32 %v1252_v18, 0.0  ;;  %v790_v27 = vpop.f32.mrf.mxu0  ;;  %v1257_v32 = vadd.f32 %v2249_v23, %v2474_v35 }
  0xe4   : > { %2143 = vst [vmem:[%s2488_s27 + $0x18] sm:$0xff] %v1999_v21   ;;  %v1994_v28 = vpack.c.bf16 %v1284_v22, %v1283_v20  ;;  %v918_v30 = vpop.f32.mrf.mxu1  ;;  %v1223_v34 = vadd.f32 %v2474_v35, %v790_v27  ;;  %v1289_v41 = vmax.f32 %v1225_v29, 0.0 }
  0xe5   : > { %2159 = vst [vmem:[%s2488_s27 + $0x98] sm:$0xff] %v2079_v25   ;;  %v2074_v31 = vpack.c.bf16 %v1316_v26, %v1315_v24  ;;  %v2218_v33 = vpop.f32.mrf.mxu0  ;;  %v1255_v38 = vadd.f32 %v2474_v35, %v918_v30  ;;  %v1321_v45 = vmax.f32 %v1257_v32, 0.0 }
  0xe6   : > { %2142 = vst [vmem:[%s2488_s27 + $0x10] sm:$0xff] %v1994_v28   ;;  %v1226_v36 = vadd.f32 %v2218_v33, %v2474_v35  ;;  %v2250_v37 = vpop.f32.mrf.mxu1  ;;  %v1287_v49 = vmax.f32 %v1223_v34, 0.0 }
  0xe7   : > { %2158 = vst [vmem:[%s2488_s27 + $0x90] sm:$0xff] %v2074_v31   ;;  %v1258_v39 = vadd.f32 %v2250_v37, %v2474_v35  ;;  %v793_v40 = vpop.f32.mrf.mxu0  ;;  %v1319_v53 = vmax.f32 %v1255_v38, 0.0 }
  0xe8   : > { %v1290_v42 = vmax.f32 %v1226_v36, 0.0  ;;  %v1224_v43 = vadd.f32 %v2474_v35, %v793_v40  ;;  %v921_v44 = vpop.f32.mrf.mxu1 }
  0xe9   : > { %v1322_v46 = vmax.f32 %v1258_v39, 0.0  ;;  %v1256_v47 = vadd.f32 %v2474_v35, %v921_v44  ;;  %v2221_v48 = vpop.f32.mrf.mxu0 }
  0xea   : > { %v2009_v50 = vpack.c.bf16 %v1290_v42, %v1289_v41  ;;  %v1288_v51 = vmax.f32 %v1224_v43, 0.0  ;;  %v2253_v52 = vpop.f32.mrf.mxu1  ;;  %v1229_v58 = vadd.f32 %v2221_v48, %v2474_v35 }
  0xeb   : > { %v2089_v54 = vpack.c.bf16 %v1322_v46, %v1321_v45  ;;  %v1320_v55 = vmax.f32 %v1256_v47, 0.0  ;;  %v806_v56 = vpop.f32.mrf.mxu0  ;;  %v1261_v61 = vadd.f32 %v2253_v52, %v2474_v35 }
  0xec   : > { %2145 = vst [vmem:[%s2488_s27 + $0x28] sm:$0xff] %v2009_v50   ;;  %v2004_v57 = vpack.c.bf16 %v1288_v51, %v1287_v49  ;;  %v934_v59 = vpop.f32.mrf.mxu1  ;;  %v1227_v63 = vadd.f32 %v2474_v35, %v806_v56  ;;  %v1293_v5 = vmax.f32 %v1229_v58, 0.0 }
  0xed   : > { %2161 = vst [vmem:[%s2488_s27 + $0xa8] sm:$0xff] %v2089_v54   ;;  %v2084_v60 = vpack.c.bf16 %v1320_v55, %v1319_v53  ;;  %v2222_v62 = vpop.f32.mrf.mxu0  ;;  %v1259_v2 = vadd.f32 %v2474_v35, %v934_v59  ;;  %v1325_v9 = vmax.f32 %v1261_v61, 0.0 }
  0xee   : > { %2144 = vst [vmem:[%s2488_s27 + $0x20] sm:$0xff] %v2004_v57   ;;  %v1230_v0 = vadd.f32 %v2222_v62, %v2474_v35  ;;  %v2254_v1 = vpop.f32.mrf.mxu1  ;;  %v1291_v13 = vmax.f32 %v1227_v63, 0.0 }
  0xef   : > { %2160 = vst [vmem:[%s2488_s27 + $0xa0] sm:$0xff] %v2084_v60   ;;  %v1262_v3 = vadd.f32 %v2254_v1, %v2474_v35  ;;  %v809_v4 = vpop.f32.mrf.mxu0  ;;  %v1323_v17 = vmax.f32 %v1259_v2, 0.0 }
  0xf0   : > { %v1294_v6 = vmax.f32 %v1230_v0, 0.0  ;;  %v1228_v7 = vadd.f32 %v2474_v35, %v809_v4  ;;  %v937_v8 = vpop.f32.mrf.mxu1 }
  0xf1   : > { %v1326_v10 = vmax.f32 %v1262_v3, 0.0  ;;  %v1260_v11 = vadd.f32 %v2474_v35, %v937_v8  ;;  %v2225_v12 = vpop.f32.mrf.mxu0 }
  0xf2   : > { %v2019_v14 = vpack.c.bf16 %v1294_v6, %v1293_v5  ;;  %v1292_v15 = vmax.f32 %v1228_v7, 0.0  ;;  %v2257_v16 = vpop.f32.mrf.mxu1  ;;  %v1233_v22 = vadd.f32 %v2225_v12, %v2474_v35 }
  0xf3   : > { %v2099_v18 = vpack.c.bf16 %v1326_v10, %v1325_v9  ;;  %v1324_v19 = vmax.f32 %v1260_v11, 0.0  ;;  %v822_v20 = vpop.f32.mrf.mxu0  ;;  %v1265_v25 = vadd.f32 %v2257_v16, %v2474_v35 }
  0xf4   : > { %2147 = vst [vmem:[%s2488_s27 + $0x38] sm:$0xff] %v2019_v14   ;;  %v2014_v21 = vpack.c.bf16 %v1292_v15, %v1291_v13  ;;  %v950_v23 = vpop.f32.mrf.mxu1  ;;  %v1231_v27 = vadd.f32 %v2474_v35, %v822_v20  ;;  %v1297_v33 = vmax.f32 %v1233_v22, 0.0 }
  0xf5   : > { %2163 = vst [vmem:[%s2488_s27 + $0xb8] sm:$0xff] %v2099_v18   ;;  %v2094_v24 = vpack.c.bf16 %v1324_v19, %v1323_v17  ;;  %v2226_v26 = vpop.f32.mrf.mxu0  ;;  %v1263_v30 = vadd.f32 %v2474_v35, %v950_v23  ;;  %v1329_v38 = vmax.f32 %v1265_v25, 0.0 }
  0xf6   : > { %2146 = vst [vmem:[%s2488_s27 + $0x30] sm:$0xff] %v2014_v21   ;;  %v1234_v28 = vadd.f32 %v2226_v26, %v2474_v35  ;;  %v2258_v29 = vpop.f32.mrf.mxu1  ;;  %v1295_v42 = vmax.f32 %v1231_v27, 0.0 }
  0xf7   : > { %2162 = vst [vmem:[%s2488_s27 + $0xb0] sm:$0xff] %v2094_v24   ;;  %v1266_v31 = vadd.f32 %v2258_v29, %v2474_v35  ;;  %v825_v32 = vpop.f32.mrf.mxu0  ;;  %v1327_v46 = vmax.f32 %v1263_v30, 0.0 }
  0xf8   : > { %v1298_v34 = vmax.f32 %v1234_v28, 0.0  ;;  %v1232_v36 = vadd.f32 %v2474_v35, %v825_v32  ;;  %v953_v37 = vpop.f32.mrf.mxu1 }
  0xf9   : > { %v1330_v39 = vmax.f32 %v1266_v31, 0.0  ;;  %v1264_v40 = vadd.f32 %v2474_v35, %v953_v37  ;;  %v2229_v41 = vpop.f32.mrf.mxu0 }
  0xfa   : > { %v2029_v43 = vpack.c.bf16 %v1298_v34, %v1297_v33  ;;  %v1296_v44 = vmax.f32 %v1232_v36, 0.0  ;;  %v2261_v45 = vpop.f32.mrf.mxu1  ;;  %v1237_v51 = vadd.f32 %v2229_v41, %v2474_v35 }
  0xfb   : > { %v2109_v47 = vpack.c.bf16 %v1330_v39, %v1329_v38  ;;  %v1328_v48 = vmax.f32 %v1264_v40, 0.0  ;;  %v838_v49 = vpop.f32.mrf.mxu0  ;;  %v1269_v54 = vadd.f32 %v2261_v45, %v2474_v35 }
  0xfc   : > { %2149 = vst [vmem:[%s2488_s27 + $0x48] sm:$0xff] %v2029_v43   ;;  %v2024_v50 = vpack.c.bf16 %v1296_v44, %v1295_v42  ;;  %v966_v52 = vpop.f32.mrf.mxu1  ;;  %v1235_v56 = vadd.f32 %v2474_v35, %v838_v49  ;;  %v1301_v62 = vmax.f32 %v1237_v51, 0.0 }
  0xfd   : > { %2165 = vst [vmem:[%s2488_s27 + $0xc8] sm:$0xff] %v2109_v47   ;;  %v2104_v53 = vpack.c.bf16 %v1328_v48, %v1327_v46  ;;  %v2230_v55 = vpop.f32.mrf.mxu0  ;;  %v1267_v59 = vadd.f32 %v2474_v35, %v966_v52  ;;  %v1333_v2 = vmax.f32 %v1269_v54, 0.0 }
  0xfe   : > { %2148 = vst [vmem:[%s2488_s27 + $0x40] sm:$0xff] %v2024_v50   ;;  %v1238_v57 = vadd.f32 %v2230_v55, %v2474_v35  ;;  %v2262_v58 = vpop.f32.mrf.mxu1  ;;  %v1299_v6 = vmax.f32 %v1235_v56, 0.0 }
  0xff   : > { %2164 = vst [vmem:[%s2488_s27 + $0xc0] sm:$0xff] %v2104_v53   ;;  %v1270_v60 = vadd.f32 %v2262_v58, %v2474_v35  ;;  %v841_v61 = vpop.f32.mrf.mxu0  ;;  %v1331_v10 = vmax.f32 %v1267_v59, 0.0 }
 0x100   : > { %v1302_v63 = vmax.f32 %v1238_v57, 0.0  ;;  %v1236_v0 = vadd.f32 %v2474_v35, %v841_v61  ;;  %v969_v1 = vpop.f32.mrf.mxu1 }
 0x101   : > { %v1334_v3 = vmax.f32 %v1270_v60, 0.0  ;;  %v1268_v4 = vadd.f32 %v2474_v35, %v969_v1  ;;  %v2233_v5 = vpop.f32.mrf.mxu0 }
 0x102   : > { %v2039_v7 = vpack.c.bf16 %v1302_v63, %v1301_v62  ;;  %v1300_v8 = vmax.f32 %v1236_v0, 0.0  ;;  %v2265_v9 = vpop.f32.mrf.mxu1  ;;  %v1241_v15 = vadd.f32 %v2233_v5, %v2474_v35 }
 0x103   : > { %v2119_v11 = vpack.c.bf16 %v1334_v3, %v1333_v2  ;;  %v1332_v12 = vmax.f32 %v1268_v4, 0.0  ;;  %v854_v13 = vpop.f32.mrf.mxu0  ;;  %v1273_v18 = vadd.f32 %v2265_v9, %v2474_v35 }
 0x104   : > { %2151 = vst [vmem:[%s2488_s27 + $0x58] sm:$0xff] %v2039_v7   ;;  %v2034_v14 = vpack.c.bf16 %v1300_v8, %v1299_v6  ;;  %v982_v16 = vpop.f32.mrf.mxu1  ;;  %v1239_v20 = vadd.f32 %v2474_v35, %v854_v13  ;;  %v1305_v26 = vmax.f32 %v1241_v15, 0.0 }
 0x105   : > { %2167 = vst [vmem:[%s2488_s27 + $0xd8] sm:$0xff] %v2119_v11   ;;  %v2114_v17 = vpack.c.bf16 %v1332_v12, %v1331_v10  ;;  %v2234_v19 = vpop.f32.mrf.mxu0  ;;  %v1271_v23 = vadd.f32 %v2474_v35, %v982_v16  ;;  %v1337_v30 = vmax.f32 %v1273_v18, 0.0 }
 0x106   : > { %2150 = vst [vmem:[%s2488_s27 + $0x50] sm:$0xff] %v2034_v14   ;;  %v1242_v21 = vadd.f32 %v2234_v19, %v2474_v35  ;;  %v2266_v22 = vpop.f32.mrf.mxu1  ;;  %v1303_v34 = vmax.f32 %v1239_v20, 0.0 }
 0x107   : > { %2166 = vst [vmem:[%s2488_s27 + $0xd0] sm:$0xff] %v2114_v17   ;;  %v1274_v24 = vadd.f32 %v2266_v22, %v2474_v35  ;;  %v857_v25 = vpop.f32.mrf.mxu0  ;;  %v1335_v39 = vmax.f32 %v1271_v23, 0.0 }
 0x108   : > { %v1306_v27 = vmax.f32 %v1242_v21, 0.0  ;;  %v1240_v28 = vadd.f32 %v2474_v35, %v857_v25  ;;  %v985_v29 = vpop.f32.mrf.mxu1 }
 0x109   : > { %v1338_v31 = vmax.f32 %v1274_v24, 0.0  ;;  %v1272_v32 = vadd.f32 %v2474_v35, %v985_v29  ;;  %v2237_v33 = vpop.f32.mrf.mxu0 }
 0x10a   : > { %v2049_v36 = vpack.c.bf16 %v1306_v27, %v1305_v26  ;;  %v1304_v37 = vmax.f32 %v1240_v28, 0.0  ;;  %v2269_v38 = vpop.f32.mrf.mxu1  ;;  %v1245_v44 = vadd.f32 %v2237_v33, %v2474_v35 }
 0x10b   : > { %v2129_v40 = vpack.c.bf16 %v1338_v31, %v1337_v30  ;;  %v1336_v41 = vmax.f32 %v1272_v32, 0.0  ;;  %v870_v42 = vpop.f32.mrf.mxu0  ;;  %v1277_v47 = vadd.f32 %v2269_v38, %v2474_v35 }
 0x10c   : > { %2153 = vst [vmem:[%s2488_s27 + $0x68] sm:$0xff] %v2049_v36   ;;  %v2044_v43 = vpack.c.bf16 %v1304_v37, %v1303_v34  ;;  %v998_v45 = vpop.f32.mrf.mxu1  ;;  %v1243_v49 = vadd.f32 %v2474_v35, %v870_v42  ;;  %v1309_v55 = vmax.f32 %v1245_v44, 0.0 }
 0x10d   : > { %2169 = vst [vmem:[%s2488_s27 + $0xe8] sm:$0xff] %v2129_v40   ;;  %v2124_v46 = vpack.c.bf16 %v1336_v41, %v1335_v39  ;;  %v2238_v48 = vpop.f32.mrf.mxu0  ;;  %v1275_v52 = vadd.f32 %v2474_v35, %v998_v45  ;;  %v1341_v59 = vmax.f32 %v1277_v47, 0.0 }
 0x10e   : > { %2152 = vst [vmem:[%s2488_s27 + $0x60] sm:$0xff] %v2044_v43   ;;  %v1246_v50 = vadd.f32 %v2238_v48, %v2474_v35  ;;  %v2270_v51 = vpop.f32.mrf.mxu1  ;;  %v1307_v62 = vmax.f32 %v1243_v49, 0.0 }
 0x10f   : > { %2168 = vst [vmem:[%s2488_s27 + $0xe0] sm:$0xff] %v2124_v46   ;;  %v1278_v53 = vadd.f32 %v2270_v51, %v2474_v35  ;;  %v873_v54 = vpop.f32.mrf.mxu0  ;;  %v1339_v1 = vmax.f32 %v1275_v52, 0.0 }
 0x110   : > { %v1310_v56 = vmax.f32 %v1246_v50, 0.0  ;;  %v1244_v57 = vadd.f32 %v2474_v35, %v873_v54  ;;  %v1001_v58 = vpop.f32.mrf.mxu1 }
 0x111   : > { %v1342_v60 = vmax.f32 %v1278_v53, 0.0  ;;  %v1276_v61 = vadd.f32 %v2474_v35, %v1001_v58 }
 0x112   : > { %v2059_v63 = vpack.c.bf16 %v1310_v56, %v1309_v55  ;;  %v1308_v0 = vmax.f32 %v1244_v57, 0.0 }
 0x113   : > { %v2139_v2 = vpack.c.bf16 %v1342_v60, %v1341_v59  ;;  %v1340_v3 = vmax.f32 %v1276_v61, 0.0 }
 0x114   : > { %2155 = vst [vmem:[%s2488_s27 + $0x78] sm:$0xff] %v2059_v63   ;;  %v2054_v4 = vpack.c.bf16 %v1308_v0, %v1307_v62 }
 0x115   : > { %2171 = vst [vmem:[%s2488_s27 + $0xf8] sm:$0xff] %v2139_v2   ;;  %v2134_v5 = vpack.c.bf16 %v1340_v3, %v1339_v1 }
 0x116   : > { %2154 = vst [vmem:[%s2488_s27 + $0x70] sm:$0xff] %v2054_v4  }
 0x117   : > { %2170 = vst [vmem:[%s2488_s27 + $0xf0] sm:$0xff] %v2134_v5  }
 0x118 PF: > { %s13_s14 = sadd.s32 1, %s2354_s14   ;;  %s2592_s12 = smov %s2350_s13 }
 0x119   : > { %p10_p5 = scmp.ge.s32.totalorder %s13_s14, 4   ;;  %s2593_s13 = smov %s2595_s15 }
 0x11b   :  { %12 = sbr.rel (!%p10_p5) target bundleno = 2 (0x2), region = 76 }

// kernel: wav2vec_lstm_forward.11
= control target key start
LH: loop header
LB: loop body
LE: loop exit
PB: predicated region body
PF: predicated region fallthrough
CT: control target
= control target key end

     0   :  { %s865_s1 = inlined_call_operand.vmem [shape: bf16[128,128], index: 1, kind: input, shape index: {}]   ;;  %s866_s0 = inlined_call_operand.vmem [shape: bf16[160,128], index: 0, kind: input, shape index: {}]   ;;  %s867_s2 = inlined_call_operand.vmem [shape: f32[1,128], index: 2, kind: input, shape index: {}]   ;;  %s868_s3 = inlined_call_operand.vmem [shape: bf16[160,128], index: 3, kind: output, shape index: {}]  }
   0x1   :  { %v718_v0 = vld [vmem:[%s865_s1 + $0x38] sm:$0xff]   ;;  %v719_v1 = vld [vmem:[%s865_s1 + $0x30] sm:$0xff]   ;;  %v720_v2 = vld [vmem:[%s865_s1 + $0x28] sm:$0xff]  }
   0x2   :  { %666 = vmatprep.subr.bf16.mxu0 %v718_v0  ;;  %702 = vmatprep.subr.bf16.mxu1 %v718_v0  ;;  %v721_v3 = vld [vmem:[%s865_s1 + $0x20] sm:$0xff]   ;;  %v728_v5 = vld [vmem:[%s866_s0 + $0x30] sm:$0xff]   ;;  %v722_v6 = vld [vmem:[%s865_s1 + $0x18] sm:$0xff]  }
   0x3   :  { %667 = vmatpush3.bf16.msra.mxu0 %v718_v0  ;;  %710 = vmatpush3.bf16.msra.mxu1 %v718_v0  ;;  %v726_v4 = vld [vmem:[%s866_s0] sm:$0xff]   ;;  %v723_v7 = vld [vmem:[%s865_s1 + $0x10] sm:$0xff]   ;;  %v724_v8 = vld [vmem:[%s865_s1 + $0x8] sm:$0xff]  }
   0x4   :  { %668 = vmatprep.subr.bf16.mxu0 %v719_v1  ;;  %703 = vmatprep.subr.bf16.mxu1 %v719_v1  ;;  %v725_v9 = vld [vmem:[%s865_s1] sm:$0xff]   ;;  %v727_v10 = vld [vmem:[%s866_s0 + $0x8] sm:$0xff]   ;;  %v729_v11 = vld [vmem:[%s866_s0 + $0x38] sm:$0xff]  }
   0x5   :  { %682 = vmatprep.mubr.bf16.mxu0 %v726_v4  ;;  %694 = vmatprep.mubr.bf16.mxu1 %v728_v5  ;;  %v730_v12 = vld [vmem:[%s866_s0 + $0x10] sm:$0xff]   ;;  %v732_v13 = vld [vmem:[%s866_s0 + $0x40] sm:$0xff]   ;;  %v731_v14 = vld [vmem:[%s866_s0 + $0x18] sm:$0xff]  }
   0x6   :  { %v733_v15 = vld [vmem:[%s866_s0 + $0x48] sm:$0xff]   ;;  %v734_v16 = vld [vmem:[%s866_s0 + $0x20] sm:$0xff]  }
   0x7   :  { %669 = vmatpush3.bf16.msra.mxu0 %v719_v1  ;;  %711 = vmatpush3.bf16.msra.mxu1 %v719_v1  ;;  %v735_v17 = vld [vmem:[%s866_s0 + $0x28] sm:$0xff]   ;;  %v813_v18 = vld [vmem:[%s867_s2] ss:$0 sm:$0xff] }
   0x8   :  { %670 = vmatprep.subr.bf16.mxu0 %v720_v2  ;;  %704 = vmatprep.subr.bf16.mxu1 %v720_v2 }
   0xb   :  { %671 = vmatpush3.bf16.msra.mxu0 %v720_v2  ;;  %712 = vmatpush3.bf16.msra.mxu1 %v720_v2 }
   0xc   :  { %672 = vmatprep.subr.bf16.mxu0 %v721_v3  ;;  %705 = vmatprep.subr.bf16.mxu1 %v721_v3 }
   0xf   :  { %673 = vmatpush3.bf16.msra.mxu0 %v721_v3  ;;  %713 = vmatpush3.bf16.msra.mxu1 %v721_v3 }
  0x10   :  { %674 = vmatprep.subr.bf16.mxu0 %v722_v6  ;;  %706 = vmatprep.subr.bf16.mxu1 %v722_v6 }
  0x13   :  { %675 = vmatpush3.bf16.msra.mxu0 %v722_v6  ;;  %714 = vmatpush3.bf16.msra.mxu1 %v722_v6 }
  0x14   :  { %676 = vmatprep.subr.bf16.mxu0 %v723_v7  ;;  %707 = vmatprep.subr.bf16.mxu1 %v723_v7 }
  0x17   :  { %677 = vmatpush3.bf16.msra.mxu0 %v723_v7  ;;  %715 = vmatpush3.bf16.msra.mxu1 %v723_v7 }
  0x18   :  { %678 = vmatprep.subr.bf16.mxu0 %v724_v8  ;;  %708 = vmatprep.subr.bf16.mxu1 %v724_v8 }
  0x1b   :  { %679 = vmatpush3.bf16.msra.mxu0 %v724_v8  ;;  %716 = vmatpush3.bf16.msra.mxu1 %v724_v8 }
  0x1c   :  { %680 = vmatprep.subr.bf16.mxu0 %v725_v9  ;;  %709 = vmatprep.subr.bf16.mxu1 %v725_v9 }
  0x1f   :  { %681 = vmatpush3.bf16.msra.mxu0 %v725_v9  ;;  %717 = vmatpush3.bf16.msra.mxu1 %v725_v9 }
  0x22   :  { %683 = vmatmul.mubr.bf16.vlgmr.msra.gmra.mxu0 %v727_v10  ;;  %695 = vmatmul.mubr.bf16.vlgmr.msra.gmra.mxu1 %v729_v11 }
  0x23   :  { %686 = vmatprep.mubr.bf16.mxu0 %v730_v12  ;;  %698 = vmatprep.mubr.bf16.mxu1 %v732_v13 }
  0x2a   :  { %687 = vmatmul.mubr.bf16.gmra.mxu0 %v731_v14  ;;  %699 = vmatmul.mubr.bf16.gmra.mxu1 %v733_v15 }
  0x2b   :  { %690 = vmatprep.mubr.bf16.mxu0 %v734_v16 }
  0x32   :  { %691 = vmatmul.mubr.bf16.gmra.mxu0 %v735_v17 }
  0xe2   :  { %v684_v19 = vpop.f32.mrf.mxu0  ;;  %v696_v20 = vpop.f32.mrf.mxu1 }
  0xe3   :  { %v400_v21 = vadd.f32 %v696_v20, %v813_v18  ;;  %v388_v22 = vadd.f32 %v684_v19, %v813_v18 }
  0xe4   :  { %v237_v23 = vpop.f32.mrf.mxu0  ;;  %v285_v24 = vpop.f32.mrf.mxu1 }
  0xe5   :  { %v398_v26 = vadd.f32 %v813_v18, %v285_v24  ;;  %v386_v28 = vadd.f32 %v813_v18, %v237_v23  ;;  %v420_v29 = vmax.f32 %v400_v21, 0.0  ;;  %v408_v32 = vmax.f32 %v388_v22, 0.0 }
  0xe6   :  { %v685_v25 = vpop.f32.mrf.mxu0  ;;  %v697_v27 = vpop.f32.mrf.mxu1 }
  0xe7   :  { %v389_v30 = vadd.f32 %v685_v25, %v813_v18  ;;  %v401_v31 = vadd.f32 %v697_v27, %v813_v18  ;;  %v418_v39 = vmax.f32 %v398_v26, 0.0  ;;  %v406_v42 = vmax.f32 %v386_v28, 0.0 }
  0xe8   :  { %v240_v33 = vpop.f32.mrf.mxu0  ;;  %v288_v34 = vpop.f32.mrf.mxu1 }
  0xe9   :  { %v409_v35 = vmax.f32 %v389_v30, 0.0  ;;  %v387_v36 = vadd.f32 %v813_v18, %v240_v33  ;;  %v421_v37 = vmax.f32 %v401_v31, 0.0  ;;  %v399_v38 = vadd.f32 %v813_v18, %v288_v34 }
  0xea   :  { %v688_v40 = vpop.f32.mrf.mxu0  ;;  %v700_v41 = vpop.f32.mrf.mxu1 }
  0xeb   :  { %v597_v43 = vpack.c.bf16 %v409_v35, %v408_v32  ;;  %v407_v44 = vmax.f32 %v387_v36, 0.0  ;;  %v627_v45 = vpack.c.bf16 %v421_v37, %v420_v29  ;;  %v392_v46 = vadd.f32 %v688_v40, %v813_v18 }
  0xec   :  { %v419_v47 = vmax.f32 %v399_v38, 0.0  ;;  %v253_v48 = vpop.f32.mrf.mxu0  ;;  %v404_v49 = vadd.f32 %v700_v41, %v813_v18  ;;  %v301_v50 = vpop.f32.mrf.mxu1 }
  0xed   :  { %639 = vst [vmem:[%s868_s3 + $0x8] sm:$0xff] %v597_v43   ;;  %v592_v51 = vpack.c.bf16 %v407_v44, %v406_v42  ;;  %645 = vst [vmem:[%s868_s3 + $0x38] sm:$0xff] %v627_v45   ;;  %v402_v54 = vadd.f32 %v813_v18, %v301_v50  ;;  %v390_v56 = vadd.f32 %v813_v18, %v253_v48  ;;  %v412_v60 = vmax.f32 %v392_v46, 0.0 }
  0xee   :  { %v622_v52 = vpack.c.bf16 %v419_v47, %v418_v39  ;;  %v689_v53 = vpop.f32.mrf.mxu0  ;;  %v701_v55 = vpop.f32.mrf.mxu1  ;;  %v424_v57 = vmax.f32 %v404_v49, 0.0 }
  0xef   :  { %593 = vst [vmem:[%s868_s3] sm:$0xff] %v592_v51   ;;  %v393_v58 = vadd.f32 %v689_v53, %v813_v18  ;;  %v405_v59 = vadd.f32 %v701_v55, %v813_v18  ;;  %v422_v3 = vmax.f32 %v402_v54, 0.0  ;;  %v410_v5 = vmax.f32 %v390_v56, 0.0 }
  0xf0   :  { %644 = vst [vmem:[%s868_s3 + $0x30] sm:$0xff] %v622_v52   ;;  %v256_v61 = vpop.f32.mrf.mxu0  ;;  %v304_v62 = vpop.f32.mrf.mxu1 }
  0xf1   :  { %v413_v63 = vmax.f32 %v393_v58, 0.0  ;;  %v391_v0 = vadd.f32 %v813_v18, %v256_v61  ;;  %v425_v1 = vmax.f32 %v405_v59, 0.0  ;;  %v403_v2 = vadd.f32 %v813_v18, %v304_v62 }
  0xf2   :  { %v692_v4 = vpop.f32.mrf.mxu0 }
  0xf3   :  { %v607_v6 = vpack.c.bf16 %v413_v63, %v412_v60  ;;  %v411_v7 = vmax.f32 %v391_v0, 0.0  ;;  %v637_v8 = vpack.c.bf16 %v425_v1, %v424_v57  ;;  %v423_v9 = vmax.f32 %v403_v2, 0.0 }
  0xf4   :  { %v269_v10 = vpop.f32.mrf.mxu0  ;;  %v396_v12 = vadd.f32 %v692_v4, %v813_v18 }
  0xf5   :  { %641 = vst [vmem:[%s868_s3 + $0x18] sm:$0xff] %v607_v6   ;;  %v602_v11 = vpack.c.bf16 %v411_v7, %v410_v5  ;;  %647 = vst [vmem:[%s868_s3 + $0x48] sm:$0xff] %v637_v8   ;;  %v632_v13 = vpack.c.bf16 %v423_v9, %v422_v3  ;;  %v394_v15 = vadd.f32 %v813_v18, %v269_v10 }
  0xf6   :  { %v693_v14 = vpop.f32.mrf.mxu0  ;;  %v416_v19 = vmax.f32 %v396_v12, 0.0 }
  0xf7   :  { %640 = vst [vmem:[%s868_s3 + $0x10] sm:$0xff] %v602_v11   ;;  %v397_v16 = vadd.f32 %v693_v14, %v813_v18  ;;  %646 = vst [vmem:[%s868_s3 + $0x40] sm:$0xff] %v632_v13   ;;  %v414_v22 = vmax.f32 %v394_v15, 0.0 }
  0xf8   :  { %v272_v17 = vpop.f32.mrf.mxu0 }
  0xf9   :  { %v417_v20 = vmax.f32 %v397_v16, 0.0  ;;  %v395_v21 = vadd.f32 %v813_v18, %v272_v17 }
  0xfb   :  { %v617_v23 = vpack.c.bf16 %v417_v20, %v416_v19  ;;  %v415_v24 = vmax.f32 %v395_v21, 0.0 }
  0xfd   :  { %643 = vst [vmem:[%s868_s3 + $0x28] sm:$0xff] %v617_v23   ;;  %v612_v25 = vpack.c.bf16 %v415_v24, %v414_v22 }
  0xff   :  { %642 = vst [vmem:[%s868_s3 + $0x20] sm:$0xff] %v612_v25  }

// kernel: wav2vec_lstm_forward.12
= control target key start
LH: loop header
LB: loop body
LE: loop exit
PB: predicated region body
PF: predicated region fallthrough
CT: control target
= control target key end

     0   :  { %v429_v0 = vmov 0.0   ;;  %vm430_vm0 = vmmov 0   ;;  %vm106_vm1 = vcmask 523264   ;;  %s501_s1 = inlined_call_operand.vmem [shape: bf16[64,128], index: 1, kind: input, shape index: {}]   ;;  %s502_s0 = inlined_call_operand.vmem [shape: bf16[80,64], index: 0, kind: input, shape index: {}]   ;;  %s503_s2 = inlined_call_operand.vmem [shape: f32[1,128], index: 2, kind: input, shape index: {}]   ;;  %s504_s3 = inlined_call_operand.vmem [shape: bf16[80,128], index: 3, kind: output, shape index: {}]  }
   0x1   :  { %382 = vmatprep.subr.bf16.mxu0 %v429_v0  ;;  %v420_v1 = vld [vmem:[%s501_s1 + $0x18] sm:$0xff]   ;;  %410 = vmatprep.subr.bf16.mxu1 %v429_v0  ;;  %v421_v2 = vld [vmem:[%s501_s1 + $0x10] sm:$0xff]   ;;  %v422_v3 = vld [vmem:[%s501_s1 + $0x8] sm:$0xff]  }
   0x2   :  { %390 = vmatprep.mubr.msk.bf16.mxu0 %vm430_vm0, %v429_v0  ;;  %402 = vmatprep.mubr.msk.bf16.mxu1 %vm430_vm0, %v429_v0  ;;  %v423_v4 = vld [vmem:[%s501_s1] sm:$0xff]   ;;  %v425_v6 = vld [vmem:[%s502_s0 + $0x18] sm:$0xff]   ;;  %v426_v7 = vld [vmem:[%s502_s0 + $0x8] sm:$0xff]  }
   0x3   :  { %383 = vmatpush3.bf16.msra.mxu0 %v420_v1  ;;  %414 = vmatpush3.bf16.msra.mxu1 %v420_v1  ;;  %v424_v5 = vld [vmem:[%s502_s0] sm:$0xff]   ;;  %v428_v9 = vld [vmem:[%s502_s0 + $0x10] sm:$0xff]  }
   0x4   :  { %384 = vmatprep.subr.bf16.mxu0 %v429_v0  ;;  %411 = vmatprep.subr.bf16.mxu1 %v429_v0  ;;  %v427_v8 = vld [vmem:[%s502_s0 + $0x20] sm:$0xff]  }
   0x5   :  { %v323_v11 = vld [vmem:[%s503_s2] ss:$0 sm:$0xff] }
   0x7   :  { %385 = vmatpush3.bf16.msra.mxu0 %v421_v2  ;;  %415 = vmatpush3.bf16.msra.mxu1 %v421_v2 }
   0x8   :  { %386 = vmatprep.subr.bf16.mxu0 %v429_v0  ;;  %412 = vmatprep.subr.bf16.mxu1 %v429_v0 }
   0xb   :  { %387 = vmatpush3.bf16.msra.mxu0 %v422_v3  ;;  %416 = vmatpush3.bf16.msra.mxu1 %v422_v3 }
   0xc   :  { %388 = vmatprep.subr.bf16.mxu0 %v429_v0  ;;  %413 = vmatprep.subr.bf16.mxu1 %v429_v0 }
   0xf   :  { %389 = vmatpush3.bf16.msra.mxu0 %v423_v4  ;;  %417 = vmatpush3.bf16.msra.mxu1 %v423_v4 }
  0x12   :  { %391 = vmatmul.mubr.msk.bf16.vlgmr.msra.gmra.mxu0 %vm106_vm1, %v424_v5  ;;  %403 = vmatmul.mubr.msk.bf16.vlgmr.msra.gmra.mxu1 %vm106_vm1, %v425_v6 }
  0x13   :  { %394 = vmatprep.mubr.msk.bf16.mxu0 %vm430_vm0, %v429_v0  ;;  %406 = vmatprep.mubr.msk.bf16.mxu1 %vm430_vm0, %v429_v0 }
  0x1a   :  { %395 = vmatmul.mubr.msk.bf16.gmra.mxu0 %vm106_vm1, %v426_v7  ;;  %407 = vmatmul.mubr.msk.bf16.gmra.mxu1 %vm106_vm1, %v427_v8 }
  0x1b   :  { %398 = vmatprep.mubr.msk.bf16.mxu0 %vm430_vm0, %v429_v0 }
  0x22   :  { %399 = vmatmul.mubr.msk.bf16.gmra.mxu0 %vm106_vm1, %v428_v9 }
  0xd2   :  { %v156_v10 = vpop.f32.mrf.mxu0  ;;  %v180_v12 = vpop.f32.mrf.mxu1 }
  0xd3   :  { %v241_v13 = vadd.f32 %v323_v11, %v180_v12  ;;  %v235_v16 = vadd.f32 %v323_v11, %v156_v10 }
  0xd4   :  { %v392_v14 = vpop.f32.mrf.mxu0  ;;  %v404_v15 = vpop.f32.mrf.mxu1 }
  0xd5   :  { %v251_v19 = vmax.f32 %v241_v13, 0.0  ;;  %v245_v24 = vmax.f32 %v235_v16, 0.0 }
  0xd6   :  { %v159_v17 = vpop.f32.mrf.mxu0  ;;  %v183_v18 = vpop.f32.mrf.mxu1 }
  0xd7   :  { %v236_v20 = vadd.f32 %v323_v11, %v159_v17  ;;  %v242_v21 = vadd.f32 %v323_v11, %v183_v18 }
  0xd8   :  { %v393_v22 = vpop.f32.mrf.mxu0  ;;  %v405_v23 = vpop.f32.mrf.mxu1 }
  0xd9   :  { %v246_v25 = vmax.f32 %v236_v20, 0.0  ;;  %v252_v26 = vmax.f32 %v242_v21, 0.0 }
  0xda   :  { %v164_v27 = vpop.f32.mrf.mxu0  ;;  %v188_v28 = vpop.f32.mrf.mxu1 }
  0xdb   :  { %v347_v29 = vpack.c.bf16 %v246_v25, %v245_v24  ;;  %v362_v30 = vpack.c.bf16 %v252_v26, %v251_v19  ;;  %v243_v31 = vadd.f32 %v323_v11, %v188_v28  ;;  %v237_v34 = vadd.f32 %v323_v11, %v164_v27 }
  0xdc   :  { %v396_v32 = vpop.f32.mrf.mxu0  ;;  %v408_v33 = vpop.f32.mrf.mxu1 }
  0xdd   :  { %348 = vst [vmem:[%s504_s3] sm:$0xff] %v347_v29   ;;  %371 = vst [vmem:[%s504_s3 + $0x18] sm:$0xff] %v362_v30   ;;  %v253_v37 = vmax.f32 %v243_v31, 0.0  ;;  %v247_v42 = vmax.f32 %v237_v34, 0.0 }
  0xde   :  { %v167_v35 = vpop.f32.mrf.mxu0  ;;  %v191_v36 = vpop.f32.mrf.mxu1 }
  0xdf   :  { %v238_v38 = vadd.f32 %v323_v11, %v167_v35  ;;  %v244_v39 = vadd.f32 %v323_v11, %v191_v36 }
  0xe0   :  { %v397_v40 = vpop.f32.mrf.mxu0  ;;  %v409_v41 = vpop.f32.mrf.mxu1 }
  0xe1   :  { %v248_v43 = vmax.f32 %v238_v38, 0.0  ;;  %v254_v44 = vmax.f32 %v244_v39, 0.0 }
  0xe2   :  { %v172_v45 = vpop.f32.mrf.mxu0 }
  0xe3   :  { %v352_v46 = vpack.c.bf16 %v248_v43, %v247_v42  ;;  %v367_v47 = vpack.c.bf16 %v254_v44, %v253_v37  ;;  %v239_v49 = vadd.f32 %v323_v11, %v172_v45 }
  0xe4   :  { %v400_v48 = vpop.f32.mrf.mxu0 }
  0xe5   :  { %369 = vst [vmem:[%s504_s3 + $0x8] sm:$0xff] %v352_v46   ;;  %372 = vst [vmem:[%s504_s3 + $0x20] sm:$0xff] %v367_v47   ;;  %v249_v53 = vmax.f32 %v239_v49, 0.0 }
  0xe6   :  { %v175_v50 = vpop.f32.mrf.mxu0 }
  0xe7   :  { %v240_v51 = vadd.f32 %v323_v11, %v175_v50 }
  0xe8   :  { %v401_v52 = vpop.f32.mrf.mxu0 }
  0xe9   :  { %v250_v54 = vmax.f32 %v240_v51, 0.0 }
  0xeb   :  { %v357_v55 = vpack.c.bf16 %v250_v54, %v249_v53 }
  0xed   :  { %370 = vst [vmem:[%s504_s3 + $0x10] sm:$0xff] %v357_v55  }

// kernel: wav2vec_lstm_forward.13
= control target key start
LH: loop header
LB: loop body
LE: loop exit
PB: predicated region body
PF: predicated region fallthrough
CT: control target
= control target key end

     0   :  { %v286_v0 = vmov 0.0   ;;  %vm287_vm0 = vmmov 0   ;;  %vm79_vm1 = vcmask 523264   ;;  %s344_s1 = inlined_call_operand.vmem [shape: bf16[64,128], index: 1, kind: input, shape index: {}]   ;;  %s345_s0 = inlined_call_operand.vmem [shape: bf16[40,64], index: 0, kind: input, shape index: {}]   ;;  %s346_s2 = inlined_call_operand.vmem [shape: f32[1,128], index: 2, kind: input, shape index: {}]   ;;  %s347_s3 = inlined_call_operand.vmem [shape: bf16[40,128], index: 3, kind: output, shape index: {}]  }
   0x1   :  { %249 = vmatprep.subr.bf16.mxu0 %v286_v0  ;;  %269 = vmatprep.subr.bf16.mxu1 %v286_v0  ;;  %v279_v1 = vld [vmem:[%s344_s1 + $0x18] sm:$0xff]   ;;  %v280_v2 = vld [vmem:[%s344_s1 + $0x10] sm:$0xff]   ;;  %v281_v3 = vld [vmem:[%s344_s1 + $0x8] sm:$0xff]  }
   0x2   :  { %257 = vmatprep.mubr.msk.bf16.mxu0 %vm287_vm0, %v286_v0  ;;  %261 = vmatprep.mubr.msk.bf16.mxu1 %vm287_vm0, %v286_v0  ;;  %v282_v4 = vld [vmem:[%s344_s1] sm:$0xff]   ;;  %v284_v6 = vld [vmem:[%s345_s0 + $0x8] sm:$0xff]   ;;  %v285_v7 = vld [vmem:[%s345_s0 + $0x10] ss:$0 sps:$4 sm:$0xff]  }
   0x3   :  { %250 = vmatpush3.bf16.msra.mxu0 %v279_v1  ;;  %273 = vmatpush3.bf16.msra.mxu1 %v279_v1  ;;  %v283_v5 = vld [vmem:[%s345_s0] sm:$0xff]  }
   0x4   :  { %251 = vmatprep.subr.bf16.mxu0 %v286_v0  ;;  %270 = vmatprep.subr.bf16.mxu1 %v286_v0  ;;  %v220_v9 = vld [vmem:[%s346_s2] ss:$0 sm:$0xff] }
   0x7   :  { %252 = vmatpush3.bf16.msra.mxu0 %v280_v2  ;;  %274 = vmatpush3.bf16.msra.mxu1 %v280_v2 }
   0x8   :  { %253 = vmatprep.subr.bf16.mxu0 %v286_v0  ;;  %271 = vmatprep.subr.bf16.mxu1 %v286_v0 }
   0xb   :  { %254 = vmatpush3.bf16.msra.mxu0 %v281_v3  ;;  %275 = vmatpush3.bf16.msra.mxu1 %v281_v3 }
   0xc   :  { %255 = vmatprep.subr.bf16.mxu0 %v286_v0  ;;  %272 = vmatprep.subr.bf16.mxu1 %v286_v0 }
   0xf   :  { %256 = vmatpush3.bf16.msra.mxu0 %v282_v4  ;;  %276 = vmatpush3.bf16.msra.mxu1 %v282_v4 }
  0x12   :  { %258 = vmatmul.mubr.msk.bf16.vlgmr.msra.gmra.mxu0 %vm79_vm1, %v283_v5  ;;  %262 = vmatmul.mubr.msk.bf16.vlgmr.msra.gmra.mxu1 %vm79_vm1, %v284_v6 }
  0x13   :  { %265 = vmatprep.mubr.msk.bf16.mxu1 %vm287_vm0, %v286_v0 }
  0x1a   :  { %266 = vmatmul.mubr.msk.bf16.gmra.mxu1 %vm79_vm1, %v285_v7 }
  0xd2   :  { %v123_v8 = vpop.f32.mrf.mxu0  ;;  %v131_v10 = vpop.f32.mrf.mxu1 }
  0xd3   :  { %v170_v11 = vadd.f32 %v220_v9, %v123_v8  ;;  %v172_v14 = vadd.f32 %v220_v9, %v131_v10 }
  0xd4   :  { %v259_v12 = vpop.f32.mrf.mxu0  ;;  %v263_v13 = vpop.f32.mrf.mxu1 }
  0xd5   :  { %v175_v17 = vmax.f32 %v170_v11, 0.0  ;;  %v177_v22 = vmax.f32 %v172_v14, 0.0 }
  0xd6   :  { %v126_v15 = vpop.f32.mrf.mxu0  ;;  %v134_v16 = vpop.f32.mrf.mxu1 }
  0xd7   :  { %v171_v18 = vadd.f32 %v220_v9, %v126_v15  ;;  %v173_v19 = vadd.f32 %v220_v9, %v134_v16 }
  0xd8   :  { %v260_v20 = vpop.f32.mrf.mxu0  ;;  %v264_v21 = vpop.f32.mrf.mxu1 }
  0xd9   :  { %v176_v23 = vmax.f32 %v171_v18, 0.0  ;;  %v178_v24 = vmax.f32 %v173_v19, 0.0 }
  0xda   :  { %v139_v25 = vpop.f32.mrf.mxu1 }
  0xdb   :  { %v234_v26 = vpack.c.bf16 %v176_v23, %v175_v17  ;;  %v239_v27 = vpack.c.bf16 %v178_v24, %v177_v22  ;;  %v174_v28 = vadd.f32 %v220_v9, %v139_v25 }
  0xdc   :  { %v267_v29 = vpop.f32.mrf.mxu1 }
  0xdd   :  { %235 = vst [vmem:[%s347_s3] sm:$0xff] %v234_v26   ;;  %241 = vst [vmem:[%s347_s3 + $0x8] sm:$0xff] %v239_v27   ;;  %v179_v30 = vmax.f32 %v174_v28, 0.0 }
  0xde   :  { %v142_v31 = vpop.f32.mrf.mxu1 }
  0xdf   :  { %v230_v32 = vpack.c.bf16 %v179_v30, %v179_v30 }
  0xe0   :  { %v268_v33 = vpop.f32.mrf.mxu1 }
  0xe1   :  { %205 = vst [vmem:[%s347_s3 + $0x10] sm:$0xf] %v230_v32 }

// kernel: wav2vec_lstm_forward.15
= control target key start
LH: loop header
LB: loop body
LE: loop exit
PB: predicated region body
PF: predicated region fallthrough
CT: control target
= control target key end

     0   :  { %v142_v0 = vmov 0.0   ;;  %vm143_vm0 = vmmov 0   ;;  %vm38_vm1 = vcmask 130048   ;;  %s176_s1 = inlined_call_operand.vmem [shape: bf16[16,128], index: 1, kind: input, shape index: {}]   ;;  %s177_s0 = inlined_call_operand.vmem [shape: bf16[16,16], index: 0, kind: input, shape index: {}]   ;;  %s178_s2 = inlined_call_operand.vmem [shape: f32[1,128], index: 2, kind: input, shape index: {}]   ;;  %s179_s3 = inlined_call_operand.vmem [shape: bf16[16,128], index: 3, kind: output, shape index: {}]  }
   0x1   :  { %132 = vmatprep.subr.bf16.mxu0 %v142_v0  ;;  %v140_v1 = vld [vmem:[%s176_s1] sm:$0xff]   ;;  %134 = vmatprep.mubr.msk.bf16.mxu0 %vm143_vm0, %v142_v0 }
   0x2   :  { %v141_v2 = vld [vmem:[%s177_s0] sm:$0xff]   ;;  %133 = vmatpush3.bf16.msra.mxu0 %v140_v1 }
   0x3   :  { %v120_v4 = vld [vmem:[%s178_s2] ss:$0 sm:$0xff] }
   0x5   :  { %135 = vmatmul.mubr.msk.bf16.vlgmr.msra.gmra.mxu0 %vm38_vm1, %v141_v2 }
  0xc5   :  { %v76_v3 = vpop.f32.mrf.mxu0 }
  0xc6   :  { %v99_v6 = vadd.f32 %v120_v4, %v76_v3 }
  0xc7   :  { %v136_v5 = vpop.f32.mrf.mxu0 }
  0xc8   :  { %v101_v10 = vmax.f32 %v99_v6, 0.0 }
  0xc9   :  { %v79_v7 = vpop.f32.mrf.mxu0 }
  0xca   :  { %v100_v8 = vadd.f32 %v120_v4, %v79_v7 }
  0xcb   :  { %v137_v9 = vpop.f32.mrf.mxu0 }
  0xcc   :  { %v102_v11 = vmax.f32 %v100_v8, 0.0 }
  0xce   :  { %v128_v12 = vpack.c.bf16 %v102_v11, %v101_v10 }
  0xd0   :  { %129 = vst [vmem:[%s179_s3] sm:$0xff] %v128_v12  }

// kernel: wav2vec_lstm_forward.14
= control target key start
LH: loop header
LB: loop body
LE: loop exit
PB: predicated region body
PF: predicated region fallthrough
CT: control target
= control target key end

     0   :  { %v181_v0 = vmov 0.0   ;;  %vm182_vm0 = vmmov 0   ;;  %vm62_vm1 = vcmask 523264   ;;  %s224_s1 = inlined_call_operand.vmem [shape: bf16[64,128], index: 1, kind: input, shape index: {}]   ;;  %s225_s0 = inlined_call_operand.vmem [shape: bf16[16,64], index: 0, kind: input, shape index: {}]   ;;  %s226_s2 = inlined_call_operand.vmem [shape: f32[1,128], index: 2, kind: input, shape index: {}]   ;;  %s227_s3 = inlined_call_operand.vmem [shape: bf16[16,128], index: 3, kind: output, shape index: {}]  }
   0x1   :  { %162 = vmatprep.subr.bf16.mxu0 %v181_v0  ;;  %v176_v1 = vld [vmem:[%s224_s1 + $0x18] sm:$0xff]   ;;  %170 = vmatprep.mubr.msk.bf16.mxu0 %vm182_vm0, %v181_v0  ;;  %v177_v2 = vld [vmem:[%s224_s1 + $0x10] sm:$0xff]   ;;  %v178_v3 = vld [vmem:[%s224_s1 + $0x8] sm:$0xff]  }
   0x2   :  { %163 = vmatpush3.bf16.msra.mxu0 %v176_v1  ;;  %v179_v4 = vld [vmem:[%s224_s1] sm:$0xff]  }
   0x3   :  { %164 = vmatprep.subr.bf16.mxu0 %v181_v0  ;;  %v180_v5 = vld [vmem:[%s225_s0] sm:$0xff]  }
   0x4   :  { %v147_v7 = vld [vmem:[%s226_s2] ss:$0 sm:$0xff] }
   0x6   :  { %165 = vmatpush3.bf16.msra.mxu0 %v177_v2 }
   0x7   :  { %166 = vmatprep.subr.bf16.mxu0 %v181_v0 }
   0xa   :  { %167 = vmatpush3.bf16.msra.mxu0 %v178_v3 }
   0xb   :  { %168 = vmatprep.subr.bf16.mxu0 %v181_v0 }
   0xe   :  { %169 = vmatpush3.bf16.msra.mxu0 %v179_v4 }
  0x11   :  { %171 = vmatmul.mubr.msk.bf16.vlgmr.msra.gmra.mxu0 %vm62_vm1, %v180_v5 }
  0xd1   :  { %v100_v6 = vpop.f32.mrf.mxu0 }
  0xd2   :  { %v123_v9 = vadd.f32 %v147_v7, %v100_v6 }
  0xd3   :  { %v172_v8 = vpop.f32.mrf.mxu0 }
  0xd4   :  { %v125_v13 = vmax.f32 %v123_v9, 0.0 }
  0xd5   :  { %v103_v10 = vpop.f32.mrf.mxu0 }
  0xd6   :  { %v124_v11 = vadd.f32 %v147_v7, %v103_v10 }
  0xd7   :  { %v173_v12 = vpop.f32.mrf.mxu0 }
  0xd8   :  { %v126_v14 = vmax.f32 %v124_v11, 0.0 }
  0xda   :  { %v155_v15 = vpack.c.bf16 %v126_v14, %v125_v13 }
  0xdc   :  { %156 = vst [vmem:[%s227_s3] sm:$0xff] %v155_v15  }

// kernel: wav2vec_lstm_forward.17
= control target key start
LH: loop header
LB: loop body
LE: loop exit
PB: predicated region body
PF: predicated region fallthrough
CT: control target
= control target key end

     0   :  { %v140_v0 = vmov 0.0   ;;  %vm141_vm0 = vmmov 0   ;;  %vm38_vm1 = vcmask 130048   ;;  %s174_s1 = inlined_call_operand.vmem [shape: bf16[16,128], index: 1, kind: input, shape index: {}]   ;;  %s175_s0 = inlined_call_operand.vmem [shape: bf16[16,16], index: 0, kind: input, shape index: {}]   ;;  %s176_s2 = inlined_call_operand.vmem [shape: f32[1,128], index: 2, kind: input, shape index: {}]   ;;  %s177_s3 = inlined_call_operand.vmem [shape: bf16[16,128], index: 3, kind: output, shape index: {}]  }
   0x1   :  { %130 = vmatprep.subr.bf16.mxu0 %v140_v0  ;;  %v138_v1 = vld [vmem:[%s174_s1] sm:$0xff]   ;;  %132 = vmatprep.mubr.msk.bf16.mxu0 %vm141_vm0, %v140_v0 }
   0x2   :  { %v139_v2 = vld [vmem:[%s175_s0] sm:$0xff]   ;;  %131 = vmatpush3.bf16.msra.mxu0 %v138_v1 }
   0x3   :  { %v118_v4 = vld [vmem:[%s176_s2] ss:$0 sm:$0xff] }
   0x5   :  { %133 = vmatmul.mubr.msk.bf16.vlgmr.msra.gmra.mxu0 %vm38_vm1, %v139_v2 }
  0xc5   :  { %v76_v3 = vpop.f32.mrf.mxu0 }
  0xc6   :  { %v99_v7 = vadd.f32 %v118_v4, %v76_v3 }
  0xc7   :  { %v134_v5 = vpop.f32.mrf.mxu0 }
  0xc9   :  { %v79_v6 = vpop.f32.mrf.mxu0 }
  0xca   :  { %v100_v8 = vadd.f32 %v118_v4, %v79_v6 }
  0xcb   :  { %v135_v9 = vpop.f32.mrf.mxu0 }
  0xcc   :  { %v126_v10 = vpack.c.bf16 %v100_v8, %v99_v7 }
  0xce   :  { %127 = vst [vmem:[%s177_s3] sm:$0xff] %v126_v10  }

// kernel: wav2vec_lstm_forward.19
= control target key start
LH: loop header
LB: loop body
LE: loop exit
PB: predicated region body
PF: predicated region fallthrough
CT: control target
= control target key end

     0   :  { %v471_v0 = vmov 0.0   ;;  %vm472_vm0 = vmmov 0   ;;  %vm66_vm1 = vcmask 261120   ;;  %vm28_vm2 = vcmask 0   ;;  %s593_s1 = inlined_call_operand.vmem [shape: bf16[32,32], index: 1, kind: input, shape index: {}]   ;;  %s594_s0 = inlined_call_operand.vmem [shape: bf16[2,8,32], index: 0, kind: input, shape index: {}]   ;;  %s595_s2 = inlined_call_operand.vmem [shape: f32[1,32], index: 2, kind: input, shape index: {}]   ;;  %s596_s3 = inlined_call_operand.vmem [shape: f32[1,32], index: 3, kind: input, shape index: {}]   ;;  %s597_s4 = inlined_call_operand.vmem [shape: f32[32,3], index: 4, kind: input, shape index: {}]   ;;  %s598_s5 = inlined_call_operand.vmem [shape: f32[1,3], index: 5, kind: input, shape index: {}]   ;;  %s599_s6 = inlined_call_operand.vmem [shape: f32[2,3], index: 6, kind: output, shape index: {}]  }
   0x1   :  { %421 = vmatprep.subr.bf16.mxu0 %v471_v0  ;;  %v447_v1 = vld [vmem:[%s593_s1 + $0x8] sm:$0xff]   ;;  %425 = vmatprep.mubr.msk.bf16.mxu0 %vm472_vm0, %v471_v0  ;;  %v448_v2 = vld [vmem:[%s593_s1] sm:$0xff]   ;;  %v473_v4 = vmov -inf   ;;  %31 = vst.msk [vmem:[#allocation3] sm:$0x1] %vm28_vm2, %v471_v0  ;;  %v474_v19 = vmov 0   ;;  %v162_v22 = vlaneseq }
   0x2   :  { %429 = vmatprep.subr.mxu1 %v471_v0  ;;  %437 = vmatprep.mubr.msk.f32.mxu1 %vm472_vm0, %v471_v0  ;;  %v524_v3 = vld [vmem:[%s594_s0] sm:$0xff]   ;;  %29 = vst.msk [vmem:[#allocation2] sm:$0x1] %vm28_vm2, %v473_v4  ;;  %30 = vst.msk [vmem:[#allocation2 + $0x1] sm:$0x1] %vm28_vm2, %v473_v4  ;;  %vm182_vm3 = vcmask 7168  }
   0x3   :  { %422 = vmatpush3.bf16.msra.mxu0 %v447_v1  ;;  %32 = vst.msk [vmem:[#allocation3 + $0x1] sm:$0x1] %vm28_vm2, %v471_v0  ;;  %v404_v5 = vld [vmem:[%s595_s2] ss:$0 sm:$0xff]  ;;  %445 = vset.pattern.permute.xlu1 %v474_v19  ;;  %v544_v27 = vshrl.u32 %v162_v22, 7  ;;  %vm33_vm4 = vcmask 253952  }
   0x4   :  { %423 = vmatprep.subr.bf16.mxu0 %v471_v0  ;;  %v409_v12 = vld [vmem:[%s596_s3] ss:$0 sm:$0xff]  ;;  %446 = vset.pattern.permute.xlu0 %v474_v19  ;;  %34 = vst.msk [vmem:[#allocation4] sm:$0x1] %vm33_vm4, %v471_v0  ;;  %35 = vst.msk [vmem:[#allocation4 + $0x1] sm:$0x1] %vm33_vm4, %v471_v0  ;;  %v224_v19 = vunpack.c.l.bf16 %v524_v3 }
   0x5   :  { %v547_v33 = vsub.s32 0, %v544_v27  ;;  %vm398_vm6 = vcmask 17408  }
   0x7   :  { %424 = vmatpush3.bf16.msra.mxu0 %v448_v2 }
   0x8   :  { %v178_v62 = vld [vmem:[#allocation3] sm:$0x1] }
   0x9   :  { %v138_v32 = vld [vmem:[#allocation2] sm:$0x1]  ;;  %v139_v38 = vld [vmem:[#allocation2 + $0x1] sm:$0x1] }
   0xa   :  { %426 = vmatmul.mubr.msk.bf16.vlgmr.msra.gmra.mxu0 %vm66_vm1, %v524_v3 }
  0xca   :  { %v104_v6 = vpop.f32.mrf.mxu0 }
  0xcb   :  { %v105_v7 = vadd.f32 %v404_v5, %v104_v6 }
  0xcc   :  { %v427_v8 = vpop.f32.mrf.mxu0 }
  0xcd   :  { %451 = vtanh.f32 %v105_v7  ;;  %v179_v7 = vld [vmem:[#allocation3 + $0x1] sm:$0x1] }
  0xce   :  { %v107_v9 = vpop.f32.mrf.mxu0 }
  0xcf   :  { %v108_v10 = vadd.f32 %v404_v5, %v107_v9 }
  0xd0   :  { %v428_v11 = vpop.f32.mrf.mxu0 }
  0xd1   :  { %453 = vtanh.f32 %v108_v10 }
  0xda   :  { %v452_v13 = vpop.eup %451 }
  0xdb   :  { %v120_v14 = vmul.f32 %v452_v13, %v409_v12 }
  0xdd   :  { %v122_v15 = vsel %vm66_vm1, %v120_v14, 0.0 }
  0xde   :  { %v454_v16 = vpop.eup %453  ;;  %123 = vadd.xlane.f32.xlu0 %v122_v15  ;;  %v291_v15 = vld [vmem:[%s597_s4 + $0x18] sm:$0xff] }
  0xdf   :  { %v121_v17 = vmul.f32 %v454_v16, %v409_v12  ;;  %v290_v16 = vld [vmem:[%s597_s4 + $0x10] sm:$0xff]  ;;  %430 = vmatpush3.msra.mxu1 %v291_v15 }
  0xe0   :  { %431 = vmatprep.subr.mxu1 %v471_v0 }
  0xe1   :  { %v125_v18 = vsel %vm66_vm1, %v121_v17, 0.0  ;;  %v289_v17 = vld [vmem:[%s597_s4 + $0x8] sm:$0xff]  ;;  %432 = vmatpush3.msra.mxu1 %v290_v16 }
  0xe2   :  { %126 = vadd.xlane.f32.xlu0 %v125_v18  ;;  %433 = vmatprep.subr.mxu1 %v471_v0  ;;  %v288_v18 = vld [vmem:[%s597_s4] sm:$0xff] }
  0xe3   :  { %434 = vmatpush3.msra.mxu1 %v289_v17 }
  0xe4   :  { %435 = vmatprep.subr.mxu1 %v471_v0 }
  0xe5   :  { %436 = vmatpush3.msra.mxu1 %v288_v18 }
 0x167   :  { %v124_v20 = vpop.xlane.xlu0 %123 }
 0x168   :  { %v140_v21 = vrot.slane %v124_v20, 4 }
 0x16a   :  { %v141_v23 = vmax.f32 %v124_v20, %v140_v21 }
 0x16b   :  { %v127_v24 = vpop.xlane.xlu0 %126 }
 0x16c   :  { %v142_v25 = vrot.slane %v141_v23, 2  ;;  %v146_v26 = vrot.slane %v127_v24, 4 }
 0x16e   :  { %v143_v28 = vmax.f32 %v141_v23, %v142_v25  ;;  %v147_v29 = vmax.f32 %v127_v24, %v146_v26 }
 0x170   :  { %v144_v30 = vrot.slane %v143_v28, 1  ;;  %v148_v31 = vrot.slane %v147_v29, 2 }
 0x172   :  { %v145_v34 = vmax.f32 %v143_v28, %v144_v30  ;;  %v149_v35 = vmax.f32 %v147_v29, %v148_v31 }
 0x174   :  { %v152_v36 = vmax.f32 %v138_v32, %v145_v34  ;;  %v150_v37 = vrot.slane %v149_v35, 1 }
 0x176   :  { %v165_v39 = vrot.slane %v152_v36, %v547_v33  ;;  %257 = vst.msk [vmem:[#allocation2] sm:$0x1] %vm28_vm2, %v152_v36  ;;  %v151_v40 = vmax.f32 %v149_v35, %v150_v37  ;;  %v154_v45 = vsub.f32 %v138_v32, %v152_v36  ;;  %v202_v35 = vld [vmem:[#allocation4] sm:$0x1] }
 0x178   :  { %v172_v41 = vsub.f32 %v124_v20, %v165_v39  ;;  %v153_v42 = vmax.f32 %v139_v38, %v151_v40  ;;  %v156_v48 = vmul.f32 1.442695, %v154_v45 }
 0x17a   :  { %v174_v43 = vmul.f32 1.442695, %v172_v41  ;;  %v169_v44 = vrot.slane %v153_v42, %v547_v33  ;;  %258 = vst.msk [vmem:[#allocation2 + $0x1] sm:$0x1] %vm28_vm2, %v153_v42  ;;  %v155_v49 = vsub.f32 %v139_v38, %v153_v42 }
 0x17c   :  { %455 = vpow2.f32 %v174_v43  ;;  %v173_v46 = vsub.f32 %v127_v24, %v169_v44  ;;  %v158_v50 = vmul.f32 1.442695, %v155_v49  ;;  %v225_v24 = vunpack.c.h.bf16 %v524_v3 }
 0x17e   :  { %v176_v47 = vmul.f32 1.442695, %v173_v46 }
 0x180   :  { %457 = vpow2.f32 %v176_v47 }
 0x181   :  { %459 = vpow2.f32 %v156_v48  ;;  %v203_v48 = vld [vmem:[#allocation4 + $0x1] sm:$0x1] }
 0x182   :  { %461 = vpow2.f32 %v158_v50 }
 0x189   :  { %v456_v51 = vpop.eup %455 }
 0x18a   :  { %v183_v52 = vsel %vm182_vm3, %v456_v51, 0.0  ;;  %228 = vperm.xlu1 %445, %v456_v51  }
 0x18b   :  { %v184_v53 = vrot.slane %v183_v52, 4 }
 0x18d   :  { %v458_v54 = vpop.eup %457  ;;  %v185_v55 = vadd.f32 %v184_v53, %v183_v52 }
 0x18e   :  { %v190_v56 = vsel %vm182_vm3, %v458_v54, 0.0  ;;  %233 = vperm.xlu1 %445, %v458_v54   ;;  %v460_v59 = vpop.eup %459  ;;  %v475_v54 = vmov 1966171168  }
 0x18f   :  { %v186_v57 = vrot.slane %v185_v55, 2  ;;  %v191_v58 = vrot.slane %v190_v56, 4  ;;  %v180_v2 = vmul.f32 %v460_v59, %v178_v62  ;;  %v462_v6 = vpop.eup %461 }
 0x190   :  { %v181_v10 = vmul.f32 %v462_v6, %v179_v7 }
 0x191   :  { %v187_v60 = vadd.f32 %v186_v57, %v185_v55  ;;  %v192_v61 = vadd.f32 %v191_v58, %v190_v56  ;;  %v303_v55 = vunpack.c.l.s4 %v475_v54 }
 0x192   :  { %206 = vperm.xlu1 %445, %v460_v59  }
 0x193   :  { %v188_v63 = vrot.slane %v187_v60, 1  ;;  %v193_v1 = vrot.slane %v192_v61, 2  ;;  %v304_v56 = vunpack.c.0.s8 %v303_v55 }
 0x195   :  { %v189_v4 = vadd.f32 %v188_v63, %v187_v60  ;;  %v194_v5 = vadd.f32 %v193_v1, %v192_v61  ;;  %v307_v63 = vsub.s32 %v304_v56, %v544_v27 }
 0x197   :  { %v197_v8 = vadd.f32 %v189_v4, %v180_v2  ;;  %v195_v9 = vrot.slane %v194_v5, 1 }
 0x199   :  { %200 = vst.msk [vmem:[#allocation3] sm:$0x1] %vm28_vm2, %v197_v8  ;;  %v196_v11 = vadd.f32 %v195_v9, %v194_v5 }
 0x19b   :  { %v198_v12 = vadd.f32 %v196_v11, %v181_v10  ;;  %v389_v11 = vand.u32 127, %v162_v22 }
 0x19d   :  { %201 = vst.msk [vmem:[#allocation3 + $0x1] sm:$0x1] %vm28_vm2, %v198_v12  ;;  %vm390_vm5 = vcmp.eq.s32.totalorder %v389_v11, 2 }
 0x1a0   :  { %v264_v13 = vld [vmem:[#allocation3] sm:$0x1] }
 0x1a1   :  { %268 = vperm.xlu0 %446, %v264_v13  }
 0x1a4   :  { %v265_v14 = vld [vmem:[#allocation3 + $0x1] sm:$0x1] }
 0x1a5   :  { %277 = vperm.xlu1 %445, %v265_v14  }
 0x1a9   :  { %215 = vperm.xlu1 %445, %v462_v6  }
 0x205   :  { %v229_v20 = vpop.permute.xlu1 %228 }
 0x206   :  { %v236_v21 = vmul.f32 %v229_v20, %v224_v19 }
 0x208   :  { %v238_v23 = vsel %vm66_vm1, %v236_v21, 0.0 }
 0x209   :  { %v239_v25 = vrot.slane %v238_v23, 4  ;;  %v234_v26 = vpop.permute.xlu1 %233 }
 0x20a   :  { %v237_v29 = vmul.f32 %v234_v26, %v225_v24 }
 0x20b   :  { %v240_v28 = vadd.f32 %v239_v25, %v238_v23 }
 0x20c   :  { %v245_v0 = vsel %vm66_vm1, %v237_v29, 0.0 }
 0x20d   :  { %v241_v30 = vrot.slane %v240_v28, 2  ;;  %v207_v31 = vpop.permute.xlu1 %206  ;;  %v246_v37 = vrot.slane %v245_v0, 4 }
 0x20e   :  { %v212_v34 = vrot.slane %v207_v31, %v547_v33 }
 0x20f   :  { %v242_v32 = vadd.f32 %v241_v30, %v240_v28  ;;  %v247_v41 = vadd.f32 %v246_v37, %v245_v0 }
 0x210   :  { %v222_v39 = vmul.f32 %v212_v34, %v202_v35 }
 0x211   :  { %v243_v36 = vrot.slane %v242_v32, 1  ;;  %v248_v3 = vrot.slane %v247_v41, 2 }
 0x213   :  { %v244_v38 = vadd.f32 %v243_v36, %v242_v32  ;;  %v249_v43 = vadd.f32 %v248_v3, %v247_v41 }
 0x215   :  { %v252_v40 = vadd.f32 %v244_v38, %v222_v39  ;;  %v250_v47 = vrot.slane %v249_v43, 1 }
 0x217   :  { %255 = vst.msk [vmem:[#allocation4] sm:$0x1] %vm33_vm4, %v252_v40  ;;  %v251_v51 = vadd.f32 %v250_v47, %v249_v43 }
 0x21c   :  { %v269_v42 = vpop.permute.xlu0 %268 }
 0x21d   :  { %v274_v44 = vrot.slane %v269_v42, %v547_v33 }
 0x21e   :  { %v262_v59 = vld [vmem:[#allocation4] sm:$0x1] }
 0x21f   :  { %463 = vrcp.f32 %v274_v44 }
 0x220   :  { %v278_v45 = vpop.permute.xlu1 %277 }
 0x221   :  { %v283_v46 = vrot.slane %v278_v45, %v547_v33 }
 0x223   :  { %465 = vrcp.f32 %v283_v46 }
 0x224   :  { %v216_v49 = vpop.permute.xlu1 %215 }
 0x225   :  { %v221_v50 = vrot.slane %v216_v49, %v547_v33  ;;  %v410_v33 = vld [vmem:[%s598_s5] ss:$0 sm:$0xff] }
 0x227   :  { %v223_v52 = vmul.f32 %v221_v50, %v203_v48 }
 0x229   :  { %v253_v53 = vadd.f32 %v251_v51, %v223_v52 }
 0x22b   :  { %256 = vst.msk [vmem:[#allocation4 + $0x1] sm:$0x1] %vm33_vm4, %v253_v53 }
 0x22c   :  { %v464_v57 = vpop.eup %463 }
 0x22d   :  { %v285_v61 = vmul.f32 %v464_v57, %v262_v59 }
 0x230   :  { %v466_v58 = vpop.eup %465 }
 0x232   :  { %v263_v60 = vld [vmem:[#allocation4 + $0x1] sm:$0x1] }
 0x233   :  { %v287_v62 = vmul.f32 %v466_v58, %v263_v60 }
 0x235   :  { %v301_v1 = vcombine.low %v285_v61, %v287_v62 }
 0x237   :  { %v308_v2 = vrot.slane %v301_v1, %v307_v63 }
 0x239   :  { %v315_v4 = vrot.slane %v308_v2, %v307_v63 }
 0x23b   :  { %438 = vmatmul.mubr.msk.f32.vlgmr.msra.gmra.mxu1 %vm66_vm1, %v315_v4 }
 0x2fb   :  { %v384_v5 = vpop.f32.mrf.mxu1 }
 0x2fc   :  { %v385_v6 = vadd.f32 %v410_v33, %v384_v5 }
 0x2fd   :  { %v439_v7 = vpop.f32.mrf.mxu1 }
 0x2fe   :  { %v412_v8 = vmul.f32 -1.442695, %v385_v6 }
 0x300   :  { %467 = vpow2.f32 %v412_v8 }
 0x30d   :  { %v468_v9 = vpop.eup %467 }
 0x30e   :  { %v394_v10 = vadd.f32 1.0, %v468_v9 }
 0x310   :  { %469 = vrcp.f32 %v394_v10 }
 0x31d   :  { %v470_v27 = vpop.eup %469 }
 0x31e   :  { %v397_v12 = vsel %vm390_vm5, %v470_v27, %v385_v6 }
 0x31f   :  { %399 = vst.msk [vmem:[%s599_s6] sm:$0x3] %vm398_vm6, %v397_v12 }

// kernel: wav2vec_lstm_forward.18
= control target key start
LH: loop header
LB: loop body
LE: loop exit
PB: predicated region body
PF: predicated region fallthrough
CT: control target
= control target key end

     0   :  { %vm16_vm0 = vcmask 254976   ;;  %v1409_v0 = vmov 0.0   ;;  %vm1410_vm1 = vmmov 0   ;;  %vm42_vm2 = vcmask 261120   ;;  %s1412_s15 = smov 64   ;;  %s1413_s5 = smov 96   ;;  %s1806_s1 = inlined_call_operand.vmem [shape: bf16[32,128], index: 1, kind: input, shape index: {}]   ;;  %s1807_s0 = inlined_call_operand.vmem [shape: bf16[2,8,128], index: 0, kind: input, shape index: {}]   ;;  %s1808_s2 = inlined_call_operand.vmem [shape: bf16[2,8,32], index: 2, kind: output, shape index: {}]  }
   0x1   :  { %1210 = vmatprep.subr.bf16.mxu0 %v1409_v0  ;;  %v1433_v1 = vld [vmem:[%s1806_s1 + $0x8] sm:$0xff]   ;;  %1214 = vmatprep.mubr.msk.bf16.mxu0 %vm1410_vm1, %v1409_v0  ;;  %17 = vst.msk [vmem:[#allocation2] sm:$0x3] %vm16_vm0, %v1409_v0  ;;  %18 = vst.msk [vmem:[#allocation3] sm:$0x3] %vm16_vm0, %v1409_v0  ;;  %v1446_v2 = vld [vmem:[%s1806_s1] sm:$0xff]  }
   0x2   :  { %1218 = vmatprep.subr.bf16.mxu1 %v1409_v0  ;;  %1222 = vmatprep.mubr.msk.bf16.mxu1 %vm1410_vm1, %v1409_v0  ;;  %s1411_s1 = smov 32   ;;  %v1183_v7 = vld [vmem:[%s1807_s0] sm:$0xff]   ;;  %vm172_vm3 = vcmask 1041409   ;;  %vm162_vm4 = vcmask 253952   ;;  %vm163_vm5 = vsmask.f32 256 }
   0x3   :  { %1211 = vmatpush3.bf16.msra.mxu0 %v1433_v1  ;;  %1219 = vmatpush3.bf16.msra.mxu1 %v1433_v1  ;;  %v1467_v8 = vunpack.c.h.bf16 %v1183_v7  ;;  %v1469_v11 = vunpack.c.l.bf16 %v1183_v7  ;;  %vm1670_vm6 = vmand %vm162_vm4, %vm163_vm5  ;;  %vm425_vm7 = vcmask 254977   ;;  %vm426_vm8 = vsmask.f32 1280 }
   0x4   :  { %1212 = vmatprep.subr.bf16.mxu0 %v1409_v0  ;;  %1220 = vmatprep.subr.bf16.mxu1 %v1409_v0  ;;  %vm1690_vm9 = vmand %vm425_vm7, %vm426_vm8  ;;  %vm690_vm10 = vcmask 256002   ;;  %vm691_vm11 = vsmask.f32 2304  ;;  %vm955_vm13 = vcmask 257027   ;;  %vm956_vm14 = vsmask.f32 3328 }
   0x5   :  { %vm1713_vm12 = vmand %vm690_vm10, %vm691_vm11  ;;  %vm294_vm0 = vsmask.f32 7938  ;;  %vm823_vm5 = vsmask.f32 7946  ;;  %vm1088_vm8 = vsmask.f32 7950 }
   0x6   :  { %vm957_vm15 = vmand %vm955_vm13, %vm956_vm14 }
   0x7   :  { %1213 = vmatpush3.bf16.msra.mxu0 %v1446_v2  ;;  %1221 = vmatpush3.bf16.msra.mxu1 %v1446_v2 }
   0x8   :  { %v27_v3 = vld [vmem:[#allocation2] sm:$0x3]  ;;  %v28_v4 = vld [vmem:[#allocation3] sm:$0x3]  ;;  %1226 = vmatprep.subr.bf16.mxu0 %v1409_v0  ;;  %1234 = vmatprep.subr.bf16.mxu1 %v1409_v0 }
   0x9   :  { %v29_v5 = vpack.c.bf16 %v27_v3, %v27_v3  ;;  %v107_v6 = vrot.slane %v28_v4, 1 }
   0xb   :  { %1215 = vmatmul.mubr.msk.bf16.vlgmr.msra.gmra.mxu0 %vm42_vm2, %v29_v5  ;;  %110 = vrot.lane.b32.xlu1 %v107_v6, %s1411_s1 }
   0xc   :  { %1227 = vmatpush3.bf16.msra.mxu0 %v1433_v1  ;;  %1230 = vmatprep.mubr.msk.bf16.mxu0 %vm1410_vm1, %v1409_v0 }
   0xd   :  { %1228 = vmatprep.subr.bf16.mxu0 %v1409_v0 }
   0xf   :  { %108 = vrot.lane.b32.xlu1 %v28_v4, %s1411_s1 }
  0x10   :  { %1229 = vmatpush3.bf16.msra.mxu0 %v1446_v2 }
  0x11   :  { %1242 = vmatprep.subr.bf16.mxu0 %v1409_v0 }
  0x7d   :  { %v111_v31 = vpop.permute.xlu1 %110 }
  0x81   :  { %v109_v33 = vpop.permute.xlu1 %108 }
  0xcb   :  { %v80_v9 = vpop.f32.mrf.mxu0 }
  0xcc   :  { %v87_v10 = vrot.slane %v80_v9, 1  ;;  %v90_v15 = vadd.f32 %v1469_v11, %v80_v9 }
  0xcd   :  { %v1216_v12 = vpop.f32.mrf.mxu0 }
  0xce   :  { %v91_v13 = vadd.f32 %v1467_v8, %v87_v10  ;;  %v1127_v20 = vmul.f32 -1.442695, %v90_v15 }
  0xcf   :  { %v83_v14 = vpop.f32.mrf.mxu0 }
  0xd0   :  { %1281 = vtanh.f32 %v91_v13  ;;  %v1128_v19 = vmul.f32 -1.442695, %v91_v13 }
  0xd1   :  { %v1217_v16 = vpop.f32.mrf.mxu0  ;;  %1283 = vtanh.f32 %v90_v15 }
  0xd2   :  { %1285 = vpow2.f32 %v1128_v19 }
  0xd3   :  { %1287 = vpow2.f32 %v1127_v20 }
  0xdd   :  { %v1282_v17 = vpop.eup %1281 }
  0xde   :  { %120 = vrot.lane.b32.xlu0 %v1282_v17, %s1412_s15  ;;  %v1284_v18 = vpop.eup %1283 }
  0xdf   :  { %v1286_v21 = vpop.eup %1285 }
  0xe0   :  { %v99_v22 = vadd.f32 1.0, %v1286_v21  ;;  %v1288_v23 = vpop.eup %1287 }
  0xe1   :  { %v98_v24 = vadd.f32 1.0, %v1288_v23 }
  0xe2   :  { %118 = vrot.lane.b32.xlu0 %v1284_v18, %s1412_s15  ;;  %1289 = vrcp.f32 %v99_v22 }
  0xe3   :  { %1291 = vrcp.f32 %v98_v24 }
  0xef   :  { %v1290_v25 = vpop.eup %1289 }
  0xf0   :  { %v1292_v28 = vpop.eup %1291  ;;  %v115_v32 = vmul.f32 %v1290_v25, %v111_v31 }
  0xf1   :  { %v114_v36 = vmul.f32 %v1292_v28, %v109_v33 }
 0x150   :  { %v121_v26 = vpop.permute.xlu0 %120 }
 0x151   :  { %v125_v27 = vmul.f32 %v1290_v25, %v121_v26 }
 0x153   :  { %130 = vrot.lane.b32.xlu0 %v125_v27, %s1411_s1 }
 0x154   :  { %v119_v29 = vpop.permute.xlu0 %118 }
 0x155   :  { %v124_v30 = vmul.f32 %v1292_v28, %v119_v29 }
 0x157   :  { %128 = vrot.lane.b32.xlu1 %v124_v30, %s1411_s1 }
 0x1c5   :  { %v131_v34 = vpop.permute.xlu0 %130 }
 0x1c6   :  { %v1477_v35 = vadd.f32 %v131_v34, %v115_v32 }
 0x1c8   :  { %1293 = vtanh.f32 %v1477_v35  ;;  %v243_v15 = vrot.slane %v1477_v35, 7 }
 0x1c9   :  { %v129_v37 = vpop.permute.xlu1 %128 }
 0x1ca   :  { %v1480_v38 = vadd.f32 %v129_v37, %v114_v36 }
 0x1cc   :  { %1295 = vtanh.f32 %v1480_v38  ;;  %v242_v17 = vrot.slane %v1480_v38, 7 }
 0x1d5   :  { %v1294_v39 = vpop.eup %1293 }
 0x1d6   :  { %142 = vrot.lane.b32.xlu0 %v1294_v39, %s1412_s15 }
 0x1d9   :  { %v1296_v40 = vpop.eup %1295 }
 0x1da   :  { %140 = vrot.lane.b32.xlu1 %v1296_v40, %s1412_s15 }
 0x248   :  { %v143_v41 = vpop.permute.xlu0 %142 }
 0x249   :  { %v147_v42 = vmul.f32 %v1290_v25, %v143_v41 }
 0x24b   :  { %v1485_v43 = vpack.c.bf16 %v147_v42, %v147_v42 }
 0x24c   :  { %v141_v44 = vpop.permute.xlu1 %140 }
 0x24d   :  { %v153_v45 = vunpack.c.l.b16 %v1485_v43  ;;  %v146_v46 = vmul.f32 %v1292_v28, %v141_v44 }
 0x24f   :  { %v1488_v47 = vpack.c.bf16 %v146_v46, %v146_v46  ;;  %v171_v48 = vrot.slane %v153_v45, 7 }
 0x251   :  { %v152_v49 = vunpack.c.l.b16 %v1488_v47 }
 0x253   :  { %v173_v50 = vsel %vm172_vm3, %v171_v48, %v152_v49 }
 0x254   :  { %v174_v51 = vpack.c.b16 %v173_v50, %v173_v50 }
 0x256   :  { %175 = vrot.lane.b32.xlu0 %v174_v51, %s1411_s1 }
 0x2c8   :  { %v176_v52 = vpop.permute.xlu0 %175 }
 0x2c9   :  { %1223 = vmatmul.mubr.msk.bf16.vlgmr.msra.gmra.mxu1 %vm42_vm2, %v176_v52 }
 0x2ca   :  { %1235 = vmatpush3.bf16.msra.mxu1 %v1433_v1  ;;  %1238 = vmatprep.mubr.msk.bf16.mxu1 %vm1410_vm1, %v1409_v0 }
 0x2cb   :  { %1236 = vmatprep.subr.bf16.mxu1 %v1409_v0 }
 0x2ce   :  { %1237 = vmatpush3.bf16.msra.mxu1 %v1446_v2 }
 0x2cf   :  { %1250 = vmatprep.subr.bf16.mxu1 %v1409_v0 }
 0x389   :  { %v214_v53 = vpop.f32.mrf.mxu1 }
 0x38a   :  { %v221_v54 = vrot.slane %v214_v53, 7  ;;  %v225_v55 = vadd.f32 %v1467_v8, %v214_v53 }
 0x38b   :  { %v1224_v56 = vpop.f32.mrf.mxu1 }
 0x38c   :  { %v224_v57 = vadd.f32 %v1469_v11, %v221_v54  ;;  %1297 = vtanh.f32 %v225_v55  ;;  %v1133_v62 = vmul.f32 -1.442695, %v225_v55 }
 0x38d   :  { %v217_v58 = vpop.f32.mrf.mxu1 }
 0x38e   :  { %1299 = vtanh.f32 %v224_v57  ;;  %v1132_v63 = vmul.f32 -1.442695, %v224_v57 }
 0x38f   :  { %v1225_v59 = vpop.f32.mrf.mxu1  ;;  %1301 = vpow2.f32 %v1133_v62 }
 0x390   :  { %1303 = vpow2.f32 %v1132_v63 }
 0x399   :  { %v1298_v60 = vpop.eup %1297 }
 0x39a   :  { %252 = vrot.lane.b32.xlu0 %v1298_v60, %s1412_s15 }
 0x39b   :  { %v1300_v61 = vpop.eup %1299 }
 0x39c   :  { %250 = vrot.lane.b32.xlu1 %v1300_v61, %s1412_s15  ;;  %v1302_v3 = vpop.eup %1301 }
 0x39d   :  { %v1304_v4 = vpop.eup %1303  ;;  %v233_v5 = vadd.f32 1.0, %v1302_v3 }
 0x39e   :  { %v232_v6 = vadd.f32 1.0, %v1304_v4 }
 0x39f   :  { %1305 = vrcp.f32 %v233_v5 }
 0x3a0   :  { %1307 = vrcp.f32 %v232_v6 }
 0x3ac   :  { %v1306_v7 = vpop.eup %1305 }
 0x3ad   :  { %v1308_v12 = vpop.eup %1307  ;;  %v247_v16 = vmul.f32 %v1306_v7, %v243_v15 }
 0x3ae   :  { %v246_v20 = vmul.f32 %v1308_v12, %v242_v17 }
 0x40c   :  { %v253_v9 = vpop.permute.xlu0 %252 }
 0x40d   :  { %v257_v10 = vmul.f32 %v1306_v7, %v253_v9 }
 0x40e   :  { %v251_v13 = vpop.permute.xlu1 %250 }
 0x40f   :  { %262 = vrot.lane.b32.xlu0 %v257_v10, %s1411_s1  ;;  %v256_v14 = vmul.f32 %v1308_v12, %v251_v13 }
 0x411   :  { %260 = vrot.lane.b32.xlu1 %v256_v14, %s1411_s1 }
 0x481   :  { %v263_v18 = vpop.permute.xlu0 %262 }
 0x482   :  { %v1508_v19 = vadd.f32 %v263_v18, %v247_v16 }
 0x483   :  { %v261_v21 = vpop.permute.xlu1 %260 }
 0x484   :  { %1309 = vtanh.f32 %v1508_v19  ;;  %v266_v22 = vadd.f32 %v261_v21, %v246_v20  ;;  %v374_v62 = vrot.slane %v1508_v19, 7 }
 0x486   :  { %1311 = vtanh.f32 %v266_v22  ;;  %v373_v61 = vrot.slane %v266_v22, 7 }
 0x491   :  { %v1310_v23 = vpop.eup %1309 }
 0x492   :  { %274 = vrot.lane.b32.xlu0 %v1310_v23, %s1412_s15 }
 0x493   :  { %v1312_v24 = vpop.eup %1311 }
 0x494   :  { %272 = vrot.lane.b32.xlu1 %v1312_v24, %s1412_s15 }
 0x504   :  { %v275_v25 = vpop.permute.xlu0 %274 }
 0x505   :  { %v279_v26 = vmul.f32 %v1306_v7, %v275_v25 }
 0x506   :  { %v273_v27 = vpop.permute.xlu1 %272 }
 0x507   :  { %v278_v28 = vmul.f32 %v1308_v12, %v273_v27  ;;  %v1513_v29 = vpack.c.bf16 %v279_v26, %v279_v26 }
 0x509   :  { %v1515_v30 = vpack.c.bf16 %v278_v28, %v278_v28  ;;  %v285_v32 = vunpack.c.l.b16 %v1513_v29 }
 0x50b   :  { %v284_v31 = vunpack.c.l.b16 %v1515_v30 }
 0x50d   :  { %v302_v33 = vrot.slane %v284_v31, 1 }
 0x50f   :  { %v303_v34 = vsel %vm172_vm3, %v285_v32, %v302_v33 }
 0x510   :  { %v304_v35 = vpack.c.b16 %v303_v34, %v303_v34 }
 0x512   :  { %305 = vrot.lane.b32.xlu1 %v304_v35, %s1411_s1 }
 0x584   :  { %v306_v36 = vpop.permute.xlu1 %305 }
 0x585   :  { %1231 = vmatmul.mubr.msk.bf16.vlgmr.msra.gmra.mxu0 %vm42_vm2, %v306_v36 }
 0x586   :  { %1243 = vmatpush3.bf16.msra.mxu0 %v1433_v1  ;;  %1246 = vmatprep.mubr.msk.bf16.mxu0 %vm1410_vm1, %v1409_v0 }
 0x587   :  { %1244 = vmatprep.subr.bf16.mxu0 %v1409_v0 }
 0x58a   :  { %1245 = vmatpush3.bf16.msra.mxu0 %v1446_v2 }
 0x58b   :  { %1258 = vmatprep.subr.bf16.mxu0 %v1409_v0 }
 0x645   :  { %v344_v37 = vpop.f32.mrf.mxu0 }
 0x646   :  { %v351_v38 = vrot.slane %v344_v37, 6  ;;  %v352_v39 = vrot.slane %v344_v37, 7 }
 0x647   :  { %v1232_v40 = vpop.f32.mrf.mxu0 }
 0x648   :  { %v355_v41 = vadd.f32 %v1469_v11, %v351_v38  ;;  %v356_v42 = vadd.f32 %v1467_v8, %v352_v39 }
 0x649   :  { %v347_v44 = vpop.f32.mrf.mxu0 }
 0x64a   :  { %1313 = vtanh.f32 %v355_v41  ;;  %v1137_v49 = vmul.f32 -1.442695, %v355_v41  ;;  %v1138_v50 = vmul.f32 -1.442695, %v356_v42 }
 0x64b   :  { %1315 = vtanh.f32 %v356_v42  ;;  %v1233_v45 = vpop.f32.mrf.mxu0 }
 0x64c   :  { %1317 = vpow2.f32 %v1137_v49 }
 0x64d   :  { %1319 = vpow2.f32 %v1138_v50 }
 0x657   :  { %v1314_v46 = vpop.eup %1313 }
 0x658   :  { %v1316_v48 = vpop.eup %1315  ;;  %381 = vrot.lane.b32.xlu0 %v1314_v46, %s1412_s15 }
 0x659   :  { %383 = vrot.lane.b32.xlu1 %v1316_v48, %s1412_s15  ;;  %v1318_v51 = vpop.eup %1317 }
 0x65a   :  { %v1320_v52 = vpop.eup %1319  ;;  %v363_v53 = vadd.f32 1.0, %v1318_v51 }
 0x65b   :  { %v364_v54 = vadd.f32 1.0, %v1320_v52 }
 0x65c   :  { %1321 = vrcp.f32 %v363_v53 }
 0x65d   :  { %1323 = vrcp.f32 %v364_v54 }
 0x669   :  { %v1322_v55 = vpop.eup %1321 }
 0x66a   :  { %v1324_v57 = vpop.eup %1323  ;;  %v377_v63 = vmul.f32 %v1322_v55, %v373_v61 }
 0x66b   :  { %v378_v3 = vmul.f32 %v1324_v57, %v374_v62 }
 0x6ca   :  { %v382_v56 = vpop.permute.xlu0 %381 }
 0x6cb   :  { %v384_v58 = vpop.permute.xlu1 %383  ;;  %v387_v59 = vmul.f32 %v1322_v55, %v382_v56 }
 0x6cc   :  { %v388_v60 = vmul.f32 %v1324_v57, %v384_v58 }
 0x6cd   :  { %391 = vrot.lane.b32.xlu0 %v387_v59, %s1411_s1 }
 0x6ce   :  { %393 = vrot.lane.b32.xlu1 %v388_v60, %s1411_s1 }
 0x73f   :  { %v392_v4 = vpop.permute.xlu0 %391 }
 0x740   :  { %v394_v5 = vpop.permute.xlu1 %393  ;;  %v1535_v6 = vadd.f32 %v392_v4, %v377_v63 }
 0x741   :  { %v1537_v7 = vadd.f32 %v394_v5, %v378_v3 }
 0x742   :  { %1325 = vtanh.f32 %v1535_v6  ;;  %v506_v51 = vrot.slane %v1535_v6, 7 }
 0x743   :  { %1327 = vtanh.f32 %v1537_v7  ;;  %v507_v52 = vrot.slane %v1537_v7, 7 }
 0x74f   :  { %v1326_v9 = vpop.eup %1325 }
 0x750   :  { %v1328_v10 = vpop.eup %1327  ;;  %403 = vrot.lane.b32.xlu0 %v1326_v9, %s1412_s15 }
 0x751   :  { %405 = vrot.lane.b32.xlu1 %v1328_v10, %s1412_s15 }
 0x7c2   :  { %v404_v12 = vpop.permute.xlu0 %403 }
 0x7c3   :  { %v406_v13 = vpop.permute.xlu1 %405  ;;  %v409_v14 = vmul.f32 %v1322_v55, %v404_v12 }
 0x7c4   :  { %v410_v15 = vmul.f32 %v1324_v57, %v406_v13 }
 0x7c5   :  { %v1543_v16 = vpack.c.bf16 %v409_v14, %v409_v14 }
 0x7c6   :  { %v1545_v17 = vpack.c.bf16 %v410_v15, %v410_v15 }
 0x7c7   :  { %v415_v18 = vunpack.c.l.b16 %v1543_v16 }
 0x7c8   :  { %v416_v19 = vunpack.c.l.b16 %v1545_v17 }
 0x7c9   :  { %v434_v20 = vrot.slane %v415_v18, 2 }
 0x7ca   :  { %v435_v21 = vrot.slane %v416_v19, 1 }
 0x7cc   :  { %v436_v22 = vsel %vm172_vm3, %v435_v21, %v434_v20 }
 0x7cd   :  { %v437_v23 = vpack.c.b16 %v436_v22, %v436_v22 }
 0x7cf   :  { %438 = vrot.lane.b32.xlu0 %v437_v23, %s1411_s1 }
 0x841   :  { %v439_v24 = vpop.permute.xlu0 %438 }
 0x842   :  { %1239 = vmatmul.mubr.msk.bf16.vlgmr.msra.gmra.mxu1 %vm42_vm2, %v439_v24 }
 0x843   :  { %1251 = vmatpush3.bf16.msra.mxu1 %v1433_v1  ;;  %1254 = vmatprep.mubr.msk.bf16.mxu1 %vm1410_vm1, %v1409_v0 }
 0x844   :  { %1252 = vmatprep.subr.bf16.mxu1 %v1409_v0 }
 0x847   :  { %1253 = vmatpush3.bf16.msra.mxu1 %v1446_v2 }
 0x848   :  { %1266 = vmatprep.subr.bf16.mxu1 %v1409_v0 }
 0x902   :  { %v477_v25 = vpop.f32.mrf.mxu1 }
 0x903   :  { %v484_v26 = vrot.slane %v477_v25, 5  ;;  %v485_v27 = vrot.slane %v477_v25, 6 }
 0x904   :  { %v1240_v28 = vpop.f32.mrf.mxu1 }
 0x905   :  { %v488_v31 = vadd.f32 %v1469_v11, %v484_v26  ;;  %v489_v32 = vadd.f32 %v1467_v8, %v485_v27 }
 0x906   :  { %v480_v33 = vpop.f32.mrf.mxu1 }
 0x907   :  { %1329 = vtanh.f32 %v488_v31  ;;  %v1142_v37 = vmul.f32 -1.442695, %v488_v31  ;;  %v1143_v38 = vmul.f32 -1.442695, %v489_v32 }
 0x908   :  { %1331 = vtanh.f32 %v489_v32  ;;  %v1241_v34 = vpop.f32.mrf.mxu1 }
 0x909   :  { %1333 = vpow2.f32 %v1142_v37 }
 0x90a   :  { %1335 = vpow2.f32 %v1143_v38 }
 0x914   :  { %v1330_v35 = vpop.eup %1329 }
 0x915   :  { %v1332_v36 = vpop.eup %1331  ;;  %514 = vrot.lane.b32.xlu1 %v1330_v35, %s1412_s15 }
 0x916   :  { %516 = vrot.lane.b32.xlu0 %v1332_v36, %s1412_s15  ;;  %v1334_v39 = vpop.eup %1333 }
 0x917   :  { %v1336_v40 = vpop.eup %1335  ;;  %v496_v41 = vadd.f32 1.0, %v1334_v39 }
 0x918   :  { %v497_v42 = vadd.f32 1.0, %v1336_v40 }
 0x919   :  { %1337 = vrcp.f32 %v496_v41 }
 0x91a   :  { %1339 = vrcp.f32 %v497_v42 }
 0x926   :  { %v1338_v44 = vpop.eup %1337 }
 0x927   :  { %v1340_v46 = vpop.eup %1339  ;;  %v510_v53 = vmul.f32 %v1338_v44, %v506_v51 }
 0x928   :  { %v511_v54 = vmul.f32 %v1340_v46, %v507_v52 }
 0x987   :  { %v515_v45 = vpop.permute.xlu1 %514 }
 0x988   :  { %v517_v48 = vpop.permute.xlu0 %516  ;;  %v520_v49 = vmul.f32 %v1338_v44, %v515_v45 }
 0x989   :  { %v521_v50 = vmul.f32 %v1340_v46, %v517_v48 }
 0x98a   :  { %524 = vrot.lane.b32.xlu1 %v520_v49, %s1411_s1 }
 0x98b   :  { %526 = vrot.lane.b32.xlu0 %v521_v50, %s1411_s1 }
 0x9fc   :  { %v525_v55 = vpop.permute.xlu1 %524 }
 0x9fd   :  { %v527_v56 = vpop.permute.xlu0 %526  ;;  %v530_v57 = vadd.f32 %v525_v55, %v510_v53 }
 0x9fe   :  { %v531_v58 = vadd.f32 %v527_v56, %v511_v54 }
 0x9ff   :  { %1341 = vtanh.f32 %v530_v57  ;;  %v638_v41 = vrot.slane %v530_v57, 7 }
 0xa00   :  { %1343 = vtanh.f32 %v531_v58  ;;  %v639_v42 = vrot.slane %v531_v58, 7 }
 0xa0c   :  { %v1342_v59 = vpop.eup %1341 }
 0xa0d   :  { %v1344_v60 = vpop.eup %1343  ;;  %536 = vrot.lane.b32.xlu1 %v1342_v59, %s1412_s15 }
 0xa0e   :  { %538 = vrot.lane.b32.xlu0 %v1344_v60, %s1412_s15 }
 0xa7f   :  { %v537_v61 = vpop.permute.xlu1 %536 }
 0xa80   :  { %v539_v62 = vpop.permute.xlu0 %538  ;;  %v542_v63 = vmul.f32 %v1338_v44, %v537_v61 }
 0xa81   :  { %v543_v3 = vmul.f32 %v1340_v46, %v539_v62 }
 0xa82   :  { %v1568_v4 = vpack.c.bf16 %v542_v63, %v542_v63 }
 0xa83   :  { %v1570_v5 = vpack.c.bf16 %v543_v3, %v543_v3 }
 0xa84   :  { %v548_v6 = vunpack.c.l.b16 %v1568_v4 }
 0xa85   :  { %v549_v7 = vunpack.c.l.b16 %v1570_v5 }
 0xa86   :  { %v566_v9 = vrot.slane %v548_v6, 3 }
 0xa87   :  { %v567_v10 = vrot.slane %v549_v7, 2 }
 0xa89   :  { %v568_v12 = vsel %vm172_vm3, %v567_v10, %v566_v9 }
 0xa8a   :  { %v569_v13 = vpack.c.b16 %v568_v12, %v568_v12 }
 0xa8c   :  { %570 = vrot.lane.b32.xlu1 %v569_v13, %s1411_s1 }
 0xafe   :  { %v571_v14 = vpop.permute.xlu1 %570 }
 0xaff   :  { %1247 = vmatmul.mubr.msk.bf16.vlgmr.msra.gmra.mxu0 %vm42_vm2, %v571_v14 }
 0xb00   :  { %1259 = vmatpush3.bf16.msra.mxu0 %v1433_v1  ;;  %1262 = vmatprep.mubr.msk.bf16.mxu0 %vm1410_vm1, %v1409_v0 }
 0xb01   :  { %1260 = vmatprep.subr.bf16.mxu0 %v1409_v0 }
 0xb04   :  { %1261 = vmatpush3.bf16.msra.mxu0 %v1446_v2 }
 0xbbf   :  { %v609_v15 = vpop.f32.mrf.mxu0 }
 0xbc0   :  { %v616_v18 = vrot.slane %v609_v15, 4  ;;  %v617_v19 = vrot.slane %v609_v15, 5 }
 0xbc1   :  { %v1248_v20 = vpop.f32.mrf.mxu0 }
 0xbc2   :  { %v620_v21 = vadd.f32 %v1469_v11, %v616_v18  ;;  %v621_v22 = vadd.f32 %v1467_v8, %v617_v19 }
 0xbc3   :  { %v612_v23 = vpop.f32.mrf.mxu0 }
 0xbc4   :  { %1345 = vtanh.f32 %v620_v21  ;;  %v1147_v27 = vmul.f32 -1.442695, %v620_v21  ;;  %v1148_v28 = vmul.f32 -1.442695, %v621_v22 }
 0xbc5   :  { %1347 = vtanh.f32 %v621_v22  ;;  %v1249_v24 = vpop.f32.mrf.mxu0 }
 0xbc6   :  { %1349 = vpow2.f32 %v1147_v27 }
 0xbc7   :  { %1351 = vpow2.f32 %v1148_v28 }
 0xbd1   :  { %v1346_v25 = vpop.eup %1345 }
 0xbd2   :  { %v1348_v26 = vpop.eup %1347  ;;  %646 = vrot.lane.b32.xlu0 %v1346_v25, %s1412_s15 }
 0xbd3   :  { %648 = vrot.lane.b32.xlu1 %v1348_v26, %s1412_s15  ;;  %v1350_v31 = vpop.eup %1349 }
 0xbd4   :  { %v1352_v32 = vpop.eup %1351  ;;  %v628_v33 = vadd.f32 1.0, %v1350_v31 }
 0xbd5   :  { %v629_v34 = vadd.f32 1.0, %v1352_v32 }
 0xbd6   :  { %1353 = vrcp.f32 %v628_v33 }
 0xbd7   :  { %1355 = vrcp.f32 %v629_v34 }
 0xbe3   :  { %v1354_v35 = vpop.eup %1353 }
 0xbe4   :  { %v1356_v37 = vpop.eup %1355  ;;  %v642_v44 = vmul.f32 %v1354_v35, %v638_v41 }
 0xbe5   :  { %v643_v45 = vmul.f32 %v1356_v37, %v639_v42 }
 0xc44   :  { %v647_v36 = vpop.permute.xlu0 %646 }
 0xc45   :  { %v649_v38 = vpop.permute.xlu1 %648  ;;  %v652_v39 = vmul.f32 %v1354_v35, %v647_v36 }
 0xc46   :  { %v653_v40 = vmul.f32 %v1356_v37, %v649_v38 }
 0xc47   :  { %656 = vrot.lane.b32.xlu0 %v652_v39, %s1411_s1 }
 0xc48   :  { %658 = vrot.lane.b32.xlu1 %v653_v40, %s1411_s1 }
 0xcb9   :  { %v657_v46 = vpop.permute.xlu0 %656 }
 0xcba   :  { %v659_v48 = vpop.permute.xlu1 %658  ;;  %v662_v49 = vadd.f32 %v657_v46, %v642_v44 }
 0xcbb   :  { %v663_v50 = vadd.f32 %v659_v48, %v643_v45 }
 0xcbc   :  { %1357 = vtanh.f32 %v662_v49  ;;  %v771_v32 = vrot.slane %v662_v49, 7 }
 0xcbd   :  { %1359 = vtanh.f32 %v663_v50  ;;  %v772_v33 = vrot.slane %v663_v50, 7 }
 0xcc9   :  { %v1358_v51 = vpop.eup %1357 }
 0xcca   :  { %v1360_v52 = vpop.eup %1359  ;;  %668 = vrot.lane.b32.xlu0 %v1358_v51, %s1412_s15 }
 0xccb   :  { %670 = vrot.lane.b32.xlu1 %v1360_v52, %s1412_s15 }
 0xd3c   :  { %v669_v53 = vpop.permute.xlu0 %668 }
 0xd3d   :  { %v671_v54 = vpop.permute.xlu1 %670  ;;  %v674_v55 = vmul.f32 %v1354_v35, %v669_v53 }
 0xd3e   :  { %v675_v56 = vmul.f32 %v1356_v37, %v671_v54 }
 0xd3f   :  { %v1590_v57 = vpack.c.bf16 %v674_v55, %v674_v55 }
 0xd40   :  { %v1592_v58 = vpack.c.bf16 %v675_v56, %v675_v56 }
 0xd41   :  { %v680_v59 = vunpack.c.l.b16 %v1590_v57 }
 0xd42   :  { %v681_v60 = vunpack.c.l.b16 %v1592_v58 }
 0xd43   :  { %v699_v61 = vrot.slane %v680_v59, 4 }
 0xd44   :  { %v700_v62 = vrot.slane %v681_v60, 3 }
 0xd46   :  { %v701_v63 = vsel %vm172_vm3, %v700_v62, %v699_v61 }
 0xd47   :  { %v702_v3 = vpack.c.b16 %v701_v63, %v701_v63 }
 0xd49   :  { %703 = vrot.lane.b32.xlu0 %v702_v3, %s1411_s1 }
 0xdbb   :  { %v704_v6 = vpop.permute.xlu0 %703 }
 0xdbc   :  { %1255 = vmatmul.mubr.msk.bf16.vlgmr.msra.gmra.mxu1 %vm42_vm2, %v704_v6 }
 0xdbd   :  { %1267 = vmatpush3.bf16.msra.mxu1 %v1433_v1  ;;  %1270 = vmatprep.mubr.msk.bf16.mxu1 %vm1410_vm1, %v1409_v0  ;;  %vm295_vm1 = vmand %vm162_vm4, %vm294_vm0 }
 0xdbe   :  { %1268 = vmatprep.subr.bf16.mxu1 %v1409_v0 }
 0xdc1   :  { %1269 = vmatpush3.bf16.msra.mxu1 %v1446_v2 }
 0xe7c   :  { %v742_v7 = vpop.f32.mrf.mxu1 }
 0xe7d   :  { %v749_v9 = vrot.slane %v742_v7, 3  ;;  %v750_v10 = vrot.slane %v742_v7, 4 }
 0xe7e   :  { %v1256_v12 = vpop.f32.mrf.mxu1 }
 0xe7f   :  { %v753_v13 = vadd.f32 %v1469_v11, %v749_v9  ;;  %v754_v14 = vadd.f32 %v1467_v8, %v750_v10 }
 0xe80   :  { %v745_v15 = vpop.f32.mrf.mxu1 }
 0xe81   :  { %1361 = vtanh.f32 %v753_v13  ;;  %v1152_v0 = vmul.f32 -1.442695, %v753_v13  ;;  %v1153_v2 = vmul.f32 -1.442695, %v754_v14 }
 0xe82   :  { %1363 = vtanh.f32 %v754_v14  ;;  %v1257_v18 = vpop.f32.mrf.mxu1 }
 0xe83   :  { %1365 = vpow2.f32 %v1152_v0 }
 0xe84   :  { %1367 = vpow2.f32 %v1153_v2 }
 0xe8e   :  { %v1362_v1 = vpop.eup %1361 }
 0xe8f   :  { %v1364_v19 = vpop.eup %1363  ;;  %779 = vrot.lane.b32.xlu1 %v1362_v1, %s1412_s15 }
 0xe90   :  { %781 = vrot.lane.b32.xlu0 %v1364_v19, %s1412_s15  ;;  %v1366_v20 = vpop.eup %1365 }
 0xe91   :  { %v1368_v21 = vpop.eup %1367  ;;  %v761_v22 = vadd.f32 1.0, %v1366_v20 }
 0xe92   :  { %v762_v23 = vadd.f32 1.0, %v1368_v21 }
 0xe93   :  { %1369 = vrcp.f32 %v761_v22 }
 0xe94   :  { %1371 = vrcp.f32 %v762_v23 }
 0xea0   :  { %v1370_v24 = vpop.eup %1369 }
 0xea1   :  { %v1372_v26 = vpop.eup %1371  ;;  %v775_v34 = vmul.f32 %v1370_v24, %v771_v32 }
 0xea2   :  { %v776_v35 = vmul.f32 %v1372_v26, %v772_v33 }
 0xf01   :  { %v780_v25 = vpop.permute.xlu1 %779 }
 0xf02   :  { %v782_v27 = vpop.permute.xlu0 %781  ;;  %v785_v28 = vmul.f32 %v1370_v24, %v780_v25 }
 0xf03   :  { %v786_v31 = vmul.f32 %v1372_v26, %v782_v27 }
 0xf04   :  { %789 = vrot.lane.b32.xlu1 %v785_v28, %s1411_s1 }
 0xf05   :  { %791 = vrot.lane.b32.xlu0 %v786_v31, %s1411_s1 }
 0xf76   :  { %v790_v36 = vpop.permute.xlu1 %789 }
 0xf77   :  { %v792_v37 = vpop.permute.xlu0 %791  ;;  %v795_v38 = vadd.f32 %v790_v36, %v775_v34 }
 0xf78   :  { %v796_v39 = vadd.f32 %v792_v37, %v776_v35 }
 0xf79   :  { %1373 = vtanh.f32 %v795_v38  ;;  %v903_v23 = vrot.slane %v795_v38, 7 }
 0xf7a   :  { %1375 = vtanh.f32 %v796_v39 }
 0xf86   :  { %v1374_v40 = vpop.eup %1373 }
 0xf87   :  { %v1376_v41 = vpop.eup %1375  ;;  %801 = vrot.lane.b32.xlu1 %v1374_v40, %s1412_s15 }
 0xf88   :  { %803 = vrot.lane.b32.xlu0 %v1376_v41, %s1412_s15 }
 0xff9   :  { %v802_v42 = vpop.permute.xlu1 %801 }
 0xffa   :  { %v804_v44 = vpop.permute.xlu0 %803  ;;  %v807_v45 = vmul.f32 %v1370_v24, %v802_v42  ;;  %v904_v24 = vrot.slane %v796_v39, 7 }
 0xffb   :  { %v808_v46 = vmul.f32 %v1372_v26, %v804_v44 }
 0xffc   :  { %v1612_v48 = vpack.c.bf16 %v807_v45, %v807_v45 }
 0xffd   :  { %v1614_v49 = vpack.c.bf16 %v808_v46, %v808_v46 }
 0xffe   :  { %v813_v50 = vunpack.c.l.b16 %v1612_v48 }
 0xfff   :  { %v814_v51 = vunpack.c.l.b16 %v1614_v49 }
0x1000   :  { %v831_v52 = vrot.slane %v813_v50, 5 }
0x1001   :  { %v832_v53 = vrot.slane %v814_v51, 4 }
0x1003   :  { %v833_v54 = vsel %vm172_vm3, %v832_v53, %v831_v52 }
0x1004   :  { %v834_v55 = vpack.c.b16 %v833_v54, %v833_v54 }
0x1006   :  { %835 = vrot.lane.b32.xlu1 %v834_v55, %s1411_s1 }
0x1078   :  { %v836_v56 = vpop.permute.xlu1 %835 }
0x1079   :  { %1263 = vmatmul.mubr.msk.bf16.vlgmr.msra.gmra.mxu0 %vm42_vm2, %v836_v56 }
0x1139   :  { %v874_v59 = vpop.f32.mrf.mxu0 }
0x113a   :  { %v881_v60 = vrot.slane %v874_v59, 2  ;;  %v882_v61 = vrot.slane %v874_v59, 3 }
0x113b   :  { %v1264_v62 = vpop.f32.mrf.mxu0 }
0x113c   :  { %v885_v63 = vadd.f32 %v1469_v11, %v881_v60  ;;  %v886_v3 = vadd.f32 %v1467_v8, %v882_v61 }
0x113d   :  { %v877_v6 = vpop.f32.mrf.mxu0 }
0x113e   :  { %1377 = vtanh.f32 %v885_v63  ;;  %v1157_v12 = vmul.f32 -1.442695, %v885_v63  ;;  %v1158_v13 = vmul.f32 -1.442695, %v886_v3 }
0x113f   :  { %1379 = vtanh.f32 %v886_v3  ;;  %v1265_v7 = vpop.f32.mrf.mxu0 }
0x1140   :  { %1381 = vpow2.f32 %v1157_v12 }
0x1141   :  { %1383 = vpow2.f32 %v1158_v13 }
0x114b   :  { %v1378_v9 = vpop.eup %1377 }
0x114c   :  { %v1380_v10 = vpop.eup %1379  ;;  %911 = vrot.lane.b32.xlu0 %v1378_v9, %s1412_s15 }
0x114d   :  { %913 = vrot.lane.b32.xlu1 %v1380_v10, %s1412_s15  ;;  %v1382_v14 = vpop.eup %1381 }
0x114e   :  { %v1384_v15 = vpop.eup %1383  ;;  %v893_v18 = vadd.f32 1.0, %v1382_v14 }
0x114f   :  { %v894_v1 = vadd.f32 1.0, %v1384_v15 }
0x1150   :  { %1385 = vrcp.f32 %v893_v18 }
0x1151   :  { %1387 = vrcp.f32 %v894_v1 }
0x115d   :  { %v1386_v19 = vpop.eup %1385 }
0x115e   :  { %v1388_v2 = vpop.eup %1387  ;;  %v907_v25 = vmul.f32 %v1386_v19, %v903_v23 }
0x115f   :  { %v908_v26 = vmul.f32 %v1388_v2, %v904_v24 }
0x11be   :  { %v912_v0 = vpop.permute.xlu0 %911 }
0x11bf   :  { %v914_v20 = vpop.permute.xlu1 %913  ;;  %v917_v21 = vmul.f32 %v1386_v19, %v912_v0 }
0x11c0   :  { %v918_v22 = vmul.f32 %v1388_v2, %v914_v20 }
0x11c1   :  { %921 = vrot.lane.b32.xlu0 %v917_v21, %s1411_s1 }
0x11c2   :  { %923 = vrot.lane.b32.xlu1 %v918_v22, %s1411_s1 }
0x1233   :  { %v922_v27 = vpop.permute.xlu0 %921 }
0x1234   :  { %v924_v28 = vpop.permute.xlu1 %923  ;;  %v927_v31 = vadd.f32 %v922_v27, %v907_v25 }
0x1235   :  { %v928_v32 = vadd.f32 %v924_v28, %v908_v26  ;;  %v428_v28 = vld [vmem:[%s1808_s2] sm:$0x2] }
0x1236   :  { %1389 = vtanh.f32 %v927_v31  ;;  %v1036_v1 = vrot.slane %v927_v31, 7  ;;  %v431_v31 = vld [vmem:[%s1808_s2 + $0x4] sm:$0x2] }
0x1237   :  { %1391 = vtanh.f32 %v928_v32 }
0x1243   :  { %v1390_v33 = vpop.eup %1389 }
0x1244   :  { %v1392_v34 = vpop.eup %1391  ;;  %933 = vrot.lane.b32.xlu0 %v1390_v33, %s1412_s15 }
0x1245   :  { %935 = vrot.lane.b32.xlu1 %v1392_v34, %s1412_s15 }
0x12b6   :  { %v934_v35 = vpop.permute.xlu0 %933 }
0x12b7   :  { %v936_v36 = vpop.permute.xlu1 %935  ;;  %v939_v37 = vmul.f32 %v1386_v19, %v934_v35  ;;  %v1037_v19 = vrot.slane %v928_v32, 7 }
0x12b8   :  { %v940_v40 = vmul.f32 %v1388_v2, %v936_v36 }
0x12b9   :  { %v941_v38 = vpack.c.bf16 %v939_v37, %v939_v37 }
0x12ba   :  { %v942_v39 = vpack.c.bf16 %v940_v40, %v940_v40  ;;  %v693_v40 = vld [vmem:[%s1808_s2] sm:$0x4] }
0x12bb   :  { %v945_v41 = vunpack.c.l.b16 %v941_v38 }
0x12bc   :  { %v946_v42 = vunpack.c.l.b16 %v942_v39 }
0x12bd   :  { %v964_v44 = vrot.slane %v945_v41, 6 }
0x12be   :  { %v965_v45 = vrot.slane %v946_v42, 5 }
0x12c0   :  { %v966_v46 = vsel %vm172_vm3, %v965_v45, %v964_v44 }
0x12c1   :  { %v967_v50 = vpack.c.b16 %v966_v46, %v966_v46  ;;  %v958_v46 = vld [vmem:[%s1808_s2] sm:$0x8] }
0x12c3   :  { %968 = vrot.lane.b32.xlu0 %v967_v50, %s1411_s1  ;;  %v961_v50 = vld [vmem:[%s1808_s2 + $0x4] sm:$0x8] }
0x1335   :  { %v969_v51 = vpop.permute.xlu0 %968 }
0x1336   :  { %1271 = vmatmul.mubr.msk.bf16.vlgmr.msra.gmra.mxu1 %vm42_vm2, %v969_v51  ;;  %vm558_vm2 = vsmask.f32 7942 }
0x1337   :  { %vm559_vm3 = vmand %vm425_vm7, %vm558_vm2  ;;  %vm1105_vm7 = vcmask 261127  }
0x13f6   :  { %v1007_v52 = vpop.f32.mrf.mxu1 }
0x13f7   :  { %v1014_v53 = vrot.slane %v1007_v52, 1  ;;  %v1015_v54 = vrot.slane %v1007_v52, 2 }
0x13f8   :  { %v1272_v55 = vpop.f32.mrf.mxu1 }
0x13f9   :  { %v1018_v56 = vadd.f32 %v1469_v11, %v1014_v53  ;;  %v1019_v59 = vadd.f32 %v1467_v8, %v1015_v54 }
0x13fa   :  { %v1010_v60 = vpop.f32.mrf.mxu1 }
0x13fb   :  { %1393 = vtanh.f32 %v1018_v56  ;;  %v1162_v3 = vmul.f32 -1.442695, %v1018_v56  ;;  %v1163_v6 = vmul.f32 -1.442695, %v1019_v59 }
0x13fc   :  { %1395 = vtanh.f32 %v1019_v59  ;;  %v1273_v61 = vpop.f32.mrf.mxu1 }
0x13fd   :  { %1397 = vpow2.f32 %v1162_v3 }
0x13fe   :  { %1399 = vpow2.f32 %v1163_v6 }
0x1408   :  { %v1394_v62 = vpop.eup %1393 }
0x1409   :  { %v1396_v63 = vpop.eup %1395  ;;  %1044 = vrot.lane.b32.xlu1 %v1394_v62, %s1412_s15 }
0x140a   :  { %1046 = vrot.lane.b32.xlu0 %v1396_v63, %s1412_s15  ;;  %v1398_v7 = vpop.eup %1397 }
0x140b   :  { %v1400_v9 = vpop.eup %1399  ;;  %v1026_v10 = vadd.f32 1.0, %v1398_v7 }
0x140c   :  { %v1027_v11 = vadd.f32 1.0, %v1400_v9 }
0x140d   :  { %1401 = vrcp.f32 %v1026_v10 }
0x140e   :  { %1403 = vrcp.f32 %v1027_v11 }
0x141a   :  { %v1402_v8 = vpop.eup %1401 }
0x141b   :  { %v1404_v13 = vpop.eup %1403  ;;  %v1040_v0 = vmul.f32 %v1402_v8, %v1036_v1 }
0x141c   :  { %v1041_v2 = vmul.f32 %v1404_v13, %v1037_v19 }
0x147b   :  { %v1045_v12 = vpop.permute.xlu1 %1044 }
0x147c   :  { %v1047_v14 = vpop.permute.xlu0 %1046  ;;  %v1050_v15 = vmul.f32 %v1402_v8, %v1045_v12 }
0x147d   :  { %v1051_v18 = vmul.f32 %v1404_v13, %v1047_v14 }
0x147e   :  { %1054 = vrot.lane.b32.xlu1 %v1050_v15, %s1411_s1 }
0x147f   :  { %1056 = vrot.lane.b32.xlu0 %v1051_v18, %s1411_s1 }
0x14f0   :  { %v1055_v20 = vpop.permute.xlu1 %1054 }
0x14f1   :  { %v1057_v21 = vpop.permute.xlu0 %1056  ;;  %v1060_v22 = vadd.f32 %v1055_v20, %v1040_v0 }
0x14f2   :  { %v1638_v23 = vadd.f32 %v1057_v21, %v1041_v2 }
0x14f3   :  { %1405 = vtanh.f32 %v1060_v22 }
0x14f4   :  { %1407 = vtanh.f32 %v1638_v23 }
0x1500   :  { %v1406_v24 = vpop.eup %1405 }
0x1501   :  { %v1408_v25 = vpop.eup %1407  ;;  %1066 = vrot.lane.b32.xlu1 %v1406_v24, %s1412_s15 }
0x1502   :  { %1068 = vrot.lane.b32.xlu0 %v1408_v25, %s1412_s15 }
0x1505   :  { %156 = vrot.lane.b32.xlu1 %v1488_v47, %s1411_s1 }
0x1506   :  { %158 = vrot.lane.b32.xlu0 %v1485_v43, %s1411_s1 }
0x1509   :  { %419 = vrot.lane.b32.xlu1 %v1543_v16, %s1411_s1 }
0x150a   :  { %421 = vrot.lane.b32.xlu0 %v1545_v17, %s1411_s1  ;;  %v165_v17 = vld [vmem:[%s1808_s2] sm:$0x1] }
0x150d   :  { %684 = vrot.lane.b32.xlu1 %v1590_v57, %s1411_s1 }
0x150e   :  { %686 = vrot.lane.b32.xlu0 %v1592_v58, %s1411_s1 }
0x1511   :  { %949 = vrot.lane.b32.xlu1 %v941_v38, %s1411_s1  ;;  %v696_v38 = vld [vmem:[%s1808_s2 + $0x4] sm:$0x4] }
0x1512   :  { %951 = vrot.lane.b32.xlu0 %v942_v39, %s1411_s1  ;;  %v1111_v39 = vrot.slane %v1638_v23, 7 }
0x1515   :  { %288 = vrot.lane.b32.xlu1 %v1515_v30, %s1411_s1 }
0x1516   :  { %290 = vrot.lane.b32.xlu0 %v1513_v29, %s1411_s1 }
0x1519   :  { %552 = vrot.lane.b32.xlu1 %v1568_v4, %s1411_s1  ;;  %v168_v4 = vld [vmem:[%s1808_s2 + $0x4] sm:$0x1] }
0x151a   :  { %554 = vrot.lane.b32.xlu0 %v1570_v5, %s1411_s1 }
0x151d   :  { %817 = vrot.lane.b32.xlu1 %v1612_v48, %s1411_s1 }
0x151e   :  { %819 = vrot.lane.b32.xlu0 %v1614_v49, %s1411_s1 }
0x1573   :  { %v1067_v43 = vpop.permute.xlu1 %1066 }
0x1574   :  { %v1069_v47 = vpop.permute.xlu0 %1068  ;;  %v1072_v30 = vmul.f32 %v1402_v8, %v1067_v43 }
0x1575   :  { %v1073_v16 = vmul.f32 %v1404_v13, %v1069_v47 }
0x1576   :  { %1099 = vrot.lane.b32.xlu1 %v1072_v30, %s1411_s1  ;;  %v1180_v58 = vpack.c.bf16 %v1072_v30, %v1072_v30 }
0x1577   :  { %v1181_v5 = vpack.c.bf16 %v1073_v16, %v1073_v16  ;;  %v157_v57 = vpop.permute.xlu1 %156  ;;  %v1098_v32 = vrot.slane %v1073_v16, 7 }
0x1578   :  { %v159_v48 = vpop.permute.xlu0 %158  ;;  %v166_v49 = vsel %vm1670_vm6, %v157_v57, %v165_v17 }
0x1579   :  { %v169_v26 = vsel %vm1670_vm6, %v159_v48, %v168_v4  ;;  %167 = vst [vmem:[%s1808_s2] sm:$0x1] %v166_v49  ;;  %1084 = vrot.lane.b32.xlu0 %v1181_v5, %s1411_s1  ;;  %vm824_vm6 = vmand %vm690_vm10, %vm823_vm5 }
0x157a   :  { %170 = vst [vmem:[%s1808_s2 + $0x4] sm:$0x1] %v169_v26  ;;  %1082 = vrot.lane.b32.xlu1 %v1180_v58, %s1411_s1 }
0x157b   :  { %v420_v33 = vpop.permute.xlu1 %419 }
0x157c   :  { %v422_v34 = vpop.permute.xlu0 %421  ;;  %v429_v35 = vsel %vm1690_vm9, %v420_v33, %v428_v28 }
0x157d   :  { %v432_v36 = vsel %vm1690_vm9, %v422_v34, %v431_v31  ;;  %430 = vst [vmem:[%s1808_s2] sm:$0x2] %v429_v35  ;;  %1101 = vrot.lane.b32.xlu0 %v1098_v32, %s1411_s1  ;;  %vm1089_vm9 = vmand %vm955_vm13, %vm1088_vm8 }
0x157e   :  { %433 = vst [vmem:[%s1808_s2 + $0x4] sm:$0x2] %v432_v36  ;;  %1112 = vrot.lane.b32.xlu1 %v1060_v22, %s1413_s5 }
0x157f   :  { %v685_v41 = vpop.permute.xlu1 %684 }
0x1580   :  { %v687_v42 = vpop.permute.xlu0 %686  ;;  %v694_v44 = vsel %vm1713_vm12, %v685_v41, %v693_v40  ;;  %v296_v55 = vld [vmem:[%s1808_s2] sm:$0x1] }
0x1581   :  { %v697_v45 = vsel %vm1713_vm12, %v687_v42, %v696_v38  ;;  %695 = vst [vmem:[%s1808_s2] sm:$0x4] %v694_v44  ;;  %1114 = vrot.lane.b32.xlu0 %v1111_v39, %s1413_s5  ;;  %v299_v59 = vld [vmem:[%s1808_s2 + $0x4] sm:$0x1] }
0x1582   :  { %698 = vst [vmem:[%s1808_s2 + $0x4] sm:$0x4] %v697_v45 }
0x1583   :  { %v950_v51 = vpop.permute.xlu1 %949 }
0x1584   :  { %v952_v52 = vpop.permute.xlu0 %951  ;;  %v959_v53 = vsel %vm957_vm15, %v950_v51, %v958_v46  ;;  %v560_v63 = vld [vmem:[%s1808_s2] sm:$0x2] }
0x1585   :  { %v962_v54 = vsel %vm957_vm15, %v952_v52, %v961_v50  ;;  %960 = vst [vmem:[%s1808_s2] sm:$0x8] %v959_v53  ;;  %v563_v6 = vld [vmem:[%s1808_s2 + $0x4] sm:$0x2] }
0x1586   :  { %963 = vst [vmem:[%s1808_s2 + $0x4] sm:$0x8] %v962_v54 }
0x1587   :  { %v289_v56 = vpop.permute.xlu1 %288 }
0x1588   :  { %v291_v60 = vpop.permute.xlu0 %290  ;;  %v297_v61 = vsel %vm295_vm1, %v289_v56, %v296_v55  ;;  %v825_v11 = vld [vmem:[%s1808_s2] sm:$0x4] }
0x1589   :  { %v300_v62 = vsel %vm295_vm1, %v291_v60, %v299_v59  ;;  %298 = vst [vmem:[%s1808_s2] sm:$0x1] %v297_v61  ;;  %v828_v12 = vld [vmem:[%s1808_s2 + $0x4] sm:$0x4] }
0x158a   :  { %301 = vst [vmem:[%s1808_s2 + $0x4] sm:$0x1] %v300_v62 }
0x158b   :  { %v553_v3 = vpop.permute.xlu1 %552 }
0x158c   :  { %v555_v7 = vpop.permute.xlu0 %554  ;;  %v561_v9 = vsel %vm559_vm3, %v553_v3, %v560_v63  ;;  %v1090_v2 = vld [vmem:[%s1808_s2] sm:$0x8] }
0x158d   :  { %v564_v10 = vsel %vm559_vm3, %v555_v7, %v563_v6  ;;  %562 = vst [vmem:[%s1808_s2] sm:$0x2] %v561_v9  ;;  %v1093_v1 = vld [vmem:[%s1808_s2 + $0x4] sm:$0x8] }
0x158e   :  { %565 = vst [vmem:[%s1808_s2 + $0x4] sm:$0x2] %v564_v10 }
0x158f   :  { %v818_v8 = vpop.permute.xlu1 %817 }
0x1590   :  { %v820_v13 = vpop.permute.xlu0 %819  ;;  %v826_v14 = vsel %vm824_vm6, %v818_v8, %v825_v11 }
0x1591   :  { %v829_v15 = vsel %vm824_vm6, %v820_v13, %v828_v12  ;;  %827 = vst [vmem:[%s1808_s2] sm:$0x4] %v826_v14 }
0x1592   :  { %830 = vst [vmem:[%s1808_s2 + $0x4] sm:$0x4] %v829_v15 }
0x15e8   :  { %v1100_v18 = vpop.permute.xlu1 %1099 }
0x15e9   :  { %1106 = vst.msk [vmem:[#allocation2 - $0x7] sm:$0x80] %vm1105_vm7, %v1100_v18 }
0x15eb   :  { %v1085_v19 = vpop.permute.xlu0 %1084 }
0x15ec   :  { %v1094_v0 = vsel %vm1089_vm9, %v1085_v19, %v1093_v1  ;;  %v1083_v20 = vpop.permute.xlu1 %1082 }
0x15ed   :  { %1095 = vst [vmem:[%s1808_s2 + $0x4] sm:$0x8] %v1094_v0  ;;  %v1091_v21 = vsel %vm1089_vm9, %v1083_v20, %v1090_v2 }
0x15ee   :  { %1092 = vst [vmem:[%s1808_s2] sm:$0x8] %v1091_v21 }
0x15ef   :  { %v1102_v22 = vpop.permute.xlu0 %1101 }
0x15f0   :  { %1108 = vst.msk [vmem:[#allocation2 + $0x1] sm:$0x1] %vm162_vm4, %v1102_v22  ;;  %v1113_v23 = vpop.permute.xlu1 %1112 }
0x15f1   :  { %1118 = vst.msk [vmem:[#allocation3 - $0x7] sm:$0x80] %vm1105_vm7, %v1113_v23 }
0x15f3   :  { %v1115_v24 = vpop.permute.xlu0 %1114 }
0x15f4   :  { %1119 = vst.msk [vmem:[#allocation3 + $0x1] sm:$0x1] %vm162_vm4, %v1115_v24 }

</bundles_post_ra>
